<compile_context>
chip_gen: v6e
topology: v6e:2x2x1
jax: 0.10.0
libtpu: 0.0.40
codegen_flags: <defaults>
</compile_context>

<pallas_src>
import jax
import jax.numpy as jnp
import numpy as np
from jax.experimental import pallas as pl
from jax.experimental.pallas import tpu as pltpu

C1, C2, K = 32, 64, 3     # conv1 out-ch, conv2 out-ch, kernel size
HIDDEN = 128              # fc1 hidden size


# ----------------------------- fused kernel --------------------------------- #

def cnn_fused_kernel(x_ref, w1_ref, b1_ref, w2_ref, b2_ref,
                     wf1_ref, bf1_ref, wf2_ref, bf2_ref,
                     o_ref, a1_ref, x2_ref, a2_ref, feat_ref):
    # x_ref  : (BT, L, 1) f32     w1_ref : (3, 32) f32     b1_ref: (1, 32) f32
    # w2_ref : (96, 64) bf16      b2_ref : (1, 64) f32
    # wf1_ref: (P2, 64, 128) bf16 bf1_ref: (1, 128) f32
    # wf2_ref: (1, 128) f32       bf2_ref: (1, 1) f32      o_ref : (BT, 1) f32
    # scratch (VMEM, all f32):
    #   a1_ref (L1, 32)  conv1 activations (per element, reused)
    #   x2_ref (L2, 96)  conv2 im2col matrix (per element, reused)
    #   a2_ref (L2, 64)  conv2 activations (per element, reused)
    #   feat_ref (BT*P2, 64)  pooled features for the whole batch tile
    BT = x_ref.shape[0]
    L = x_ref.shape[1]
    L1 = a1_ref.shape[0]          # after conv1
    L2 = x2_ref.shape[0]          # after conv2
    P2 = wf1_ref.shape[0]         # after pool2

    # ---- feature extractor: conv1 -> pool1 -> conv2 -> pool2, per element ----
    # (statically unrolled: BT is small here; use lax.fori_loop at large BT)
    for b in range(BT):
        # conv1: Cin=1 -> 32, k=3, VALID, + ReLU.  The lane broadcast of the
        # single input channel is hoisted out of the k-loop.
        xb = jnp.broadcast_to(x_ref[b], (L, C1))                  # (L, 32)
        acc1 = jnp.zeros((L1, C1), jnp.float32)
        for k in range(K):
            acc1 = acc1 + xb[k:k + L1, :] * w1_ref[k:k + 1, :]    # (L1, 32)
        a1_ref[...] = jnp.maximum(acc1 + b1_ref[...], 0.0)

        # maxpool1 (k=2,s=2) fused into the conv2 im2col build:
        # x2[j, k*32+c] = max(a1[2j+2k, c], a1[2j+2k+1, c])
        for k in range(K):
            lo = a1_ref[pl.ds(2 * k, L2, 2), :]
            hi = a1_ref[pl.ds(2 * k + 1, L2, 2), :]
            x2_ref[:, k * C1:(k + 1) * C1] = jnp.maximum(lo, hi)

        # conv2: 32 -> 64, k=3, VALID, + ReLU as ONE im2col MXU matmul
        # (bf16 operands, f32 accumulation).
        a2 = jnp.dot(x2_ref[...].astype(jnp.bfloat16), w2_ref[...],
                     preferred_element_type=jnp.float32)          # (L2, 64)
        a2_ref[...] = jnp.maximum(a2 + b2_ref[...], 0.0)

        # maxpool2 (vectorized, stride-2 sublane reads) -> feature rows of this
        # element at rows [b*P2, (b+1)*P2) of the tile-wide feature scratch.
        feat_ref[pl.ds(b * P2, P2), :] = jnp.maximum(
            a2_ref[pl.ds(0, P2, 2), :], a2_ref[pl.ds(1, P2, 2), :])

    # ---- fc1 for the whole batch tile ----
    # out[b,h] = sum_t sum_c feat[b,t,c] * wf1_k[t,c,h]; wf1_k encodes PyTorch's
    # channel-major x.view(B,-1) flatten, so this matches fc1 exactly.
    h = jnp.zeros((BT, HIDDEN), jnp.float32)
    for t in range(P2):
        ft = feat_ref[pl.ds(t, BT, P2), :].astype(jnp.bfloat16)   # (BT, 64)
        h = h + jnp.dot(ft, wf1_ref[t],
                        preferred_element_type=jnp.float32)       # (BT, 128)
    h = jnp.maximum(h + bf1_ref[...], 0.0)                        # fc1 + ReLU

    # ---- fc2 (128 -> 1) as VPU multiply + cross-lane reduce, then sigmoid ----
    z = jnp.sum(h * wf2_ref[...], axis=-1, keepdims=True) + bf2_ref[...]  # (BT,1)
    e = jnp.exp(-jnp.abs(z))                                      # stable sigmoid
    o_ref[...] = jnp.where(z >= 0.0, 1.0 / (1.0 + e), e / (1.0 + e))


# ------------------------------- wrapper ------------------------------------- #

def cnn_forward(x_ncw, params, *, batch_tile=8):
    """x_ncw: (B, 1, L) float32, params in PyTorch shapes. Returns (B, 1)."""
    w1, b1, w2, b2, wf1, bf1, wf2, bf2 = params
    B, cin, L = x_ncw.shape
    assert cin == 1
    L1 = L - K + 1          # after conv1
    P1 = L1 // 2            # after pool1
    L2 = P1 - K + 1         # after conv2
    P2 = L2 // 2            # after pool2
    assert wf1.shape == (HIDDEN, C2 * P2)
    BT = min(batch_tile, B)
    assert B % BT == 0, "pad the batch to a multiple of the batch tile"

    # ---- glue: one-time re-layout of inputs / weights for the kernel ----
    x_tc = jnp.transpose(x_ncw, (0, 2, 1))                         # (B, L, 1)
    w1_k = jnp.transpose(w1[:, 0, :], (1, 0))                      # (3, 32)
    b1_k = b1.reshape(1, C1)
    # conv2 im2col weight, bf16 for the MXU: w2_k[k*32+c1, c2] = w2[c2, c1, k]
    w2_k = jnp.transpose(w2, (2, 1, 0)).reshape(K * C1, C2).astype(jnp.bfloat16)
    b2_k = b2.reshape(1, C2)
    # fc1 weight regrouped so slice t is the (C2, HIDDEN) block matching
    # PyTorch's channel-major flatten: wf1_k[t, c, h] = wf1[h, c*P2 + t].
    wf1_k = jnp.transpose(wf1.reshape(HIDDEN, C2, P2),
                          (2, 1, 0)).astype(jnp.bfloat16)          # (P2, 64, 128)
    bf1_k = bf1.reshape(1, HIDDEN)
    wf2_k = wf2.reshape(1, HIDDEN)
    bf2_k = bf2.reshape(1, 1)

    out = pl.pallas_call(
        cnn_fused_kernel,
        out_shape=jax.ShapeDtypeStruct((B, 1), jnp.float32),
        grid=(B // BT,),
        in_specs=[
            pl.BlockSpec((BT, L, 1), lambda i: (i, 0, 0)),
            pl.BlockSpec((K, C1), lambda i: (0, 0)),
            pl.BlockSpec((1, C1), lambda i: (0, 0)),
            pl.BlockSpec((K * C1, C2), lambda i: (0, 0)),
            pl.BlockSpec((1, C2), lambda i: (0, 0)),
            # At the real model size, add pipeline_mode=pl.Buffered(1) here so
            # the constant-index fc1 weight is not double-buffered (v7x VMEM).
            pl.BlockSpec((P2, C2, HIDDEN), lambda i: (0, 0, 0)),
            pl.BlockSpec((1, HIDDEN), lambda i: (0, 0)),
            pl.BlockSpec((1, HIDDEN), lambda i: (0, 0)),
            pl.BlockSpec((1, 1), lambda i: (0, 0)),
        ],
        out_specs=pl.BlockSpec((BT, 1), lambda i: (i, 0)),
        scratch_shapes=[
            pltpu.VMEM((L1, C1), jnp.float32),        # conv1 activations
            pltpu.VMEM((L2, K * C1), jnp.float32),    # conv2 im2col matrix
            pltpu.VMEM((L2, C2), jnp.float32),        # conv2 activations
            pltpu.VMEM((BT * P2, C2), jnp.float32),   # pooled features (tile)
        ],
        compiler_params=pltpu.CompilerParams(
            # "parallel" for portability; on v7x use pltpu.CORE_PARALLEL to
            # shard the batch-tile axis across both TensorCores.
            dimension_semantics=("parallel",)),
    )(x_tc, w1_k, b1_k, w2_k, b2_k, wf1_k, bf1_k, wf2_k, bf2_k)
    return out


# ----------------------- pure-JAX reference (PyTorch semantics) --------------- #

def reference_forward(x, params):
    w1, b1, w2, b2, wf1, bf1, wf2, bf2 = params

    def conv1d(z, w, b):                               # z: (B,Cin,L) w: (Cout,Cin,K)
        kk = w.shape[2]
        lout = z.shape[2] - kk + 1
        out = sum(jnp.einsum('bcl,oc->bol', z[:, :, k:k + lout], w[:, :, k])
                  for k in range(kk))
        return out + b[None, :, None]

    def maxpool(z):
        b_, c_, lc = z.shape
        p = lc // 2
        return z[:, :, :2 * p].reshape(b_, c_, p, 2).max(axis=-1)

    y = maxpool(jnp.maximum(conv1d(x, w1, b1), 0.0))
    y = maxpool(jnp.maximum(conv1d(y, w2, b2), 0.0))
    y = y.reshape(x.shape[0], -1)
    y = jnp.maximum(y @ wf1.T + bf1, 0.0)
    y = y @ wf2.T + bf2
    return jax.nn.sigmoid(y)


# ---------------------------------- main -------------------------------------- #

if __name__ == "__main__":
    B, L = 16, 40         # demo size: fc1 in_features = 64 * 8 = 512
    L1 = L - 2
    P1 = L1 // 2
    L2 = P1 - 2
    P2 = L2 // 2          # = 8

    key = jax.random.PRNGKey(0)
    ks = jax.random.split(key, 9)
    w1 = jax.random.normal(ks[0], (C1, 1, K), jnp.float32) * 0.3
    b1 = jax.random.normal(ks[1], (C1,), jnp.float32) * 0.1
    w2 = jax.random.normal(ks[2], (C2, C1, K), jnp.float32) * 0.1
    b2 = jax.random.normal(ks[3], (C2,), jnp.float32) * 0.1
    wf1 = jax.random.normal(ks[4], (HIDDEN, C2 * P2), jnp.float32) * 0.05
    bf1 = jax.random.normal(ks[5], (HIDDEN,), jnp.float32) * 0.05
    wf2 = jax.random.normal(ks[6], (1, HIDDEN), jnp.float32) * 0.05
    bf2 = jax.random.normal(ks[7], (1,), jnp.float32) * 0.05
    params = (w1, b1, w2, b2, wf1, bf1, wf2, bf2)

    x = jax.random.normal(ks[8], (B, 1, L), jnp.float32)

    out = jax.block_until_ready(cnn_forward(x, params, batch_tile=8))
    ref = jax.block_until_ready(reference_forward(x, params))

    # bf16 MXU operands (f32 accumulation) -> tolerance relaxed vs. pure-f32.
    np.testing.assert_allclose(np.asarray(out), np.asarray(ref),
                               rtol=2e-2, atol=2e-2)
    assert out.shape == (B, 1)
    print("KERNEL_OK")
</pallas_src>

<mosaic_0001>
module attributes {stable_mosaic.version = 11 : i64} {
  func.func @cnn_fused_kernel(%arg0: i32, %arg1: memref<8x40x1xf32, #tpu.memory_space<vmem>>, %arg2: memref<3x32xf32, #tpu.memory_space<vmem>>, %arg3: memref<1x32xf32, #tpu.memory_space<vmem>>, %arg4: memref<96x64xbf16, #tpu.memory_space<vmem>>, %arg5: memref<1x64xf32, #tpu.memory_space<vmem>>, %arg6: memref<8x64x128xbf16, #tpu.memory_space<vmem>>, %arg7: memref<1x128xf32, #tpu.memory_space<vmem>>, %arg8: memref<1x128xf32, #tpu.memory_space<vmem>>, %arg9: memref<1x1xf32, #tpu.memory_space<vmem>>, %arg10: memref<8x1xf32, #tpu.memory_space<vmem>>, %arg11: memref<38x32xf32, #tpu.memory_space<vmem>>, %arg12: memref<17x96xf32, #tpu.memory_space<vmem>>, %arg13: memref<17x64xf32, #tpu.memory_space<vmem>>, %arg14: memref<64x64xf32, #tpu.memory_space<vmem>>) attributes {dimension_semantics = [#tpu.dimension_semantics<parallel>], iteration_bounds = array<i64: 2>, scalar_prefetch = 0 : i64, scratch_operands = 4 : i64, tpu.core_type = #tpu.core_type<tc>, window_params = [{transform_indices = @transform_0, window_bounds = array<i64: 8, 40, 1>}, {pipeline_mode = #tpu.pipeline_mode<synchronous>, transform_indices = @transform_1, window_bounds = array<i64: 3, 32>}, {pipeline_mode = #tpu.pipeline_mode<synchronous>, transform_indices = @transform_2, window_bounds = array<i64: 1, 32>}, {pipeline_mode = #tpu.pipeline_mode<synchronous>, transform_indices = @transform_3, window_bounds = array<i64: 96, 64>}, {pipeline_mode = #tpu.pipeline_mode<synchronous>, transform_indices = @transform_4, window_bounds = array<i64: 1, 64>}, {pipeline_mode = #tpu.pipeline_mode<synchronous>, transform_indices = @transform_5, window_bounds = array<i64: 8, 64, 128>}, {pipeline_mode = #tpu.pipeline_mode<synchronous>, transform_indices = @transform_6, window_bounds = array<i64: 1, 128>}, {pipeline_mode = #tpu.pipeline_mode<synchronous>, transform_indices = @transform_7, window_bounds = array<i64: 1, 128>}, {pipeline_mode = #tpu.pipeline_mode<synchronous>, transform_indices = @transform_8, window_bounds = array<i64: 1, 1>}, {transform_indices = @transform_9, window_bounds = array<i64: 8, 1>}]} {
    %c0 = arith.constant 0 : index
    %c0_0 = arith.constant 0 : index
    %c0_1 = arith.constant 0 : index
    %0 = vector.load %arg1[%c0, %c0_0, %c0_1] : memref<8x40x1xf32, #tpu.memory_space<vmem>>, vector<1x40x1xf32>
    %1 = vector.shape_cast %0 : vector<1x40x1xf32> to vector<40x1xf32>
    %2 = vector.shape_cast %1 : vector<40x1xf32> to vector<40x1xf32>
    %3 = vector.broadcast %2 : vector<40x1xf32> to vector<40x32xf32>
    %cst = arith.constant 0.000000e+00 : f32
    %4 = vector.broadcast %cst : f32 to vector<38x32xf32>
    %5 = vector.extract_strided_slice %3 {offsets = [0, 0], sizes = [38, 32], strides = [1, 1]} : vector<40x32xf32> to vector<38x32xf32>
    %c0_2 = arith.constant 0 : index
    %c0_3 = arith.constant 0 : index
    %6 = vector.load %arg2[%c0_2, %c0_3] : memref<3x32xf32, #tpu.memory_space<vmem>>, vector<1x32xf32>
    %7 = vector.broadcast %6 : vector<1x32xf32> to vector<38x32xf32>
    %8 = arith.mulf %5, %7 : vector<38x32xf32>
    %9 = arith.addf %4, %8 : vector<38x32xf32>
    %10 = vector.extract_strided_slice %3 {offsets = [1, 0], sizes = [38, 32], strides = [1, 1]} : vector<40x32xf32> to vector<38x32xf32>
    %c1 = arith.constant 1 : index
    %c0_4 = arith.constant 0 : index
    %11 = vector.load %arg2[%c1, %c0_4] : memref<3x32xf32, #tpu.memory_space<vmem>>, vector<1x32xf32>
    %12 = vector.broadcast %11 : vector<1x32xf32> to vector<38x32xf32>
    %13 = arith.mulf %10, %12 : vector<38x32xf32>
    %14 = arith.addf %9, %13 : vector<38x32xf32>
    %15 = vector.extract_strided_slice %3 {offsets = [2, 0], sizes = [38, 32], strides = [1, 1]} : vector<40x32xf32> to vector<38x32xf32>
    %c2 = arith.constant 2 : index
    %c0_5 = arith.constant 0 : index
    %16 = vector.load %arg2[%c2, %c0_5] : memref<3x32xf32, #tpu.memory_space<vmem>>, vector<1x32xf32>
    %17 = vector.broadcast %16 : vector<1x32xf32> to vector<38x32xf32>
    %18 = arith.mulf %15, %17 : vector<38x32xf32>
    %19 = arith.addf %14, %18 : vector<38x32xf32>
    %c0_6 = arith.constant 0 : index
    %c0_7 = arith.constant 0 : index
    %20 = vector.load %arg3[%c0_6, %c0_7] : memref<1x32xf32, #tpu.memory_space<vmem>>, vector<1x32xf32>
    %21 = vector.broadcast %20 : vector<1x32xf32> to vector<38x32xf32>
    %22 = arith.addf %19, %21 : vector<38x32xf32>
    %cst_8 = arith.constant 0.000000e+00 : f32
    %23 = vector.broadcast %cst_8 : f32 to vector<38x32xf32>
    %24 = arith.maximumf %22, %23 : vector<38x32xf32>
    %c0_9 = arith.constant 0 : index
    %c0_10 = arith.constant 0 : index
    %25 = vector.load %arg11[%c0_9, %c0_10] : memref<38x32xf32, #tpu.memory_space<vmem>>, vector<38x32xf32>
    tpu.vector_store %arg11[%c0_9, %c0_10], %24 {strides = array<i32>} : memref<38x32xf32, #tpu.memory_space<vmem>>, vector<38x32xf32>,
    %c0_11 = arith.constant 0 : index
    %c0_12 = arith.constant 0 : index
    %26 = tpu.strided_load %arg11[%c0_11, %c0_12] {strides = array<i32: 2, 1>} : memref<38x32xf32, #tpu.memory_space<vmem>>, vector<17x32xf32>
    %c1_13 = arith.constant 1 : index
    %c0_14 = arith.constant 0 : index
    %27 = tpu.strided_load %arg11[%c1_13, %c0_14] {strides = array<i32: 2, 1>} : memref<38x32xf32, #tpu.memory_space<vmem>>, vector<17x32xf32>
    %28 = arith.maximumf %26, %27 : vector<17x32xf32>
    %c0_15 = arith.constant 0 : index
    %c0_16 = arith.constant 0 : index
    %29 = vector.load %arg12[%c0_15, %c0_16] : memref<17x96xf32, #tpu.memory_space<vmem>>, vector<17x32xf32>
    tpu.vector_store %arg12[%c0_15, %c0_16], %28 {strides = array<i32>} : memref<17x96xf32, #tpu.memory_space<vmem>>, vector<17x32xf32>,
    %c2_17 = arith.constant 2 : index
    %c0_18 = arith.constant 0 : index
    %30 = tpu.strided_load %arg11[%c2_17, %c0_18] {strides = array<i32: 2, 1>} : memref<38x32xf32, #tpu.memory_space<vmem>>, vector<17x32xf32>
    %c3 = arith.constant 3 : index
    %c0_19 = arith.constant 0 : index
    %31 = tpu.strided_load %arg11[%c3, %c0_19] {strides = array<i32: 2, 1>} : memref<38x32xf32, #tpu.memory_space<vmem>>, vector<17x32xf32>
    %32 = arith.maximumf %30, %31 : vector<17x32xf32>
    %c0_20 = arith.constant 0 : index
    %c32 = arith.constant 32 : index
    %33 = vector.load %arg12[%c0_20, %c32] : memref<17x96xf32, #tpu.memory_space<vmem>>, vector<17x32xf32>
    tpu.vector_store %arg12[%c0_20, %c32], %32 {strides = array<i32>} : memref<17x96xf32, #tpu.memory_space<vmem>>, vector<17x32xf32>,
    %c4 = arith.constant 4 : index
    %c0_21 = arith.constant 0 : index
    %34 = tpu.strided_load %arg11[%c4, %c0_21] {strides = array<i32: 2, 1>} : memref<38x32xf32, #tpu.memory_space<vmem>>, vector<17x32xf32>
    %c5 = arith.constant 5 : index
    %c0_22 = arith.constant 0 : index
    %35 = tpu.strided_load %arg11[%c5, %c0_22] {strides = array<i32: 2, 1>} : memref<38x32xf32, #tpu.memory_space<vmem>>, vector<17x32xf32>
    %36 = arith.maximumf %34, %35 : vector<17x32xf32>
    %c0_23 = arith.constant 0 : index
    %c64 = arith.constant 64 : index
    %37 = vector.load %arg12[%c0_23, %c64] : memref<17x96xf32, #tpu.memory_space<vmem>>, vector<17x32xf32>
    tpu.vector_store %arg12[%c0_23, %c64], %36 {strides = array<i32>} : memref<17x96xf32, #tpu.memory_space<vmem>>, vector<17x32xf32>,
    %c0_24 = arith.constant 0 : index
    %c0_25 = arith.constant 0 : index
    %38 = vector.load %arg12[%c0_24, %c0_25] : memref<17x96xf32, #tpu.memory_space<vmem>>, vector<17x96xf32>
    %39 = arith.truncf %38 : vector<17x96xf32> to vector<17x96xbf16>
    %c0_26 = arith.constant 0 : index
    %c0_27 = arith.constant 0 : index
    %40 = vector.load %arg4[%c0_26, %c0_27] : memref<96x64xbf16, #tpu.memory_space<vmem>>, vector<96x64xbf16>
    %cst_28 = arith.constant dense<0.000000e+00> : vector<17x64xf32>
    %41 = tpu.matmul %39, %40, %cst_28 {dimension_numbers = #tpu.dot_dimension_numbers<[1], [0], [0], [1], [0, 0, 1, 1], [], []>} : vector<17x96xbf16>, vector<96x64xbf16>, vector<17x64xf32> -> vector<17x64xf32>
    %c0_29 = arith.constant 0 : index
    %c0_30 = arith.constant 0 : index
    %42 = vector.load %arg5[%c0_29, %c0_30] : memref<1x64xf32, #tpu.memory_space<vmem>>, vector<1x64xf32>
    %43 = vector.broadcast %42 : vector<1x64xf32> to vector<17x64xf32>
    %44 = arith.addf %41, %43 : vector<17x64xf32>
    %cst_31 = arith.constant 0.000000e+00 : f32
    %45 = vector.broadcast %cst_31 : f32 to vector<17x64xf32>
    %46 = arith.maximumf %44, %45 : vector<17x64xf32>
    %c0_32 = arith.constant 0 : index
    %c0_33 = arith.constant 0 : index
    %47 = vector.load %arg13[%c0_32, %c0_33] : memref<17x64xf32, #tpu.memory_space<vmem>>, vector<17x64xf32>
    tpu.vector_store %arg13[%c0_32, %c0_33], %46 {strides = array<i32>} : memref<17x64xf32, #tpu.memory_space<vmem>>, vector<17x64xf32>,
    %c0_34 = arith.constant 0 : index
    %c0_35 = arith.constant 0 : index
    %48 = tpu.strided_load %arg13[%c0_34, %c0_35] {strides = array<i32: 2, 1>} : memref<17x64xf32, #tpu.memory_space<vmem>>, vector<8x64xf32>
    %c1_36 = arith.constant 1 : index
    %c0_37 = arith.constant 0 : index
    %49 = tpu.strided_load %arg13[%c1_36, %c0_37] {strides = array<i32: 2, 1>} : memref<17x64xf32, #tpu.memory_space<vmem>>, vector<8x64xf32>
    %50 = arith.maximumf %48, %49 : vector<8x64xf32>
    %c0_38 = arith.constant 0 : index
    %c0_39 = arith.constant 0 : index
    %51 = vector.load %arg14[%c0_38, %c0_39] : memref<64x64xf32, #tpu.memory_space<vmem>>, vector<8x64xf32>
    tpu.vector_store %arg14[%c0_38, %c0_39], %50 {strides = array<i32>} : memref<64x64xf32, #tpu.memory_space<vmem>>, vector<8x64xf32>,
    %c1_40 = arith.constant 1 : index
    %c0_41 = arith.constant 0 : index
    %c0_42 = arith.constant 0 : index
    %52 = vector.load %arg1[%c1_40, %c0_41, %c0_42] : memref<8x40x1xf32, #tpu.memory_space<vmem>>, vector<1x40x1xf32>
    %53 = vector.shape_cast %52 : vector<1x40x1xf32> to vector<40x1xf32>
    %54 = vector.shape_cast %53 : vector<40x1xf32> to vector<40x1xf32>
    %55 = vector.broadcast %54 : vector<40x1xf32> to vector<40x32xf32>
    %cst_43 = arith.constant 0.000000e+00 : f32
    %56 = vector.broadcast %cst_43 : f32 to vector<38x32xf32>
    %57 = vector.extract_strided_slice %55 {offsets = [0, 0], sizes = [38, 32], strides = [1, 1]} : vector<40x32xf32> to vector<38x32xf32>
    %c0_44 = arith.constant 0 : index
    %c0_45 = arith.constant 0 : index
    %58 = vector.load %arg2[%c0_44, %c0_45] : memref<3x32xf32, #tpu.memory_space<vmem>>, vector<1x32xf32>
    %59 = vector.broadcast %58 : vector<1x32xf32> to vector<38x32xf32>
    %60 = arith.mulf %57, %59 : vector<38x32xf32>
    %61 = arith.addf %56, %60 : vector<38x32xf32>
    %62 = vector.extract_strided_slice %55 {offsets = [1, 0], sizes = [38, 32], strides = [1, 1]} : vector<40x32xf32> to vector<38x32xf32>
    %c1_46 = arith.constant 1 : index
    %c0_47 = arith.constant 0 : index
    %63 = vector.load %arg2[%c1_46, %c0_47] : memref<3x32xf32, #tpu.memory_space<vmem>>, vector<1x32xf32>
    %64 = vector.broadcast %63 : vector<1x32xf32> to vector<38x32xf32>
    %65 = arith.mulf %62, %64 : vector<38x32xf32>
    %66 = arith.addf %61, %65 : vector<38x32xf32>
    %67 = vector.extract_strided_slice %55 {offsets = [2, 0], sizes = [38, 32], strides = [1, 1]} : vector<40x32xf32> to vector<38x32xf32>
    %c2_48 = arith.constant 2 : index
    %c0_49 = arith.constant 0 : index
    %68 = vector.load %arg2[%c2_48, %c0_49] : memref<3x32xf32, #tpu.memory_space<vmem>>, vector<1x32xf32>
    %69 = vector.broadcast %68 : vector<1x32xf32> to vector<38x32xf32>
    %70 = arith.mulf %67, %69 : vector<38x32xf32>
    %71 = arith.addf %66, %70 : vector<38x32xf32>
    %c0_50 = arith.constant 0 : index
    %c0_51 = arith.constant 0 : index
    %72 = vector.load %arg3[%c0_50, %c0_51] : memref<1x32xf32, #tpu.memory_space<vmem>>, vector<1x32xf32>
    %73 = vector.broadcast %72 : vector<1x32xf32> to vector<38x32xf32>
    %74 = arith.addf %71, %73 : vector<38x32xf32>
    %cst_52 = arith.constant 0.000000e+00 : f32
    %75 = vector.broadcast %cst_52 : f32 to vector<38x32xf32>
    %76 = arith.maximumf %74, %75 : vector<38x32xf32>
    %c0_53 = arith.constant 0 : index
    %c0_54 = arith.constant 0 : index
    %77 = vector.load %arg11[%c0_53, %c0_54] : memref<38x32xf32, #tpu.memory_space<vmem>>, vector<38x32xf32>
    tpu.vector_store %arg11[%c0_53, %c0_54], %76 {strides = array<i32>} : memref<38x32xf32, #tpu.memory_space<vmem>>, vector<38x32xf32>,
    %c0_55 = arith.constant 0 : index
    %c0_56 = arith.constant 0 : index
    %78 = tpu.strided_load %arg11[%c0_55, %c0_56] {strides = array<i32: 2, 1>} : memref<38x32xf32, #tpu.memory_space<vmem>>, vector<17x32xf32>
    %c1_57 = arith.constant 1 : index
    %c0_58 = arith.constant 0 : index
    %79 = tpu.strided_load %arg11[%c1_57, %c0_58] {strides = array<i32: 2, 1>} : memref<38x32xf32, #tpu.memory_space<vmem>>, vector<17x32xf32>
    %80 = arith.maximumf %78, %79 : vector<17x32xf32>
    %c0_59 = arith.constant 0 : index
    %c0_60 = arith.constant 0 : index
    %81 = vector.load %arg12[%c0_59, %c0_60] : memref<17x96xf32, #tpu.memory_space<vmem>>, vector<17x32xf32>
    tpu.vector_store %arg12[%c0_59, %c0_60], %80 {strides = array<i32>} : memref<17x96xf32, #tpu.memory_space<vmem>>, vector<17x32xf32>,
    %c2_61 = arith.constant 2 : index
    %c0_62 = arith.constant 0 : index
    %82 = tpu.strided_load %arg11[%c2_61, %c0_62] {strides = array<i32: 2, 1>} : memref<38x32xf32, #tpu.memory_space<vmem>>, vector<17x32xf32>
    %c3_63 = arith.constant 3 : index
    %c0_64 = arith.constant 0 : index
    %83 = tpu.strided_load %arg11[%c3_63, %c0_64] {strides = array<i32: 2, 1>} : memref<38x32xf32, #tpu.memory_space<vmem>>, vector<17x32xf32>
    %84 = arith.maximumf %82, %83 : vector<17x32xf32>
    %c0_65 = arith.constant 0 : index
    %c32_66 = arith.constant 32 : index
    %85 = vector.load %arg12[%c0_65, %c32_66] : memref<17x96xf32, #tpu.memory_space<vmem>>, vector<17x32xf32>
    tpu.vector_store %arg12[%c0_65, %c32_66], %84 {strides = array<i32>} : memref<17x96xf32, #tpu.memory_space<vmem>>, vector<17x32xf32>,
    %c4_67 = arith.constant 4 : index
    %c0_68 = arith.constant 0 : index
    %86 = tpu.strided_load %arg11[%c4_67, %c0_68] {strides = array<i32: 2, 1>} : memref<38x32xf32, #tpu.memory_space<vmem>>, vector<17x32xf32>
    %c5_69 = arith.constant 5 : index
    %c0_70 = arith.constant 0 : index
    %87 = tpu.strided_load %arg11[%c5_69, %c0_70] {strides = array<i32: 2, 1>} : memref<38x32xf32, #tpu.memory_space<vmem>>, vector<17x32xf32>
    %88 = arith.maximumf %86, %87 : vector<17x32xf32>
    %c0_71 = arith.constant 0 : index
    %c64_72 = arith.constant 64 : index
    %89 = vector.load %arg12[%c0_71, %c64_72] : memref<17x96xf32, #tpu.memory_space<vmem>>, vector<17x32xf32>
    tpu.vector_store %arg12[%c0_71, %c64_72], %88 {strides = array<i32>} : memref<17x96xf32, #tpu.memory_space<vmem>>, vector<17x32xf32>,
    %c0_73 = arith.constant 0 : index
    %c0_74 = arith.constant 0 : index
    %90 = vector.load %arg12[%c0_73, %c0_74] : memref<17x96xf32, #tpu.memory_space<vmem>>, vector<17x96xf32>
    %91 = arith.truncf %90 : vector<17x96xf32> to vector<17x96xbf16>
    %c0_75 = arith.constant 0 : index
    %c0_76 = arith.constant 0 : index
    %92 = vector.load %arg4[%c0_75, %c0_76] : memref<96x64xbf16, #tpu.memory_space<vmem>>, vector<96x64xbf16>
    %cst_77 = arith.constant dense<0.000000e+00> : vector<17x64xf32>
    %93 = tpu.matmul %91, %92, %cst_77 {dimension_numbers = #tpu.dot_dimension_numbers<[1], [0], [0], [1], [0, 0, 1, 1], [], []>} : vector<17x96xbf16>, vector<96x64xbf16>, vector<17x64xf32> -> vector<17x64xf32>
    %c0_78 = arith.constant 0 : index
    %c0_79 = arith.constant 0 : index
    %94 = vector.load %arg5[%c0_78, %c0_79] : memref<1x64xf32, #tpu.memory_space<vmem>>, vector<1x64xf32>
    %95 = vector.broadcast %94 : vector<1x64xf32> to vector<17x64xf32>
    %96 = arith.addf %93, %95 : vector<17x64xf32>
    %cst_80 = arith.constant 0.000000e+00 : f32
    %97 = vector.broadcast %cst_80 : f32 to vector<17x64xf32>
    %98 = arith.maximumf %96, %97 : vector<17x64xf32>
    %c0_81 = arith.constant 0 : index
    %c0_82 = arith.constant 0 : index
    %99 = vector.load %arg13[%c0_81, %c0_82] : memref<17x64xf32, #tpu.memory_space<vmem>>, vector<17x64xf32>
    tpu.vector_store %arg13[%c0_81, %c0_82], %98 {strides = array<i32>} : memref<17x64xf32, #tpu.memory_space<vmem>>, vector<17x64xf32>,
    %c0_83 = arith.constant 0 : index
    %c0_84 = arith.constant 0 : index
    %100 = tpu.strided_load %arg13[%c0_83, %c0_84] {strides = array<i32: 2, 1>} : memref<17x64xf32, #tpu.memory_space<vmem>>, vector<8x64xf32>
    %c1_85 = arith.constant 1 : index
    %c0_86 = arith.constant 0 : index
    %101 = tpu.strided_load %arg13[%c1_85, %c0_86] {strides = array<i32: 2, 1>} : memref<17x64xf32, #tpu.memory_space<vmem>>, vector<8x64xf32>
    %102 = arith.maximumf %100, %101 : vector<8x64xf32>
    %c8 = arith.constant 8 : index
    %c0_87 = arith.constant 0 : index
    %103 = vector.load %arg14[%c8, %c0_87] : memref<64x64xf32, #tpu.memory_space<vmem>>, vector<8x64xf32>
    tpu.vector_store %arg14[%c8, %c0_87], %102 {strides = array<i32>} : memref<64x64xf32, #tpu.memory_space<vmem>>, vector<8x64xf32>,
    %c2_88 = arith.constant 2 : index
    %c0_89 = arith.constant 0 : index
    %c0_90 = arith.constant 0 : index
    %104 = vector.load %arg1[%c2_88, %c0_89, %c0_90] : memref<8x40x1xf32, #tpu.memory_space<vmem>>, vector<1x40x1xf32>
    %105 = vector.shape_cast %104 : vector<1x40x1xf32> to vector<40x1xf32>
    %106 = vector.shape_cast %105 : vector<40x1xf32> to vector<40x1xf32>
    %107 = vector.broadcast %106 : vector<40x1xf32> to vector<40x32xf32>
    %cst_91 = arith.constant 0.000000e+00 : f32
    %108 = vector.broadcast %cst_91 : f32 to vector<38x32xf32>
    %109 = vector.extract_strided_slice %107 {offsets = [0, 0], sizes = [38, 32], strides = [1, 1]} : vector<40x32xf32> to vector<38x32xf32>
    %c0_92 = arith.constant 0 : index
    %c0_93 = arith.constant 0 : index
    %110 = vector.load %arg2[%c0_92, %c0_93] : memref<3x32xf32, #tpu.memory_space<vmem>>, vector<1x32xf32>
    %111 = vector.broadcast %110 : vector<1x32xf32> to vector<38x32xf32>
    %112 = arith.mulf %109, %111 : vector<38x32xf32>
    %113 = arith.addf %108, %112 : vector<38x32xf32>
    %114 = vector.extract_strided_slice %107 {offsets = [1, 0], sizes = [38, 32], strides = [1, 1]} : vector<40x32xf32> to vector<38x32xf32>
    %c1_94 = arith.constant 1 : index
    %c0_95 = arith.constant 0 : index
    %115 = vector.load %arg2[%c1_94, %c0_95] : memref<3x32xf32, #tpu.memory_space<vmem>>, vector<1x32xf32>
    %116 = vector.broadcast %115 : vector<1x32xf32> to vector<38x32xf32>
    %117 = arith.mulf %114, %116 : vector<38x32xf32>
    %118 = arith.addf %113, %117 : vector<38x32xf32>
    %119 = vector.extract_strided_slice %107 {offsets = [2, 0], sizes = [38, 32], strides = [1, 1]} : vector<40x32xf32> to vector<38x32xf32>
    %c2_96 = arith.constant 2 : index
    %c0_97 = arith.constant 0 : index
    %120 = vector.load %arg2[%c2_96, %c0_97] : memref<3x32xf32, #tpu.memory_space<vmem>>, vector<1x32xf32>
    %121 = vector.broadcast %120 : vector<1x32xf32> to vector<38x32xf32>
    %122 = arith.mulf %119, %121 : vector<38x32xf32>
    %123 = arith.addf %118, %122 : vector<38x32xf32>
    %c0_98 = arith.constant 0 : index
    %c0_99 = arith.constant 0 : index
    %124 = vector.load %arg3[%c0_98, %c0_99] : memref<1x32xf32, #tpu.memory_space<vmem>>, vector<1x32xf32>
    %125 = vector.broadcast %124 : vector<1x32xf32> to vector<38x32xf32>
    %126 = arith.addf %123, %125 : vector<38x32xf32>
    %cst_100 = arith.constant 0.000000e+00 : f32
    %127 = vector.broadcast %cst_100 : f32 to vector<38x32xf32>
    %128 = arith.maximumf %126, %127 : vector<38x32xf32>
    %c0_101 = arith.constant 0 : index
    %c0_102 = arith.constant 0 : index
    %129 = vector.load %arg11[%c0_101, %c0_102] : memref<38x32xf32, #tpu.memory_space<vmem>>, vector<38x32xf32>
    tpu.vector_store %arg11[%c0_101, %c0_102], %128 {strides = array<i32>} : memref<38x32xf32, #tpu.memory_space<vmem>>, vector<38x32xf32>,
    %c0_103 = arith.constant 0 : index
    %c0_104 = arith.constant 0 : index
    %130 = tpu.strided_load %arg11[%c0_103, %c0_104] {strides = array<i32: 2, 1>} : memref<38x32xf32, #tpu.memory_space<vmem>>, vector<17x32xf32>
    %c1_105 = arith.constant 1 : index
    %c0_106 = arith.constant 0 : index
    %131 = tpu.strided_load %arg11[%c1_105, %c0_106] {strides = array<i32: 2, 1>} : memref<38x32xf32, #tpu.memory_space<vmem>>, vector<17x32xf32>
    %132 = arith.maximumf %130, %131 : vector<17x32xf32>
    %c0_107 = arith.constant 0 : index
    %c0_108 = arith.constant 0 : index
    %133 = vector.load %arg12[%c0_107, %c0_108] : memref<17x96xf32, #tpu.memory_space<vmem>>, vector<17x32xf32>
    tpu.vector_store %arg12[%c0_107, %c0_108], %132 {strides = array<i32>} : memref<17x96xf32, #tpu.memory_space<vmem>>, vector<17x32xf32>,
    %c2_109 = arith.constant 2 : index
    %c0_110 = arith.constant 0 : index
    %134 = tpu.strided_load %arg11[%c2_109, %c0_110] {strides = array<i32: 2, 1>} : memref<38x32xf32, #tpu.memory_space<vmem>>, vector<17x32xf32>
    %c3_111 = arith.constant 3 : index
    %c0_112 = arith.constant 0 : index
    %135 = tpu.strided_load %arg11[%c3_111, %c0_112] {strides = array<i32: 2, 1>} : memref<38x32xf32, #tpu.memory_space<vmem>>, vector<17x32xf32>
    %136 = arith.maximumf %134, %135 : vector<17x32xf32>
    %c0_113 = arith.constant 0 : index
    %c32_114 = arith.constant 32 : index
    %137 = vector.load %arg12[%c0_113, %c32_114] : memref<17x96xf32, #tpu.memory_space<vmem>>, vector<17x32xf32>
    tpu.vector_store %arg12[%c0_113, %c32_114], %136 {strides = array<i32>} : memref<17x96xf32, #tpu.memory_space<vmem>>, vector<17x32xf32>,
    %c4_115 = arith.constant 4 : index
    %c0_116 = arith.constant 0 : index
    %138 = tpu.strided_load %arg11[%c4_115, %c0_116] {strides = array<i32: 2, 1>} : memref<38x32xf32, #tpu.memory_space<vmem>>, vector<17x32xf32>
    %c5_117 = arith.constant 5 : index
    %c0_118 = arith.constant 0 : index
    %139 = tpu.strided_load %arg11[%c5_117, %c0_118] {strides = array<i32: 2, 1>} : memref<38x32xf32, #tpu.memory_space<vmem>>, vector<17x32xf32>
    %140 = arith.maximumf %138, %139 : vector<17x32xf32>
    %c0_119 = arith.constant 0 : index
    %c64_120 = arith.constant 64 : index
    %141 = vector.load %arg12[%c0_119, %c64_120] : memref<17x96xf32, #tpu.memory_space<vmem>>, vector<17x32xf32>
    tpu.vector_store %arg12[%c0_119, %c64_120], %140 {strides = array<i32>} : memref<17x96xf32, #tpu.memory_space<vmem>>, vector<17x32xf32>,
    %c0_121 = arith.constant 0 : index
    %c0_122 = arith.constant 0 : index
    %142 = vector.load %arg12[%c0_121, %c0_122] : memref<17x96xf32, #tpu.memory_space<vmem>>, vector<17x96xf32>
    %143 = arith.truncf %142 : vector<17x96xf32> to vector<17x96xbf16>
    %c0_123 = arith.constant 0 : index
    %c0_124 = arith.constant 0 : index
    %144 = vector.load %arg4[%c0_123, %c0_124] : memref<96x64xbf16, #tpu.memory_space<vmem>>, vector<96x64xbf16>
    %cst_125 = arith.constant dense<0.000000e+00> : vector<17x64xf32>
    %145 = tpu.matmul %143, %144, %cst_125 {dimension_numbers = #tpu.dot_dimension_numbers<[1], [0], [0], [1], [0, 0, 1, 1], [], []>} : vector<17x96xbf16>, vector<96x64xbf16>, vector<17x64xf32> -> vector<17x64xf32>
    %c0_126 = arith.constant 0 : index
    %c0_127 = arith.constant 0 : index
    %146 = vector.load %arg5[%c0_126, %c0_127] : memref<1x64xf32, #tpu.memory_space<vmem>>, vector<1x64xf32>
    %147 = vector.broadcast %146 : vector<1x64xf32> to vector<17x64xf32>
    %148 = arith.addf %145, %147 : vector<17x64xf32>
    %cst_128 = arith.constant 0.000000e+00 : f32
    %149 = vector.broadcast %cst_128 : f32 to vector<17x64xf32>
    %150 = arith.maximumf %148, %149 : vector<17x64xf32>
    %c0_129 = arith.constant 0 : index
    %c0_130 = arith.constant 0 : index
    %151 = vector.load %arg13[%c0_129, %c0_130] : memref<17x64xf32, #tpu.memory_space<vmem>>, vector<17x64xf32>
    tpu.vector_store %arg13[%c0_129, %c0_130], %150 {strides = array<i32>} : memref<17x64xf32, #tpu.memory_space<vmem>>, vector<17x64xf32>,
    %c0_131 = arith.constant 0 : index
    %c0_132 = arith.constant 0 : index
    %152 = tpu.strided_load %arg13[%c0_131, %c0_132] {strides = array<i32: 2, 1>} : memref<17x64xf32, #tpu.memory_space<vmem>>, vector<8x64xf32>
    %c1_133 = arith.constant 1 : index
    %c0_134 = arith.constant 0 : index
    %153 = tpu.strided_load %arg13[%c1_133, %c0_134] {strides = array<i32: 2, 1>} : memref<17x64xf32, #tpu.memory_space<vmem>>, vector<8x64xf32>
    %154 = arith.maximumf %152, %153 : vector<8x64xf32>
    %c16 = arith.constant 16 : index
    %c0_135 = arith.constant 0 : index
    %155 = vector.load %arg14[%c16, %c0_135] : memref<64x64xf32, #tpu.memory_space<vmem>>, vector<8x64xf32>
    tpu.vector_store %arg14[%c16, %c0_135], %154 {strides = array<i32>} : memref<64x64xf32, #tpu.memory_space<vmem>>, vector<8x64xf32>,
    %c3_136 = arith.constant 3 : index
    %c0_137 = arith.constant 0 : index
    %c0_138 = arith.constant 0 : index
    %156 = vector.load %arg1[%c3_136, %c0_137, %c0_138] : memref<8x40x1xf32, #tpu.memory_space<vmem>>, vector<1x40x1xf32>
    %157 = vector.shape_cast %156 : vector<1x40x1xf32> to vector<40x1xf32>
    %158 = vector.shape_cast %157 : vector<40x1xf32> to vector<40x1xf32>
    %159 = vector.broadcast %158 : vector<40x1xf32> to vector<40x32xf32>
    %cst_139 = arith.constant 0.000000e+00 : f32
    %160 = vector.broadcast %cst_139 : f32 to vector<38x32xf32>
    %161 = vector.extract_strided_slice %159 {offsets = [0, 0], sizes = [38, 32], strides = [1, 1]} : vector<40x32xf32> to vector<38x32xf32>
    %c0_140 = arith.constant 0 : index
    %c0_141 = arith.constant 0 : index
    %162 = vector.load %arg2[%c0_140, %c0_141] : memref<3x32xf32, #tpu.memory_space<vmem>>, vector<1x32xf32>
    %163 = vector.broadcast %162 : vector<1x32xf32> to vector<38x32xf32>
    %164 = arith.mulf %161, %163 : vector<38x32xf32>
    %165 = arith.addf %160, %164 : vector<38x32xf32>
    %166 = vector.extract_strided_slice %159 {offsets = [1, 0], sizes = [38, 32], strides = [1, 1]} : vector<40x32xf32> to vector<38x32xf32>
    %c1_142 = arith.constant 1 : index
    %c0_143 = arith.constant 0 : index
    %167 = vector.load %arg2[%c1_142, %c0_143] : memref<3x32xf32, #tpu.memory_space<vmem>>, vector<1x32xf32>
    %168 = vector.broadcast %167 : vector<1x32xf32> to vector<38x32xf32>
    %169 = arith.mulf %166, %168 : vector<38x32xf32>
    %170 = arith.addf %165, %169 : vector<38x32xf32>
    %171 = vector.extract_strided_slice %159 {offsets = [2, 0], sizes = [38, 32], strides = [1, 1]} : vector<40x32xf32> to vector<38x32xf32>
    %c2_144 = arith.constant 2 : index
    %c0_145 = arith.constant 0 : index
    %172 = vector.load %arg2[%c2_144, %c0_145] : memref<3x32xf32, #tpu.memory_space<vmem>>, vector<1x32xf32>
    %173 = vector.broadcast %172 : vector<1x32xf32> to vector<38x32xf32>
    %174 = arith.mulf %171, %173 : vector<38x32xf32>
    %175 = arith.addf %170, %174 : vector<38x32xf32>
    %c0_146 = arith.constant 0 : index
    %c0_147 = arith.constant 0 : index
    %176 = vector.load %arg3[%c0_146, %c0_147] : memref<1x32xf32, #tpu.memory_space<vmem>>, vector<1x32xf32>
    %177 = vector.broadcast %176 : vector<1x32xf32> to vector<38x32xf32>
    %178 = arith.addf %175, %177 : vector<38x32xf32>
    %cst_148 = arith.constant 0.000000e+00 : f32
    %179 = vector.broadcast %cst_148 : f32 to vector<38x32xf32>
    %180 = arith.maximumf %178, %179 : vector<38x32xf32>
    %c0_149 = arith.constant 0 : index
    %c0_150 = arith.constant 0 : index
    %181 = vector.load %arg11[%c0_149, %c0_150] : memref<38x32xf32, #tpu.memory_space<vmem>>, vector<38x32xf32>
    tpu.vector_store %arg11[%c0_149, %c0_150], %180 {strides = array<i32>} : memref<38x32xf32, #tpu.memory_space<vmem>>, vector<38x32xf32>,
    %c0_151 = arith.constant 0 : index
    %c0_152 = arith.constant 0 : index
    %182 = tpu.strided_load %arg11[%c0_151, %c0_152] {strides = array<i32: 2, 1>} : memref<38x32xf32, #tpu.memory_space<vmem>>, vector<17x32xf32>
    %c1_153 = arith.constant 1 : index
    %c0_154 = arith.constant 0 : index
    %183 = tpu.strided_load %arg11[%c1_153, %c0_154] {strides = array<i32: 2, 1>} : memref<38x32xf32, #tpu.memory_space<vmem>>, vector<17x32xf32>
    %184 = arith.maximumf %182, %183 : vector<17x32xf32>
    %c0_155 = arith.constant 0 : index
    %c0_156 = arith.constant 0 : index
    %185 = vector.load %arg12[%c0_155, %c0_156] : memref<17x96xf32, #tpu.memory_space<vmem>>, vector<17x32xf32>
    tpu.vector_store %arg12[%c0_155, %c0_156], %184 {strides = array<i32>} : memref<17x96xf32, #tpu.memory_space<vmem>>, vector<17x32xf32>,
    %c2_157 = arith.constant 2 : index
    %c0_158 = arith.constant 0 : index
    %186 = tpu.strided_load %arg11[%c2_157, %c0_158] {strides = array<i32: 2, 1>} : memref<38x32xf32, #tpu.memory_space<vmem>>, vector<17x32xf32>
    %c3_159 = arith.constant 3 : index
    %c0_160 = arith.constant 0 : index
    %187 = tpu.strided_load %arg11[%c3_159, %c0_160] {strides = array<i32: 2, 1>} : memref<38x32xf32, #tpu.memory_space<vmem>>, vector<17x32xf32>
    %188 = arith.maximumf %186, %187 : vector<17x32xf32>
    %c0_161 = arith.constant 0 : index
    %c32_162 = arith.constant 32 : index
    %189 = vector.load %arg12[%c0_161, %c32_162] : memref<17x96xf32, #tpu.memory_space<vmem>>, vector<17x32xf32>
    tpu.vector_store %arg12[%c0_161, %c32_162], %188 {strides = array<i32>} : memref<17x96xf32, #tpu.memory_space<vmem>>, vector<17x32xf32>,
    %c4_163 = arith.constant 4 : index
    %c0_164 = arith.constant 0 : index
    %190 = tpu.strided_load %arg11[%c4_163, %c0_164] {strides = array<i32: 2, 1>} : memref<38x32xf32, #tpu.memory_space<vmem>>, vector<17x32xf32>
    %c5_165 = arith.constant 5 : index
    %c0_166 = arith.constant 0 : index
    %191 = tpu.strided_load %arg11[%c5_165, %c0_166] {strides = array<i32: 2, 1>} : memref<38x32xf32, #tpu.memory_space<vmem>>, vector<17x32xf32>
    %192 = arith.maximumf %190, %191 : vector<17x32xf32>
    %c0_167 = arith.constant 0 : index
    %c64_168 = arith.constant 64 : index
    %193 = vector.load %arg12[%c0_167, %c64_168] : memref<17x96xf32, #tpu.memory_space<vmem>>, vector<17x32xf32>
    tpu.vector_store %arg12[%c0_167, %c64_168], %192 {strides = array<i32>} : memref<17x96xf32, #tpu.memory_space<vmem>>, vector<17x32xf32>,
    %c0_169 = arith.constant 0 : index
    %c0_170 = arith.constant 0 : index
    %194 = vector.load %arg12[%c0_169, %c0_170] : memref<17x96xf32, #tpu.memory_space<vmem>>, vector<17x96xf32>
    %195 = arith.truncf %194 : vector<17x96xf32> to vector<17x96xbf16>
    %c0_171 = arith.constant 0 : index
    %c0_172 = arith.constant 0 : index
    %196 = vector.load %arg4[%c0_171, %c0_172] : memref<96x64xbf16, #tpu.memory_space<vmem>>, vector<96x64xbf16>
    %cst_173 = arith.constant dense<0.000000e+00> : vector<17x64xf32>
    %197 = tpu.matmul %195, %196, %cst_173 {dimension_numbers = #tpu.dot_dimension_numbers<[1], [0], [0], [1], [0, 0, 1, 1], [], []>} : vector<17x96xbf16>, vector<96x64xbf16>, vector<17x64xf32> -> vector<17x64xf32>
    %c0_174 = arith.constant 0 : index
    %c0_175 = arith.constant 0 : index
    %198 = vector.load %arg5[%c0_174, %c0_175] : memref<1x64xf32, #tpu.memory_space<vmem>>, vector<1x64xf32>
    %199 = vector.broadcast %198 : vector<1x64xf32> to vector<17x64xf32>
    %200 = arith.addf %197, %199 : vector<17x64xf32>
    %cst_176 = arith.constant 0.000000e+00 : f32
    %201 = vector.broadcast %cst_176 : f32 to vector<17x64xf32>
    %202 = arith.maximumf %200, %201 : vector<17x64xf32>
    %c0_177 = arith.constant 0 : index
    %c0_178 = arith.constant 0 : index
    %203 = vector.load %arg13[%c0_177, %c0_178] : memref<17x64xf32, #tpu.memory_space<vmem>>, vector<17x64xf32>
    tpu.vector_store %arg13[%c0_177, %c0_178], %202 {strides = array<i32>} : memref<17x64xf32, #tpu.memory_space<vmem>>, vector<17x64xf32>,
    %c0_179 = arith.constant 0 : index
    %c0_180 = arith.constant 0 : index
    %204 = tpu.strided_load %arg13[%c0_179, %c0_180] {strides = array<i32: 2, 1>} : memref<17x64xf32, #tpu.memory_space<vmem>>, vector<8x64xf32>
    %c1_181 = arith.constant 1 : index
    %c0_182 = arith.constant 0 : index
    %205 = tpu.strided_load %arg13[%c1_181, %c0_182] {strides = array<i32: 2, 1>} : memref<17x64xf32, #tpu.memory_space<vmem>>, vector<8x64xf32>
    %206 = arith.maximumf %204, %205 : vector<8x64xf32>
    %c24 = arith.constant 24 : index
    %c0_183 = arith.constant 0 : index
    %207 = vector.load %arg14[%c24, %c0_183] : memref<64x64xf32, #tpu.memory_space<vmem>>, vector<8x64xf32>
    tpu.vector_store %arg14[%c24, %c0_183], %206 {strides = array<i32>} : memref<64x64xf32, #tpu.memory_space<vmem>>, vector<8x64xf32>,
    %c4_184 = arith.constant 4 : index
    %c0_185 = arith.constant 0 : index
    %c0_186 = arith.constant 0 : index
    %208 = vector.load %arg1[%c4_184, %c0_185, %c0_186] : memref<8x40x1xf32, #tpu.memory_space<vmem>>, vector<1x40x1xf32>
    %209 = vector.shape_cast %208 : vector<1x40x1xf32> to vector<40x1xf32>
    %210 = vector.shape_cast %209 : vector<40x1xf32> to vector<40x1xf32>
    %211 = vector.broadcast %210 : vector<40x1xf32> to vector<40x32xf32>
    %cst_187 = arith.constant 0.000000e+00 : f32
    %212 = vector.broadcast %cst_187 : f32 to vector<38x32xf32>
    %213 = vector.extract_strided_slice %211 {offsets = [0, 0], sizes = [38, 32], strides = [1, 1]} : vector<40x32xf32> to vector<38x32xf32>
    %c0_188 = arith.constant 0 : index
    %c0_189 = arith.constant 0 : index
    %214 = vector.load %arg2[%c0_188, %c0_189] : memref<3x32xf32, #tpu.memory_space<vmem>>, vector<1x32xf32>
    %215 = vector.broadcast %214 : vector<1x32xf32> to vector<38x32xf32>
    %216 = arith.mulf %213, %215 : vector<38x32xf32>
    %217 = arith.addf %212, %216 : vector<38x32xf32>
    %218 = vector.extract_strided_slice %211 {offsets = [1, 0], sizes = [38, 32], strides = [1, 1]} : vector<40x32xf32> to vector<38x32xf32>
    %c1_190 = arith.constant 1 : index
    %c0_191 = arith.constant 0 : index
    %219 = vector.load %arg2[%c1_190, %c0_191] : memref<3x32xf32, #tpu.memory_space<vmem>>, vector<1x32xf32>
    %220 = vector.broadcast %219 : vector<1x32xf32> to vector<38x32xf32>
    %221 = arith.mulf %218, %220 : vector<38x32xf32>
    %222 = arith.addf %217, %221 : vector<38x32xf32>
    %223 = vector.extract_strided_slice %211 {offsets = [2, 0], sizes = [38, 32], strides = [1, 1]} : vector<40x32xf32> to vector<38x32xf32>
    %c2_192 = arith.constant 2 : index
    %c0_193 = arith.constant 0 : index
    %224 = vector.load %arg2[%c2_192, %c0_193] : memref<3x32xf32, #tpu.memory_space<vmem>>, vector<1x32xf32>
    %225 = vector.broadcast %224 : vector<1x32xf32> to vector<38x32xf32>
    %226 = arith.mulf %223, %225 : vector<38x32xf32>
    %227 = arith.addf %222, %226 : vector<38x32xf32>
    %c0_194 = arith.constant 0 : index
    %c0_195 = arith.constant 0 : index
    %228 = vector.load %arg3[%c0_194, %c0_195] : memref<1x32xf32, #tpu.memory_space<vmem>>, vector<1x32xf32>
    %229 = vector.broadcast %228 : vector<1x32xf32> to vector<38x32xf32>
    %230 = arith.addf %227, %229 : vector<38x32xf32>
    %cst_196 = arith.constant 0.000000e+00 : f32
    %231 = vector.broadcast %cst_196 : f32 to vector<38x32xf32>
    %232 = arith.maximumf %230, %231 : vector<38x32xf32>
    %c0_197 = arith.constant 0 : index
    %c0_198 = arith.constant 0 : index
    %233 = vector.load %arg11[%c0_197, %c0_198] : memref<38x32xf32, #tpu.memory_space<vmem>>, vector<38x32xf32>
    tpu.vector_store %arg11[%c0_197, %c0_198], %232 {strides = array<i32>} : memref<38x32xf32, #tpu.memory_space<vmem>>, vector<38x32xf32>,
    %c0_199 = arith.constant 0 : index
    %c0_200 = arith.constant 0 : index
    %234 = tpu.strided_load %arg11[%c0_199, %c0_200] {strides = array<i32: 2, 1>} : memref<38x32xf32, #tpu.memory_space<vmem>>, vector<17x32xf32>
    %c1_201 = arith.constant 1 : index
    %c0_202 = arith.constant 0 : index
    %235 = tpu.strided_load %arg11[%c1_201, %c0_202] {strides = array<i32: 2, 1>} : memref<38x32xf32, #tpu.memory_space<vmem>>, vector<17x32xf32>
    %236 = arith.maximumf %234, %235 : vector<17x32xf32>
    %c0_203 = arith.constant 0 : index
    %c0_204 = arith.constant 0 : index
    %237 = vector.load %arg12[%c0_203, %c0_204] : memref<17x96xf32, #tpu.memory_space<vmem>>, vector<17x32xf32>
    tpu.vector_store %arg12[%c0_203, %c0_204], %236 {strides = array<i32>} : memref<17x96xf32, #tpu.memory_space<vmem>>, vector<17x32xf32>,
    %c2_205 = arith.constant 2 : index
    %c0_206 = arith.constant 0 : index
    %238 = tpu.strided_load %arg11[%c2_205, %c0_206] {strides = array<i32: 2, 1>} : memref<38x32xf32, #tpu.memory_space<vmem>>, vector<17x32xf32>
    %c3_207 = arith.constant 3 : index
    %c0_208 = arith.constant 0 : index
    %239 = tpu.strided_load %arg11[%c3_207, %c0_208] {strides = array<i32: 2, 1>} : memref<38x32xf32, #tpu.memory_space<vmem>>, vector<17x32xf32>
    %240 = arith.maximumf %238, %239 : vector<17x32xf32>
    %c0_209 = arith.constant 0 : index
    %c32_210 = arith.constant 32 : index
    %241 = vector.load %arg12[%c0_209, %c32_210] : memref<17x96xf32, #tpu.memory_space<vmem>>, vector<17x32xf32>
    tpu.vector_store %arg12[%c0_209, %c32_210], %240 {strides = array<i32>} : memref<17x96xf32, #tpu.memory_space<vmem>>, vector<17x32xf32>,
    %c4_211 = arith.constant 4 : index
    %c0_212 = arith.constant 0 : index
    %242 = tpu.strided_load %arg11[%c4_211, %c0_212] {strides = array<i32: 2, 1>} : memref<38x32xf32, #tpu.memory_space<vmem>>, vector<17x32xf32>
    %c5_213 = arith.constant 5 : index
    %c0_214 = arith.constant 0 : index
    %243 = tpu.strided_load %arg11[%c5_213, %c0_214] {strides = array<i32: 2, 1>} : memref<38x32xf32, #tpu.memory_space<vmem>>, vector<17x32xf32>
    %244 = arith.maximumf %242, %243 : vector<17x32xf32>
    %c0_215 = arith.constant 0 : index
    %c64_216 = arith.constant 64 : index
    %245 = vector.load %arg12[%c0_215, %c64_216] : memref<17x96xf32, #tpu.memory_space<vmem>>, vector<17x32xf32>
    tpu.vector_store %arg12[%c0_215, %c64_216], %244 {strides = array<i32>} : memref<17x96xf32, #tpu.memory_space<vmem>>, vector<17x32xf32>,
    %c0_217 = arith.constant 0 : index
    %c0_218 = arith.constant 0 : index
    %246 = vector.load %arg12[%c0_217, %c0_218] : memref<17x96xf32, #tpu.memory_space<vmem>>, vector<17x96xf32>
    %247 = arith.truncf %246 : vector<17x96xf32> to vector<17x96xbf16>
    %c0_219 = arith.constant 0 : index
    %c0_220 = arith.constant 0 : index
    %248 = vector.load %arg4[%c0_219, %c0_220] : memref<96x64xbf16, #tpu.memory_space<vmem>>, vector<96x64xbf16>
    %cst_221 = arith.constant dense<0.000000e+00> : vector<17x64xf32>
    %249 = tpu.matmul %247, %248, %cst_221 {dimension_numbers = #tpu.dot_dimension_numbers<[1], [0], [0], [1], [0, 0, 1, 1], [], []>} : vector<17x96xbf16>, vector<96x64xbf16>, vector<17x64xf32> -> vector<17x64xf32>
    %c0_222 = arith.constant 0 : index
    %c0_223 = arith.constant 0 : index
    %250 = vector.load %arg5[%c0_222, %c0_223] : memref<1x64xf32, #tpu.memory_space<vmem>>, vector<1x64xf32>
    %251 = vector.broadcast %250 : vector<1x64xf32> to vector<17x64xf32>
    %252 = arith.addf %249, %251 : vector<17x64xf32>
    %cst_224 = arith.constant 0.000000e+00 : f32
    %253 = vector.broadcast %cst_224 : f32 to vector<17x64xf32>
    %254 = arith.maximumf %252, %253 : vector<17x64xf32>
    %c0_225 = arith.constant 0 : index
    %c0_226 = arith.constant 0 : index
    %255 = vector.load %arg13[%c0_225, %c0_226] : memref<17x64xf32, #tpu.memory_space<vmem>>, vector<17x64xf32>
    tpu.vector_store %arg13[%c0_225, %c0_226], %254 {strides = array<i32>} : memref<17x64xf32, #tpu.memory_space<vmem>>, vector<17x64xf32>,
    %c0_227 = arith.constant 0 : index
    %c0_228 = arith.constant 0 : index
    %256 = tpu.strided_load %arg13[%c0_227, %c0_228] {strides = array<i32: 2, 1>} : memref<17x64xf32, #tpu.memory_space<vmem>>, vector<8x64xf32>
    %c1_229 = arith.constant 1 : index
    %c0_230 = arith.constant 0 : index
    %257 = tpu.strided_load %arg13[%c1_229, %c0_230] {strides = array<i32: 2, 1>} : memref<17x64xf32, #tpu.memory_space<vmem>>, vector<8x64xf32>
    %258 = arith.maximumf %256, %257 : vector<8x64xf32>
    %c32_231 = arith.constant 32 : index
    %c0_232 = arith.constant 0 : index
    %259 = vector.load %arg14[%c32_231, %c0_232] : memref<64x64xf32, #tpu.memory_space<vmem>>, vector<8x64xf32>
    tpu.vector_store %arg14[%c32_231, %c0_232], %258 {strides = array<i32>} : memref<64x64xf32, #tpu.memory_space<vmem>>, vector<8x64xf32>,
    %c5_233 = arith.constant 5 : index
    %c0_234 = arith.constant 0 : index
    %c0_235 = arith.constant 0 : index
    %260 = vector.load %arg1[%c5_233, %c0_234, %c0_235] : memref<8x40x1xf32, #tpu.memory_space<vmem>>, vector<1x40x1xf32>
    %261 = vector.shape_cast %260 : vector<1x40x1xf32> to vector<40x1xf32>
    %262 = vector.shape_cast %261 : vector<40x1xf32> to vector<40x1xf32>
    %263 = vector.broadcast %262 : vector<40x1xf32> to vector<40x32xf32>
    %cst_236 = arith.constant 0.000000e+00 : f32
    %264 = vector.broadcast %cst_236 : f32 to vector<38x32xf32>
    %265 = vector.extract_strided_slice %263 {offsets = [0, 0], sizes = [38, 32], strides = [1, 1]} : vector<40x32xf32> to vector<38x32xf32>
    %c0_237 = arith.constant 0 : index
    %c0_238 = arith.constant 0 : index
    %266 = vector.load %arg2[%c0_237, %c0_238] : memref<3x32xf32, #tpu.memory_space<vmem>>, vector<1x32xf32>
    %267 = vector.broadcast %266 : vector<1x32xf32> to vector<38x32xf32>
    %268 = arith.mulf %265, %267 : vector<38x32xf32>
    %269 = arith.addf %264, %268 : vector<38x32xf32>
    %270 = vector.extract_strided_slice %263 {offsets = [1, 0], sizes = [38, 32], strides = [1, 1]} : vector<40x32xf32> to vector<38x32xf32>
    %c1_239 = arith.constant 1 : index
    %c0_240 = arith.constant 0 : index
    %271 = vector.load %arg2[%c1_239, %c0_240] : memref<3x32xf32, #tpu.memory_space<vmem>>, vector<1x32xf32>
    %272 = vector.broadcast %271 : vector<1x32xf32> to vector<38x32xf32>
    %273 = arith.mulf %270, %272 : vector<38x32xf32>
    %274 = arith.addf %269, %273 : vector<38x32xf32>
    %275 = vector.extract_strided_slice %263 {offsets = [2, 0], sizes = [38, 32], strides = [1, 1]} : vector<40x32xf32> to vector<38x32xf32>
    %c2_241 = arith.constant 2 : index
    %c0_242 = arith.constant 0 : index
    %276 = vector.load %arg2[%c2_241, %c0_242] : memref<3x32xf32, #tpu.memory_space<vmem>>, vector<1x32xf32>
    %277 = vector.broadcast %276 : vector<1x32xf32> to vector<38x32xf32>
    %278 = arith.mulf %275, %277 : vector<38x32xf32>
    %279 = arith.addf %274, %278 : vector<38x32xf32>
    %c0_243 = arith.constant 0 : index
    %c0_244 = arith.constant 0 : index
    %280 = vector.load %arg3[%c0_243, %c0_244] : memref<1x32xf32, #tpu.memory_space<vmem>>, vector<1x32xf32>
    %281 = vector.broadcast %280 : vector<1x32xf32> to vector<38x32xf32>
    %282 = arith.addf %279, %281 : vector<38x32xf32>
    %cst_245 = arith.constant 0.000000e+00 : f32
    %283 = vector.broadcast %cst_245 : f32 to vector<38x32xf32>
    %284 = arith.maximumf %282, %283 : vector<38x32xf32>
    %c0_246 = arith.constant 0 : index
    %c0_247 = arith.constant 0 : index
    %285 = vector.load %arg11[%c0_246, %c0_247] : memref<38x32xf32, #tpu.memory_space<vmem>>, vector<38x32xf32>
    tpu.vector_store %arg11[%c0_246, %c0_247], %284 {strides = array<i32>} : memref<38x32xf32, #tpu.memory_space<vmem>>, vector<38x32xf32>,
    %c0_248 = arith.constant 0 : index
    %c0_249 = arith.constant 0 : index
    %286 = tpu.strided_load %arg11[%c0_248, %c0_249] {strides = array<i32: 2, 1>} : memref<38x32xf32, #tpu.memory_space<vmem>>, vector<17x32xf32>
    %c1_250 = arith.constant 1 : index
    %c0_251 = arith.constant 0 : index
    %287 = tpu.strided_load %arg11[%c1_250, %c0_251] {strides = array<i32: 2, 1>} : memref<38x32xf32, #tpu.memory_space<vmem>>, vector<17x32xf32>
    %288 = arith.maximumf %286, %287 : vector<17x32xf32>
    %c0_252 = arith.constant 0 : index
    %c0_253 = arith.constant 0 : index
    %289 = vector.load %arg12[%c0_252, %c0_253] : memref<17x96xf32, #tpu.memory_space<vmem>>, vector<17x32xf32>
    tpu.vector_store %arg12[%c0_252, %c0_253], %288 {strides = array<i32>} : memref<17x96xf32, #tpu.memory_space<vmem>>, vector<17x32xf32>,
    %c2_254 = arith.constant 2 : index
    %c0_255 = arith.constant 0 : index
    %290 = tpu.strided_load %arg11[%c2_254, %c0_255] {strides = array<i32: 2, 1>} : memref<38x32xf32, #tpu.memory_space<vmem>>, vector<17x32xf32>
    %c3_256 = arith.constant 3 : index
    %c0_257 = arith.constant 0 : index
    %291 = tpu.strided_load %arg11[%c3_256, %c0_257] {strides = array<i32: 2, 1>} : memref<38x32xf32, #tpu.memory_space<vmem>>, vector<17x32xf32>
    %292 = arith.maximumf %290, %291 : vector<17x32xf32>
    %c0_258 = arith.constant 0 : index
    %c32_259 = arith.constant 32 : index
    %293 = vector.load %arg12[%c0_258, %c32_259] : memref<17x96xf32, #tpu.memory_space<vmem>>, vector<17x32xf32>
    tpu.vector_store %arg12[%c0_258, %c32_259], %292 {strides = array<i32>} : memref<17x96xf32, #tpu.memory_space<vmem>>, vector<17x32xf32>,
    %c4_260 = arith.constant 4 : index
    %c0_261 = arith.constant 0 : index
    %294 = tpu.strided_load %arg11[%c4_260, %c0_261] {strides = array<i32: 2, 1>} : memref<38x32xf32, #tpu.memory_space<vmem>>, vector<17x32xf32>
    %c5_262 = arith.constant 5 : index
    %c0_263 = arith.constant 0 : index
    %295 = tpu.strided_load %arg11[%c5_262, %c0_263] {strides = array<i32: 2, 1>} : memref<38x32xf32, #tpu.memory_space<vmem>>, vector<17x32xf32>
    %296 = arith.maximumf %294, %295 : vector<17x32xf32>
    %c0_264 = arith.constant 0 : index
    %c64_265 = arith.constant 64 : index
    %297 = vector.load %arg12[%c0_264, %c64_265] : memref<17x96xf32, #tpu.memory_space<vmem>>, vector<17x32xf32>
    tpu.vector_store %arg12[%c0_264, %c64_265], %296 {strides = array<i32>} : memref<17x96xf32, #tpu.memory_space<vmem>>, vector<17x32xf32>,
    %c0_266 = arith.constant 0 : index
    %c0_267 = arith.constant 0 : index
    %298 = vector.load %arg12[%c0_266, %c0_267] : memref<17x96xf32, #tpu.memory_space<vmem>>, vector<17x96xf32>
    %299 = arith.truncf %298 : vector<17x96xf32> to vector<17x96xbf16>
    %c0_268 = arith.constant 0 : index
    %c0_269 = arith.constant 0 : index
    %300 = vector.load %arg4[%c0_268, %c0_269] : memref<96x64xbf16, #tpu.memory_space<vmem>>, vector<96x64xbf16>
    %cst_270 = arith.constant dense<0.000000e+00> : vector<17x64xf32>
    %301 = tpu.matmul %299, %300, %cst_270 {dimension_numbers = #tpu.dot_dimension_numbers<[1], [0], [0], [1], [0, 0, 1, 1], [], []>} : vector<17x96xbf16>, vector<96x64xbf16>, vector<17x64xf32> -> vector<17x64xf32>
    %c0_271 = arith.constant 0 : index
    %c0_272 = arith.constant 0 : index
    %302 = vector.load %arg5[%c0_271, %c0_272] : memref<1x64xf32, #tpu.memory_space<vmem>>, vector<1x64xf32>
    %303 = vector.broadcast %302 : vector<1x64xf32> to vector<17x64xf32>
    %304 = arith.addf %301, %303 : vector<17x64xf32>
    %cst_273 = arith.constant 0.000000e+00 : f32
    %305 = vector.broadcast %cst_273 : f32 to vector<17x64xf32>
    %306 = arith.maximumf %304, %305 : vector<17x64xf32>
    %c0_274 = arith.constant 0 : index
    %c0_275 = arith.constant 0 : index
    %307 = vector.load %arg13[%c0_274, %c0_275] : memref<17x64xf32, #tpu.memory_space<vmem>>, vector<17x64xf32>
    tpu.vector_store %arg13[%c0_274, %c0_275], %306 {strides = array<i32>} : memref<17x64xf32, #tpu.memory_space<vmem>>, vector<17x64xf32>,
    %c0_276 = arith.constant 0 : index
    %c0_277 = arith.constant 0 : index
    %308 = tpu.strided_load %arg13[%c0_276, %c0_277] {strides = array<i32: 2, 1>} : memref<17x64xf32, #tpu.memory_space<vmem>>, vector<8x64xf32>
    %c1_278 = arith.constant 1 : index
    %c0_279 = arith.constant 0 : index
    %309 = tpu.strided_load %arg13[%c1_278, %c0_279] {strides = array<i32: 2, 1>} : memref<17x64xf32, #tpu.memory_space<vmem>>, vector<8x64xf32>
    %310 = arith.maximumf %308, %309 : vector<8x64xf32>
    %c40 = arith.constant 40 : index
    %c0_280 = arith.constant 0 : index
    %311 = vector.load %arg14[%c40, %c0_280] : memref<64x64xf32, #tpu.memory_space<vmem>>, vector<8x64xf32>
    tpu.vector_store %arg14[%c40, %c0_280], %310 {strides = array<i32>} : memref<64x64xf32, #tpu.memory_space<vmem>>, vector<8x64xf32>,
    %c6 = arith.constant 6 : index
    %c0_281 = arith.constant 0 : index
    %c0_282 = arith.constant 0 : index
    %312 = vector.load %arg1[%c6, %c0_281, %c0_282] : memref<8x40x1xf32, #tpu.memory_space<vmem>>, vector<1x40x1xf32>
    %313 = vector.shape_cast %312 : vector<1x40x1xf32> to vector<40x1xf32>
    %314 = vector.shape_cast %313 : vector<40x1xf32> to vector<40x1xf32>
    %315 = vector.broadcast %314 : vector<40x1xf32> to vector<40x32xf32>
    %cst_283 = arith.constant 0.000000e+00 : f32
    %316 = vector.broadcast %cst_283 : f32 to vector<38x32xf32>
    %317 = vector.extract_strided_slice %315 {offsets = [0, 0], sizes = [38, 32], strides = [1, 1]} : vector<40x32xf32> to vector<38x32xf32>
    %c0_284 = arith.constant 0 : index
    %c0_285 = arith.constant 0 : index
    %318 = vector.load %arg2[%c0_284, %c0_285] : memref<3x32xf32, #tpu.memory_space<vmem>>, vector<1x32xf32>
    %319 = vector.broadcast %318 : vector<1x32xf32> to vector<38x32xf32>
    %320 = arith.mulf %317, %319 : vector<38x32xf32>
    %321 = arith.addf %316, %320 : vector<38x32xf32>
    %322 = vector.extract_strided_slice %315 {offsets = [1, 0], sizes = [38, 32], strides = [1, 1]} : vector<40x32xf32> to vector<38x32xf32>
    %c1_286 = arith.constant 1 : index
    %c0_287 = arith.constant 0 : index
    %323 = vector.load %arg2[%c1_286, %c0_287] : memref<3x32xf32, #tpu.memory_space<vmem>>, vector<1x32xf32>
    %324 = vector.broadcast %323 : vector<1x32xf32> to vector<38x32xf32>
    %325 = arith.mulf %322, %324 : vector<38x32xf32>
    %326 = arith.addf %321, %325 : vector<38x32xf32>
    %327 = vector.extract_strided_slice %315 {offsets = [2, 0], sizes = [38, 32], strides = [1, 1]} : vector<40x32xf32> to vector<38x32xf32>
    %c2_288 = arith.constant 2 : index
    %c0_289 = arith.constant 0 : index
    %328 = vector.load %arg2[%c2_288, %c0_289] : memref<3x32xf32, #tpu.memory_space<vmem>>, vector<1x32xf32>
    %329 = vector.broadcast %328 : vector<1x32xf32> to vector<38x32xf32>
    %330 = arith.mulf %327, %329 : vector<38x32xf32>
    %331 = arith.addf %326, %330 : vector<38x32xf32>
    %c0_290 = arith.constant 0 : index
    %c0_291 = arith.constant 0 : index
    %332 = vector.load %arg3[%c0_290, %c0_291] : memref<1x32xf32, #tpu.memory_space<vmem>>, vector<1x32xf32>
    %333 = vector.broadcast %332 : vector<1x32xf32> to vector<38x32xf32>
    %334 = arith.addf %331, %333 : vector<38x32xf32>
    %cst_292 = arith.constant 0.000000e+00 : f32
    %335 = vector.broadcast %cst_292 : f32 to vector<38x32xf32>
    %336 = arith.maximumf %334, %335 : vector<38x32xf32>
    %c0_293 = arith.constant 0 : index
    %c0_294 = arith.constant 0 : index
    %337 = vector.load %arg11[%c0_293, %c0_294] : memref<38x32xf32, #tpu.memory_space<vmem>>, vector<38x32xf32>
    tpu.vector_store %arg11[%c0_293, %c0_294], %336 {strides = array<i32>} : memref<38x32xf32, #tpu.memory_space<vmem>>, vector<38x32xf32>,
    %c0_295 = arith.constant 0 : index
    %c0_296 = arith.constant 0 : index
    %338 = tpu.strided_load %arg11[%c0_295, %c0_296] {strides = array<i32: 2, 1>} : memref<38x32xf32, #tpu.memory_space<vmem>>, vector<17x32xf32>
    %c1_297 = arith.constant 1 : index
    %c0_298 = arith.constant 0 : index
    %339 = tpu.strided_load %arg11[%c1_297, %c0_298] {strides = array<i32: 2, 1>} : memref<38x32xf32, #tpu.memory_space<vmem>>, vector<17x32xf32>
    %340 = arith.maximumf %338, %339 : vector<17x32xf32>
    %c0_299 = arith.constant 0 : index
    %c0_300 = arith.constant 0 : index
    %341 = vector.load %arg12[%c0_299, %c0_300] : memref<17x96xf32, #tpu.memory_space<vmem>>, vector<17x32xf32>
    tpu.vector_store %arg12[%c0_299, %c0_300], %340 {strides = array<i32>} : memref<17x96xf32, #tpu.memory_space<vmem>>, vector<17x32xf32>,
    %c2_301 = arith.constant 2 : index
    %c0_302 = arith.constant 0 : index
    %342 = tpu.strided_load %arg11[%c2_301, %c0_302] {strides = array<i32: 2, 1>} : memref<38x32xf32, #tpu.memory_space<vmem>>, vector<17x32xf32>
    %c3_303 = arith.constant 3 : index
    %c0_304 = arith.constant 0 : index
    %343 = tpu.strided_load %arg11[%c3_303, %c0_304] {strides = array<i32: 2, 1>} : memref<38x32xf32, #tpu.memory_space<vmem>>, vector<17x32xf32>
    %344 = arith.maximumf %342, %343 : vector<17x32xf32>
    %c0_305 = arith.constant 0 : index
    %c32_306 = arith.constant 32 : index
    %345 = vector.load %arg12[%c0_305, %c32_306] : memref<17x96xf32, #tpu.memory_space<vmem>>, vector<17x32xf32>
    tpu.vector_store %arg12[%c0_305, %c32_306], %344 {strides = array<i32>} : memref<17x96xf32, #tpu.memory_space<vmem>>, vector<17x32xf32>,
    %c4_307 = arith.constant 4 : index
    %c0_308 = arith.constant 0 : index
    %346 = tpu.strided_load %arg11[%c4_307, %c0_308] {strides = array<i32: 2, 1>} : memref<38x32xf32, #tpu.memory_space<vmem>>, vector<17x32xf32>
    %c5_309 = arith.constant 5 : index
    %c0_310 = arith.constant 0 : index
    %347 = tpu.strided_load %arg11[%c5_309, %c0_310] {strides = array<i32: 2, 1>} : memref<38x32xf32, #tpu.memory_space<vmem>>, vector<17x32xf32>
    %348 = arith.maximumf %346, %347 : vector<17x32xf32>
    %c0_311 = arith.constant 0 : index
    %c64_312 = arith.constant 64 : index
    %349 = vector.load %arg12[%c0_311, %c64_312] : memref<17x96xf32, #tpu.memory_space<vmem>>, vector<17x32xf32>
    tpu.vector_store %arg12[%c0_311, %c64_312], %348 {strides = array<i32>} : memref<17x96xf32, #tpu.memory_space<vmem>>, vector<17x32xf32>,
    %c0_313 = arith.constant 0 : index
    %c0_314 = arith.constant 0 : index
    %350 = vector.load %arg12[%c0_313, %c0_314] : memref<17x96xf32, #tpu.memory_space<vmem>>, vector<17x96xf32>
    %351 = arith.truncf %350 : vector<17x96xf32> to vector<17x96xbf16>
    %c0_315 = arith.constant 0 : index
    %c0_316 = arith.constant 0 : index
    %352 = vector.load %arg4[%c0_315, %c0_316] : memref<96x64xbf16, #tpu.memory_space<vmem>>, vector<96x64xbf16>
    %cst_317 = arith.constant dense<0.000000e+00> : vector<17x64xf32>
    %353 = tpu.matmul %351, %352, %cst_317 {dimension_numbers = #tpu.dot_dimension_numbers<[1], [0], [0], [1], [0, 0, 1, 1], [], []>} : vector<17x96xbf16>, vector<96x64xbf16>, vector<17x64xf32> -> vector<17x64xf32>
    %c0_318 = arith.constant 0 : index
    %c0_319 = arith.constant 0 : index
    %354 = vector.load %arg5[%c0_318, %c0_319] : memref<1x64xf32, #tpu.memory_space<vmem>>, vector<1x64xf32>
    %355 = vector.broadcast %354 : vector<1x64xf32> to vector<17x64xf32>
    %356 = arith.addf %353, %355 : vector<17x64xf32>
    %cst_320 = arith.constant 0.000000e+00 : f32
    %357 = vector.broadcast %cst_320 : f32 to vector<17x64xf32>
    %358 = arith.maximumf %356, %357 : vector<17x64xf32>
    %c0_321 = arith.constant 0 : index
    %c0_322 = arith.constant 0 : index
    %359 = vector.load %arg13[%c0_321, %c0_322] : memref<17x64xf32, #tpu.memory_space<vmem>>, vector<17x64xf32>
    tpu.vector_store %arg13[%c0_321, %c0_322], %358 {strides = array<i32>} : memref<17x64xf32, #tpu.memory_space<vmem>>, vector<17x64xf32>,
    %c0_323 = arith.constant 0 : index
    %c0_324 = arith.constant 0 : index
    %360 = tpu.strided_load %arg13[%c0_323, %c0_324] {strides = array<i32: 2, 1>} : memref<17x64xf32, #tpu.memory_space<vmem>>, vector<8x64xf32>
    %c1_325 = arith.constant 1 : index
    %c0_326 = arith.constant 0 : index
    %361 = tpu.strided_load %arg13[%c1_325, %c0_326] {strides = array<i32: 2, 1>} : memref<17x64xf32, #tpu.memory_space<vmem>>, vector<8x64xf32>
    %362 = arith.maximumf %360, %361 : vector<8x64xf32>
    %c48 = arith.constant 48 : index
    %c0_327 = arith.constant 0 : index
    %363 = vector.load %arg14[%c48, %c0_327] : memref<64x64xf32, #tpu.memory_space<vmem>>, vector<8x64xf32>
    tpu.vector_store %arg14[%c48, %c0_327], %362 {strides = array<i32>} : memref<64x64xf32, #tpu.memory_space<vmem>>, vector<8x64xf32>,
    %c7 = arith.constant 7 : index
    %c0_328 = arith.constant 0 : index
    %c0_329 = arith.constant 0 : index
    %364 = vector.load %arg1[%c7, %c0_328, %c0_329] : memref<8x40x1xf32, #tpu.memory_space<vmem>>, vector<1x40x1xf32>
    %365 = vector.shape_cast %364 : vector<1x40x1xf32> to vector<40x1xf32>
    %366 = vector.shape_cast %365 : vector<40x1xf32> to vector<40x1xf32>
    %367 = vector.broadcast %366 : vector<40x1xf32> to vector<40x32xf32>
    %cst_330 = arith.constant 0.000000e+00 : f32
    %368 = vector.broadcast %cst_330 : f32 to vector<38x32xf32>
    %369 = vector.extract_strided_slice %367 {offsets = [0, 0], sizes = [38, 32], strides = [1, 1]} : vector<40x32xf32> to vector<38x32xf32>
    %c0_331 = arith.constant 0 : index
    %c0_332 = arith.constant 0 : index
    %370 = vector.load %arg2[%c0_331, %c0_332] : memref<3x32xf32, #tpu.memory_space<vmem>>, vector<1x32xf32>
    %371 = vector.broadcast %370 : vector<1x32xf32> to vector<38x32xf32>
    %372 = arith.mulf %369, %371 : vector<38x32xf32>
    %373 = arith.addf %368, %372 : vector<38x32xf32>
    %374 = vector.extract_strided_slice %367 {offsets = [1, 0], sizes = [38, 32], strides = [1, 1]} : vector<40x32xf32> to vector<38x32xf32>
    %c1_333 = arith.constant 1 : index
    %c0_334 = arith.constant 0 : index
    %375 = vector.load %arg2[%c1_333, %c0_334] : memref<3x32xf32, #tpu.memory_space<vmem>>, vector<1x32xf32>
    %376 = vector.broadcast %375 : vector<1x32xf32> to vector<38x32xf32>
    %377 = arith.mulf %374, %376 : vector<38x32xf32>
    %378 = arith.addf %373, %377 : vector<38x32xf32>
    %379 = vector.extract_strided_slice %367 {offsets = [2, 0], sizes = [38, 32], strides = [1, 1]} : vector<40x32xf32> to vector<38x32xf32>
    %c2_335 = arith.constant 2 : index
    %c0_336 = arith.constant 0 : index
    %380 = vector.load %arg2[%c2_335, %c0_336] : memref<3x32xf32, #tpu.memory_space<vmem>>, vector<1x32xf32>
    %381 = vector.broadcast %380 : vector<1x32xf32> to vector<38x32xf32>
    %382 = arith.mulf %379, %381 : vector<38x32xf32>
    %383 = arith.addf %378, %382 : vector<38x32xf32>
    %c0_337 = arith.constant 0 : index
    %c0_338 = arith.constant 0 : index
    %384 = vector.load %arg3[%c0_337, %c0_338] : memref<1x32xf32, #tpu.memory_space<vmem>>, vector<1x32xf32>
    %385 = vector.broadcast %384 : vector<1x32xf32> to vector<38x32xf32>
    %386 = arith.addf %383, %385 : vector<38x32xf32>
    %cst_339 = arith.constant 0.000000e+00 : f32
    %387 = vector.broadcast %cst_339 : f32 to vector<38x32xf32>
    %388 = arith.maximumf %386, %387 : vector<38x32xf32>
    %c0_340 = arith.constant 0 : index
    %c0_341 = arith.constant 0 : index
    %389 = vector.load %arg11[%c0_340, %c0_341] : memref<38x32xf32, #tpu.memory_space<vmem>>, vector<38x32xf32>
    tpu.vector_store %arg11[%c0_340, %c0_341], %388 {strides = array<i32>} : memref<38x32xf32, #tpu.memory_space<vmem>>, vector<38x32xf32>,
    %c0_342 = arith.constant 0 : index
    %c0_343 = arith.constant 0 : index
    %390 = tpu.strided_load %arg11[%c0_342, %c0_343] {strides = array<i32: 2, 1>} : memref<38x32xf32, #tpu.memory_space<vmem>>, vector<17x32xf32>
    %c1_344 = arith.constant 1 : index
    %c0_345 = arith.constant 0 : index
    %391 = tpu.strided_load %arg11[%c1_344, %c0_345] {strides = array<i32: 2, 1>} : memref<38x32xf32, #tpu.memory_space<vmem>>, vector<17x32xf32>
    %392 = arith.maximumf %390, %391 : vector<17x32xf32>
    %c0_346 = arith.constant 0 : index
    %c0_347 = arith.constant 0 : index
    %393 = vector.load %arg12[%c0_346, %c0_347] : memref<17x96xf32, #tpu.memory_space<vmem>>, vector<17x32xf32>
    tpu.vector_store %arg12[%c0_346, %c0_347], %392 {strides = array<i32>} : memref<17x96xf32, #tpu.memory_space<vmem>>, vector<17x32xf32>,
    %c2_348 = arith.constant 2 : index
    %c0_349 = arith.constant 0 : index
    %394 = tpu.strided_load %arg11[%c2_348, %c0_349] {strides = array<i32: 2, 1>} : memref<38x32xf32, #tpu.memory_space<vmem>>, vector<17x32xf32>
    %c3_350 = arith.constant 3 : index
    %c0_351 = arith.constant 0 : index
    %395 = tpu.strided_load %arg11[%c3_350, %c0_351] {strides = array<i32: 2, 1>} : memref<38x32xf32, #tpu.memory_space<vmem>>, vector<17x32xf32>
    %396 = arith.maximumf %394, %395 : vector<17x32xf32>
    %c0_352 = arith.constant 0 : index
    %c32_353 = arith.constant 32 : index
    %397 = vector.load %arg12[%c0_352, %c32_353] : memref<17x96xf32, #tpu.memory_space<vmem>>, vector<17x32xf32>
    tpu.vector_store %arg12[%c0_352, %c32_353], %396 {strides = array<i32>} : memref<17x96xf32, #tpu.memory_space<vmem>>, vector<17x32xf32>,
    %c4_354 = arith.constant 4 : index
    %c0_355 = arith.constant 0 : index
    %398 = tpu.strided_load %arg11[%c4_354, %c0_355] {strides = array<i32: 2, 1>} : memref<38x32xf32, #tpu.memory_space<vmem>>, vector<17x32xf32>
    %c5_356 = arith.constant 5 : index
    %c0_357 = arith.constant 0 : index
    %399 = tpu.strided_load %arg11[%c5_356, %c0_357] {strides = array<i32: 2, 1>} : memref<38x32xf32, #tpu.memory_space<vmem>>, vector<17x32xf32>
    %400 = arith.maximumf %398, %399 : vector<17x32xf32>
    %c0_358 = arith.constant 0 : index
    %c64_359 = arith.constant 64 : index
    %401 = vector.load %arg12[%c0_358, %c64_359] : memref<17x96xf32, #tpu.memory_space<vmem>>, vector<17x32xf32>
    tpu.vector_store %arg12[%c0_358, %c64_359], %400 {strides = array<i32>} : memref<17x96xf32, #tpu.memory_space<vmem>>, vector<17x32xf32>,
    %c0_360 = arith.constant 0 : index
    %c0_361 = arith.constant 0 : index
    %402 = vector.load %arg12[%c0_360, %c0_361] : memref<17x96xf32, #tpu.memory_space<vmem>>, vector<17x96xf32>
    %403 = arith.truncf %402 : vector<17x96xf32> to vector<17x96xbf16>
    %c0_362 = arith.constant 0 : index
    %c0_363 = arith.constant 0 : index
    %404 = vector.load %arg4[%c0_362, %c0_363] : memref<96x64xbf16, #tpu.memory_space<vmem>>, vector<96x64xbf16>
    %cst_364 = arith.constant dense<0.000000e+00> : vector<17x64xf32>
    %405 = tpu.matmul %403, %404, %cst_364 {dimension_numbers = #tpu.dot_dimension_numbers<[1], [0], [0], [1], [0, 0, 1, 1], [], []>} : vector<17x96xbf16>, vector<96x64xbf16>, vector<17x64xf32> -> vector<17x64xf32>
    %c0_365 = arith.constant 0 : index
    %c0_366 = arith.constant 0 : index
    %406 = vector.load %arg5[%c0_365, %c0_366] : memref<1x64xf32, #tpu.memory_space<vmem>>, vector<1x64xf32>
    %407 = vector.broadcast %406 : vector<1x64xf32> to vector<17x64xf32>
    %408 = arith.addf %405, %407 : vector<17x64xf32>
    %cst_367 = arith.constant 0.000000e+00 : f32
    %409 = vector.broadcast %cst_367 : f32 to vector<17x64xf32>
    %410 = arith.maximumf %408, %409 : vector<17x64xf32>
    %c0_368 = arith.constant 0 : index
    %c0_369 = arith.constant 0 : index
    %411 = vector.load %arg13[%c0_368, %c0_369] : memref<17x64xf32, #tpu.memory_space<vmem>>, vector<17x64xf32>
    tpu.vector_store %arg13[%c0_368, %c0_369], %410 {strides = array<i32>} : memref<17x64xf32, #tpu.memory_space<vmem>>, vector<17x64xf32>,
    %c0_370 = arith.constant 0 : index
    %c0_371 = arith.constant 0 : index
    %412 = tpu.strided_load %arg13[%c0_370, %c0_371] {strides = array<i32: 2, 1>} : memref<17x64xf32, #tpu.memory_space<vmem>>, vector<8x64xf32>
    %c1_372 = arith.constant 1 : index
    %c0_373 = arith.constant 0 : index
    %413 = tpu.strided_load %arg13[%c1_372, %c0_373] {strides = array<i32: 2, 1>} : memref<17x64xf32, #tpu.memory_space<vmem>>, vector<8x64xf32>
    %414 = arith.maximumf %412, %413 : vector<8x64xf32>
    %c56 = arith.constant 56 : index
    %c0_374 = arith.constant 0 : index
    %415 = vector.load %arg14[%c56, %c0_374] : memref<64x64xf32, #tpu.memory_space<vmem>>, vector<8x64xf32>
    tpu.vector_store %arg14[%c56, %c0_374], %414 {strides = array<i32>} : memref<64x64xf32, #tpu.memory_space<vmem>>, vector<8x64xf32>,
    %cst_375 = arith.constant 0.000000e+00 : f32
    %416 = vector.broadcast %cst_375 : f32 to vector<8x128xf32>
    %c0_376 = arith.constant 0 : index
    %c0_377 = arith.constant 0 : index
    %417 = tpu.strided_load %arg14[%c0_376, %c0_377] {strides = array<i32: 8, 1>} : memref<64x64xf32, #tpu.memory_space<vmem>>, vector<8x64xf32>
    %418 = arith.truncf %417 : vector<8x64xf32> to vector<8x64xbf16>
    %c0_378 = arith.constant 0 : index
    %c0_379 = arith.constant 0 : index
    %c0_380 = arith.constant 0 : index
    %419 = vector.load %arg6[%c0_378, %c0_379, %c0_380] : memref<8x64x128xbf16, #tpu.memory_space<vmem>>, vector<1x64x128xbf16>
    %420 = vector.shape_cast %419 : vector<1x64x128xbf16> to vector<64x128xbf16>
    %cst_381 = arith.constant dense<0.000000e+00> : vector<8x128xf32>
    %421 = tpu.matmul %418, %420, %cst_381 {dimension_numbers = #tpu.dot_dimension_numbers<[1], [0], [0], [1], [0, 0, 1, 1], [], []>} : vector<8x64xbf16>, vector<64x128xbf16>, vector<8x128xf32> -> vector<8x128xf32>
    %422 = arith.addf %416, %421 : vector<8x128xf32>
    %c1_382 = arith.constant 1 : index
    %c0_383 = arith.constant 0 : index
    %423 = tpu.strided_load %arg14[%c1_382, %c0_383] {strides = array<i32: 8, 1>} : memref<64x64xf32, #tpu.memory_space<vmem>>, vector<8x64xf32>
    %424 = arith.truncf %423 : vector<8x64xf32> to vector<8x64xbf16>
    %c1_384 = arith.constant 1 : index
    %c0_385 = arith.constant 0 : index
    %c0_386 = arith.constant 0 : index
    %425 = vector.load %arg6[%c1_384, %c0_385, %c0_386] : memref<8x64x128xbf16, #tpu.memory_space<vmem>>, vector<1x64x128xbf16>
    %426 = vector.shape_cast %425 : vector<1x64x128xbf16> to vector<64x128xbf16>
    %cst_387 = arith.constant dense<0.000000e+00> : vector<8x128xf32>
    %427 = tpu.matmul %424, %426, %cst_387 {dimension_numbers = #tpu.dot_dimension_numbers<[1], [0], [0], [1], [0, 0, 1, 1], [], []>} : vector<8x64xbf16>, vector<64x128xbf16>, vector<8x128xf32> -> vector<8x128xf32>
    %428 = arith.addf %422, %427 : vector<8x128xf32>
    %c2_388 = arith.constant 2 : index
    %c0_389 = arith.constant 0 : index
    %429 = tpu.strided_load %arg14[%c2_388, %c0_389] {strides = array<i32: 8, 1>} : memref<64x64xf32, #tpu.memory_space<vmem>>, vector<8x64xf32>
    %430 = arith.truncf %429 : vector<8x64xf32> to vector<8x64xbf16>
    %c2_390 = arith.constant 2 : index
    %c0_391 = arith.constant 0 : index
    %c0_392 = arith.constant 0 : index
    %431 = vector.load %arg6[%c2_390, %c0_391, %c0_392] : memref<8x64x128xbf16, #tpu.memory_space<vmem>>, vector<1x64x128xbf16>
    %432 = vector.shape_cast %431 : vector<1x64x128xbf16> to vector<64x128xbf16>
    %cst_393 = arith.constant dense<0.000000e+00> : vector<8x128xf32>
    %433 = tpu.matmul %430, %432, %cst_393 {dimension_numbers = #tpu.dot_dimension_numbers<[1], [0], [0], [1], [0, 0, 1, 1], [], []>} : vector<8x64xbf16>, vector<64x128xbf16>, vector<8x128xf32> -> vector<8x128xf32>
    %434 = arith.addf %428, %433 : vector<8x128xf32>
    %c3_394 = arith.constant 3 : index
    %c0_395 = arith.constant 0 : index
    %435 = tpu.strided_load %arg14[%c3_394, %c0_395] {strides = array<i32: 8, 1>} : memref<64x64xf32, #tpu.memory_space<vmem>>, vector<8x64xf32>
    %436 = arith.truncf %435 : vector<8x64xf32> to vector<8x64xbf16>
    %c3_396 = arith.constant 3 : index
    %c0_397 = arith.constant 0 : index
    %c0_398 = arith.constant 0 : index
    %437 = vector.load %arg6[%c3_396, %c0_397, %c0_398] : memref<8x64x128xbf16, #tpu.memory_space<vmem>>, vector<1x64x128xbf16>
    %438 = vector.shape_cast %437 : vector<1x64x128xbf16> to vector<64x128xbf16>
    %cst_399 = arith.constant dense<0.000000e+00> : vector<8x128xf32>
    %439 = tpu.matmul %436, %438, %cst_399 {dimension_numbers = #tpu.dot_dimension_numbers<[1], [0], [0], [1], [0, 0, 1, 1], [], []>} : vector<8x64xbf16>, vector<64x128xbf16>, vector<8x128xf32> -> vector<8x128xf32>
    %440 = arith.addf %434, %439 : vector<8x128xf32>
    %c4_400 = arith.constant 4 : index
    %c0_401 = arith.constant 0 : index
    %441 = tpu.strided_load %arg14[%c4_400, %c0_401] {strides = array<i32: 8, 1>} : memref<64x64xf32, #tpu.memory_space<vmem>>, vector<8x64xf32>
    %442 = arith.truncf %441 : vector<8x64xf32> to vector<8x64xbf16>
    %c4_402 = arith.constant 4 : index
    %c0_403 = arith.constant 0 : index
    %c0_404 = arith.constant 0 : index
    %443 = vector.load %arg6[%c4_402, %c0_403, %c0_404] : memref<8x64x128xbf16, #tpu.memory_space<vmem>>, vector<1x64x128xbf16>
    %444 = vector.shape_cast %443 : vector<1x64x128xbf16> to vector<64x128xbf16>
    %cst_405 = arith.constant dense<0.000000e+00> : vector<8x128xf32>
    %445 = tpu.matmul %442, %444, %cst_405 {dimension_numbers = #tpu.dot_dimension_numbers<[1], [0], [0], [1], [0, 0, 1, 1], [], []>} : vector<8x64xbf16>, vector<64x128xbf16>, vector<8x128xf32> -> vector<8x128xf32>
    %446 = arith.addf %440, %445 : vector<8x128xf32>
    %c5_406 = arith.constant 5 : index
    %c0_407 = arith.constant 0 : index
    %447 = tpu.strided_load %arg14[%c5_406, %c0_407] {strides = array<i32: 8, 1>} : memref<64x64xf32, #tpu.memory_space<vmem>>, vector<8x64xf32>
    %448 = arith.truncf %447 : vector<8x64xf32> to vector<8x64xbf16>
    %c5_408 = arith.constant 5 : index
    %c0_409 = arith.constant 0 : index
    %c0_410 = arith.constant 0 : index
    %449 = vector.load %arg6[%c5_408, %c0_409, %c0_410] : memref<8x64x128xbf16, #tpu.memory_space<vmem>>, vector<1x64x128xbf16>
    %450 = vector.shape_cast %449 : vector<1x64x128xbf16> to vector<64x128xbf16>
    %cst_411 = arith.constant dense<0.000000e+00> : vector<8x128xf32>
    %451 = tpu.matmul %448, %450, %cst_411 {dimension_numbers = #tpu.dot_dimension_numbers<[1], [0], [0], [1], [0, 0, 1, 1], [], []>} : vector<8x64xbf16>, vector<64x128xbf16>, vector<8x128xf32> -> vector<8x128xf32>
    %452 = arith.addf %446, %451 : vector<8x128xf32>
    %c6_412 = arith.constant 6 : index
    %c0_413 = arith.constant 0 : index
    %453 = tpu.strided_load %arg14[%c6_412, %c0_413] {strides = array<i32: 8, 1>} : memref<64x64xf32, #tpu.memory_space<vmem>>, vector<8x64xf32>
    %454 = arith.truncf %453 : vector<8x64xf32> to vector<8x64xbf16>
    %c6_414 = arith.constant 6 : index
    %c0_415 = arith.constant 0 : index
    %c0_416 = arith.constant 0 : index
    %455 = vector.load %arg6[%c6_414, %c0_415, %c0_416] : memref<8x64x128xbf16, #tpu.memory_space<vmem>>, vector<1x64x128xbf16>
    %456 = vector.shape_cast %455 : vector<1x64x128xbf16> to vector<64x128xbf16>
    %cst_417 = arith.constant dense<0.000000e+00> : vector<8x128xf32>
    %457 = tpu.matmul %454, %456, %cst_417 {dimension_numbers = #tpu.dot_dimension_numbers<[1], [0], [0], [1], [0, 0, 1, 1], [], []>} : vector<8x64xbf16>, vector<64x128xbf16>, vector<8x128xf32> -> vector<8x128xf32>
    %458 = arith.addf %452, %457 : vector<8x128xf32>
    %c7_418 = arith.constant 7 : index
    %c0_419 = arith.constant 0 : index
    %459 = tpu.strided_load %arg14[%c7_418, %c0_419] {strides = array<i32: 8, 1>} : memref<64x64xf32, #tpu.memory_space<vmem>>, vector<8x64xf32>
    %460 = arith.truncf %459 : vector<8x64xf32> to vector<8x64xbf16>
    %c7_420 = arith.constant 7 : index
    %c0_421 = arith.constant 0 : index
    %c0_422 = arith.constant 0 : index
    %461 = vector.load %arg6[%c7_420, %c0_421, %c0_422] : memref<8x64x128xbf16, #tpu.memory_space<vmem>>, vector<1x64x128xbf16>
    %462 = vector.shape_cast %461 : vector<1x64x128xbf16> to vector<64x128xbf16>
    %cst_423 = arith.constant dense<0.000000e+00> : vector<8x128xf32>
    %463 = tpu.matmul %460, %462, %cst_423 {dimension_numbers = #tpu.dot_dimension_numbers<[1], [0], [0], [1], [0, 0, 1, 1], [], []>} : vector<8x64xbf16>, vector<64x128xbf16>, vector<8x128xf32> -> vector<8x128xf32>
    %464 = arith.addf %458, %463 : vector<8x128xf32>
    %c0_424 = arith.constant 0 : index
    %c0_425 = arith.constant 0 : index
    %465 = vector.load %arg7[%c0_424, %c0_425] : memref<1x128xf32, #tpu.memory_space<vmem>>, vector<1x128xf32>
    %466 = vector.broadcast %465 : vector<1x128xf32> to vector<8x128xf32>
    %467 = arith.addf %464, %466 : vector<8x128xf32>
    %cst_426 = arith.constant 0.000000e+00 : f32
    %468 = vector.broadcast %cst_426 : f32 to vector<8x128xf32>
    %469 = arith.maximumf %467, %468 : vector<8x128xf32>
    %c0_427 = arith.constant 0 : index
    %c0_428 = arith.constant 0 : index
    %470 = vector.load %arg8[%c0_427, %c0_428] : memref<1x128xf32, #tpu.memory_space<vmem>>, vector<1x128xf32>
    %471 = vector.broadcast %470 : vector<1x128xf32> to vector<8x128xf32>
    %472 = arith.mulf %469, %471 : vector<8x128xf32>
    %cst_429 = arith.constant dense<0.000000e+00> : vector<8xf32>
    %473 = vector.multi_reduction <add>, %472, %cst_429 [1] : vector<8x128xf32> to vector<8xf32>
    %474 = vector.shape_cast %473 : vector<8xf32> to vector<8x1xf32>
    %c0_430 = arith.constant 0 : index
    %c0_431 = arith.constant 0 : index
    %475 = vector.load %arg9[%c0_430, %c0_431] : memref<1x1xf32, #tpu.memory_space<vmem>>, vector<1x1xf32>
    %476 = vector.broadcast %475 : vector<1x1xf32> to vector<8x1xf32>
    %477 = arith.addf %474, %476 : vector<8x1xf32>
    %478 = math.absf %477 : vector<8x1xf32>
    %cst_432 = arith.constant 0.000000e+00 : f32
    %479 = vector.broadcast %cst_432 : f32 to vector<8x1xf32>
    %480 = arith.subf %479, %478 : vector<8x1xf32>
    %481 = math.exp %480 : vector<8x1xf32>
    %cst_433 = arith.constant 0.000000e+00 : f32
    %482 = vector.broadcast %cst_433 : f32 to vector<8x1xf32>
    %483 = arith.cmpf oge, %477, %482 : vector<8x1xf32>
    %cst_434 = arith.constant 1.000000e+00 : f32
    %484 = vector.broadcast %cst_434 : f32 to vector<8x1xf32>
    %485 = arith.addf %484, %481 : vector<8x1xf32>
    %cst_435 = arith.constant 1.000000e+00 : f32
    %486 = vector.broadcast %cst_435 : f32 to vector<8x1xf32>
    %487 = arith.divf %486, %485 : vector<8x1xf32>
    %cst_436 = arith.constant 1.000000e+00 : f32
    %488 = vector.broadcast %cst_436 : f32 to vector<8x1xf32>
    %489 = arith.addf %488, %481 : vector<8x1xf32>
    %490 = arith.divf %481, %489 : vector<8x1xf32>
    %491 = arith.select %483, %487, %490 : vector<8x1xi1>, vector<8x1xf32>
    %c0_437 = arith.constant 0 : index
    %c0_438 = arith.constant 0 : index
    %492 = vector.load %arg10[%c0_437, %c0_438] : memref<8x1xf32, #tpu.memory_space<vmem>>, vector<8x1xf32>
    tpu.vector_store %arg10[%c0_437, %c0_438], %491 {strides = array<i32>} : memref<8x1xf32, #tpu.memory_space<vmem>>, vector<8x1xf32>,
    return
  }
  func.func @transform_0(%arg0: i32) -> (i32, i32, i32) {
    %c0_i32 = arith.constant 0 : i32
    %c0_i32_0 = arith.constant 0 : i32
    %c0_i32_1 = arith.constant 0 : i32
    return %arg0, %c0_i32, %c0_i32_0 : i32, i32, i32
  }
  func.func @transform_1(%arg0: i32) -> (i32, i32) {
    %c0_i32 = arith.constant 0 : i32
    %c0_i32_0 = arith.constant 0 : i32
    %c0_i32_1 = arith.constant 0 : i32
    return %c0_i32, %c0_i32_0 : i32, i32
  }
  func.func @transform_2(%arg0: i32) -> (i32, i32) {
    %c0_i32 = arith.constant 0 : i32
    %c0_i32_0 = arith.constant 0 : i32
    %c0_i32_1 = arith.constant 0 : i32
    return %c0_i32, %c0_i32_0 : i32, i32
  }
  func.func @transform_3(%arg0: i32) -> (i32, i32) {
    %c0_i32 = arith.constant 0 : i32
    %c0_i32_0 = arith.constant 0 : i32
    %c0_i32_1 = arith.constant 0 : i32
    return %c0_i32, %c0_i32_0 : i32, i32
  }
  func.func @transform_4(%arg0: i32) -> (i32, i32) {
    %c0_i32 = arith.constant 0 : i32
    %c0_i32_0 = arith.constant 0 : i32
    %c0_i32_1 = arith.constant 0 : i32
    return %c0_i32, %c0_i32_0 : i32, i32
  }
  func.func @transform_5(%arg0: i32) -> (i32, i32, i32) {
    %c0_i32 = arith.constant 0 : i32
    %c0_i32_0 = arith.constant 0 : i32
    %c0_i32_1 = arith.constant 0 : i32
    %c0_i32_2 = arith.constant 0 : i32
    return %c0_i32, %c0_i32_0, %c0_i32_1 : i32, i32, i32
  }
  func.func @transform_6(%arg0: i32) -> (i32, i32) {
    %c0_i32 = arith.constant 0 : i32
    %c0_i32_0 = arith.constant 0 : i32
    %c0_i32_1 = arith.constant 0 : i32
    return %c0_i32, %c0_i32_0 : i32, i32
  }
  func.func @transform_7(%arg0: i32) -> (i32, i32) {
    %c0_i32 = arith.constant 0 : i32
    %c0_i32_0 = arith.constant 0 : i32
    %c0_i32_1 = arith.constant 0 : i32
    return %c0_i32, %c0_i32_0 : i32, i32
  }
  func.func @transform_8(%arg0: i32) -> (i32, i32) {
    %c0_i32 = arith.constant 0 : i32
    %c0_i32_0 = arith.constant 0 : i32
    %c0_i32_1 = arith.constant 0 : i32
    return %c0_i32, %c0_i32_0 : i32, i32
  }
  func.func @transform_9(%arg0: i32) -> (i32, i32) {
    %c0_i32 = arith.constant 0 : i32
    %c0_i32_0 = arith.constant 0 : i32
    return %arg0, %c0_i32 : i32, i32
  }
}

</mosaic_0001>

<bundles_post_ra>
// kernel: tpu_custom_call.1
= control target key start
LH: loop header
LB: loop body
LE: loop exit
PB: predicated region body
PF: predicated region fallthrough
CT: control target
= control target key end

     0   :  { %s4416_s11 = smov 0   ;;  %s5831_s0 = inlined_call_operand.vmem [shape: f32[16,40,1], index: 0, kind: input, shape index: {}]   ;;  %s5832_s1 = inlined_call_operand.vmem [shape: f32[3,32], index: 1, kind: input, shape index: {}]   ;;  %s5833_s2 = inlined_call_operand.vmem [shape: f32[1,32], index: 2, kind: input, shape index: {}]   ;;  %s5834_s3 = inlined_call_operand.vmem [shape: bf16[96,64], index: 3, kind: input, shape index: {}]   ;;  %s5835_s4 = inlined_call_operand.vmem [shape: f32[1,64], index: 4, kind: input, shape index: {}]   ;;  %s5836_s5 = inlined_call_operand.vmem [shape: bf16[8,64,128], index: 5, kind: input, shape index: {}]   ;;  %s5837_s6 = inlined_call_operand.vmem [shape: f32[1,128], index: 6, kind: input, shape index: {}]   ;;  %s5838_s7 = inlined_call_operand.vmem [shape: f32[1,128], index: 7, kind: input, shape index: {}]   ;;  %s5839_s8 = inlined_call_operand.<no memory space> [shape: f32[1,1], index: 8, kind: input, shape index: {}]   ;;  %s5840_s9 = inlined_call_operand.vmem [shape: f32[16,1], index: 9, kind: output, shape index: {}]  }
   0x1   :  { %v14_v0 = vstv %s5839_s8 }
   0x2   :  { %15 = vst [vmem:[#allocation6] sm:$0x1] %v14_v0 }
   0x3 LB: > { %s4422_s12 = sadd.s32 4294967295, %s4356_s11   ;;  %p3676_p0 = scmp.ge.s32.totalorder %s4356_s11, 1  ;;  %s4356_s11 = sphi %s4416_s11, %s21_s11  }
   0x4   : > { %p291_p1 = scmp.lt.s32.totalorder %s4356_s11, 3 }
   0x6   : > { %p292_p2 = pnand %p3676_p0, %p291_p1 }
   0x8   : > { %295 = sbr.rel (%p292_p2) target bundleno = 1089 (0x441), region = 56 }
   0xd   : > { %s3677_s13 = sshll.u32 %s4422_s12, 3  ;;  %v4358_v1 = vmov 0   ;;  %v4475_v42 = vld [vmem:[%s5832_s1 + $0x1] ss:$0 sm:$0xff]  ;;  %v4480_v43 = vld [vmem:[%s5832_s1 + $0x2] ss:$0 sm:$0xff] }
   0xe   : > { %4263 = vset.pattern.permute.xlu1 %v4358_v1  ;;  %4262 = vset.pattern.permute.xlu0 %v4358_v1  ;;  %p328_p3 = scmp.lt.s32.totalorder %s3677_s13, 15  ;;  %v4488_v49 = vld [vmem:[%s5832_s1] ss:$0 sm:$0xff]  ;;  %vm399_vm0 = vcmask 1046528   ;;  %vm434_vm1 = vcmask 1045504   ;;  %vm471_vm2 = vcmask 261120  }
   0xf   : > { %vm476_vm3 = vcmask 259072   ;;  %s4359_s17 = smov 64   ;;  %s4360_s18 = smov 32   ;;  %vm494_vm4 = vcmask 253952   ;;  %vm526_vm5 = vcmask 516352   ;;  %vm558_vm6 = vcmask 778752  }
  0x10   : > { %s5922_s13 = smov (!%p328_p3, %s3677_s13), 15  ;;  %vm523_vm7 = vcmask 523520   ;;  %vm555_vm8 = vcmask 785920   ;;  %vm620_vm9 = vcmask 785408   ;;  %vm4362_vm10 = vmmov 0   ;;  %p334_p4 = scmp.lt.s32.totalorder %s4422_s12, 1 }
  0x11   : > { %s4248_s8 = smul.u32 40, %s5922_s13  ;;  %vm678_vm11 = vcmask 523264   ;;  %vm3617_vm12 = vcmask 7168  }
  0x12   : > { %s5924_s12 = smov (!%p334_p4, %s4422_s12), 1 }
  0x13   : > { %s4430_s16 = scalar_lea.vmem %s5831_s0, %s4248_s8 }
  0x14   : > { %v341_v2 = vld [vmem:[%s4430_s16 + $0x10] sm:$0xff]  ;;  %v339_v3 = vld [vmem:[%s4430_s16] sm:$0xff]  ;;  %v342_v4 = vld [vmem:[%s4430_s16 + $0x18] sm:$0xff] }
  0x15   : > { %356 = vperm.xlu1 %4263, %v341_v2   ;;  %346 = vperm.xlu0 %4262, %v339_v3   ;;  %v340_v5 = vld [vmem:[%s4430_s16 + $0x8] sm:$0xff]  ;;  %v343_v7 = vld [vmem:[%s4430_s16 + $0x20] sm:$0xff]  ;;  %v3695_v8 = vld [vmem:[%s4430_s16 + $0x38] sm:$0xff] }
  0x16   : > { %v3693_v6 = vld [vmem:[%s4430_s16 + $0x28] sm:$0xff]  ;;  %v3694_v9 = vld [vmem:[%s4430_s16 + $0x30] sm:$0xff]  ;;  %v3696_v11 = vld [vmem:[%s4430_s16 + $0x40] sm:$0xff] }
  0x17   : > { %v3697_v10 = vld [vmem:[%s4430_s16 + $0x48] sm:$0xff]  ;;  %v3712_v12 = vld [vmem:[%s4430_s16 + $0x58] sm:$0xff]  ;;  %v3711_v13 = vld [vmem:[%s4430_s16 + $0x50] sm:$0xff] }
  0x18   : > { %v3714_v14 = vld [vmem:[%s4430_s16 + $0x68] sm:$0xff]  ;;  %v3713_v15 = vld [vmem:[%s4430_s16 + $0x60] sm:$0xff]  ;;  %v3729_v16 = vld [vmem:[%s4430_s16 + $0x78] sm:$0xff] }
  0x19   : > { %361 = vperm.xlu1 %4263, %v342_v4   ;;  %351 = vperm.xlu0 %4262, %v340_v5   ;;  %v3715_v17 = vld [vmem:[%s4430_s16 + $0x70] sm:$0xff]  ;;  %v3731_v18 = vld [vmem:[%s4430_s16 + $0x88] sm:$0xff]  ;;  %v3730_v19 = vld [vmem:[%s4430_s16 + $0x80] sm:$0xff] }
  0x1a   : > { %v3733_v20 = vld [vmem:[%s4430_s16 + $0x98] sm:$0xff]  ;;  %v3732_v21 = vld [vmem:[%s4430_s16 + $0x90] sm:$0xff]  ;;  %v3748_v22 = vld [vmem:[%s4430_s16 + $0xa8] sm:$0xff] }
  0x1b   : > { %v3747_v23 = vld [vmem:[%s4430_s16 + $0xa0] sm:$0xff]  ;;  %v3750_v24 = vld [vmem:[%s4430_s16 + $0xb8] sm:$0xff]  ;;  %v3749_v25 = vld [vmem:[%s4430_s16 + $0xb0] sm:$0xff] }
  0x1c   : > { %v3765_v26 = vld [vmem:[%s4430_s16 + $0xc8] sm:$0xff]  ;;  %v3751_v27 = vld [vmem:[%s4430_s16 + $0xc0] sm:$0xff]  ;;  %v3767_v28 = vld [vmem:[%s4430_s16 + $0xd8] sm:$0xff] }
  0x1d   : > { %696 = vperm.xlu1 %4263, %v3693_v6   ;;  %366 = vperm.xlu0 %4262, %v343_v7   ;;  %v3766_v29 = vld [vmem:[%s4430_s16 + $0xd0] sm:$0xff]  ;;  %v3769_v30 = vld [vmem:[%s4430_s16 + $0xe8] sm:$0xff]  ;;  %v3768_v31 = vld [vmem:[%s4430_s16 + $0xe0] sm:$0xff] }
  0x1e   : > { %v3784_v32 = vld [vmem:[%s4430_s16 + $0xf8] sm:$0xff]  ;;  %v3783_v33 = vld [vmem:[%s4430_s16 + $0xf0] sm:$0xff]  ;;  %v3786_v34 = vld [vmem:[%s4430_s16 + $0x108] sm:$0xff] }
  0x1f   : > { %v3785_v35 = vld [vmem:[%s4430_s16 + $0x100] sm:$0xff]  ;;  %v3801_v36 = vld [vmem:[%s4430_s16 + $0x118] sm:$0xff]  ;;  %v3787_v37 = vld [vmem:[%s4430_s16 + $0x110] sm:$0xff] }
  0x20   : > { %v3803_v38 = vld [vmem:[%s4430_s16 + $0x128] sm:$0xff]  ;;  %v3802_v39 = vld [vmem:[%s4430_s16 + $0x120] sm:$0xff]  ;;  %v3805_v40 = vld [vmem:[%s4430_s16 + $0x138] sm:$0xff] }
  0x21   : > { %706 = vperm.xlu1 %4263, %v3695_v8   ;;  %701 = vperm.xlu0 %4262, %v3694_v9   ;;  %v3804_v41 = vld [vmem:[%s4430_s16 + $0x130] sm:$0xff] }
  0x25   : > { %716 = vperm.xlu1 %4263, %v3697_v10   ;;  %711 = vperm.xlu0 %4262, %v3696_v11  }
  0x29   : > { %1021 = vperm.xlu1 %4263, %v3712_v12   ;;  %1016 = vperm.xlu0 %4262, %v3711_v13  }
  0x2d   : > { %1031 = vperm.xlu1 %4263, %v3714_v14   ;;  %1026 = vperm.xlu0 %4262, %v3713_v15   ;;  %v4510_v14 = vld [vmem:[%s5833_s2] ss:$0 sm:$0xff] }
  0x31   : > { %1336 = vperm.xlu1 %4263, %v3729_v16   ;;  %1036 = vperm.xlu0 %4262, %v3715_v17  }
  0x35   : > { %1346 = vperm.xlu1 %4263, %v3731_v18   ;;  %1341 = vperm.xlu0 %4262, %v3730_v19  }
  0x39   : > { %1356 = vperm.xlu1 %4263, %v3733_v20   ;;  %1351 = vperm.xlu0 %4262, %v3732_v21  }
  0x3d   : > { %1661 = vperm.xlu1 %4263, %v3748_v22   ;;  %1656 = vperm.xlu0 %4262, %v3747_v23  }
  0x41   : > { %1671 = vperm.xlu1 %4263, %v3750_v24   ;;  %1666 = vperm.xlu0 %4262, %v3749_v25  }
  0x45   : > { %1976 = vperm.xlu1 %4263, %v3765_v26   ;;  %1676 = vperm.xlu0 %4262, %v3751_v27  }
  0x49   : > { %1986 = vperm.xlu1 %4263, %v3767_v28   ;;  %1981 = vperm.xlu0 %4262, %v3766_v29  }
  0x4d   : > { %1996 = vperm.xlu1 %4263, %v3769_v30   ;;  %1991 = vperm.xlu0 %4262, %v3768_v31  }
  0x51   : > { %2301 = vperm.xlu1 %4263, %v3784_v32   ;;  %2296 = vperm.xlu0 %4262, %v3783_v33  }
  0x55   : > { %2311 = vperm.xlu1 %4263, %v3786_v34   ;;  %2306 = vperm.xlu0 %4262, %v3785_v35  }
  0x59   : > { %2616 = vperm.xlu1 %4263, %v3801_v36   ;;  %2316 = vperm.xlu0 %4262, %v3787_v37  }
  0x5d   : > { %2626 = vperm.xlu1 %4263, %v3803_v38   ;;  %2621 = vperm.xlu0 %4262, %v3802_v39  }
  0x61   : > { %2636 = vperm.xlu1 %4263, %v3805_v40   ;;  %2631 = vperm.xlu0 %4262, %v3804_v41  }
  0x90   : > { %v357_v44 = vpop.permute.xlu1 %356  ;;  %v347_v45 = vpop.permute.xlu0 %346 }
  0x91   : > { %v391_v46 = vmul.f32 %v4475_v42, %v357_v44  ;;  %v426_v47 = vmul.f32 %v4480_v43, %v357_v44  ;;  %v389_v48 = vmul.f32 %v4475_v42, %v347_v45  ;;  %v424_v50 = vmul.f32 %v4480_v43, %v347_v45 }
  0x92   : > { %v376_v57 = vmul.f32 %v4488_v49, %v357_v44  ;;  %v374_v60 = vmul.f32 %v4488_v49, %v347_v45 }
  0x93   : > { %v403_v53 = vrot.slane %v391_v46, 1  ;;  %v438_v54 = vrot.slane %v426_v47, 2  ;;  %v400_v61 = vrot.slane %v389_v48, 1  ;;  %v435_v0 = vrot.slane %v424_v50, 2 }
  0x94   : > { %v362_v51 = vpop.permute.xlu1 %361  ;;  %v352_v52 = vpop.permute.xlu0 %351 }
  0x95   : > { %v392_v55 = vmul.f32 %v4475_v42, %v362_v51  ;;  %v427_v56 = vmul.f32 %v4480_v43, %v362_v51  ;;  %v390_v58 = vmul.f32 %v4475_v42, %v352_v52  ;;  %v425_v59 = vmul.f32 %v4480_v43, %v352_v52 }
  0x96   : > { %v377_v1 = vmul.f32 %v4488_v49, %v362_v51  ;;  %v375_v8 = vmul.f32 %v4488_v49, %v352_v52 }
  0x97   : > { %v405_v62 = vrot.slane %v392_v55, 1  ;;  %v440_v63 = vrot.slane %v427_v56, 2  ;;  %v401_v2 = vrot.slane %v390_v58, 1  ;;  %v436_v3 = vrot.slane %v425_v59, 2 }
  0x98   : > { %v697_v4 = vpop.permute.xlu1 %696  ;;  %v367_v5 = vpop.permute.xlu0 %366 }
  0x99   : > { %v406_v6 = vsel %vm399_vm0, %v403_v53, %v405_v62  ;;  %v441_v7 = vsel %vm434_vm1, %v438_v54, %v440_v63  ;;  %v4502_v9 = vmul.f32 %v4475_v42, %v697_v4  ;;  %v402_v11 = vsel %vm399_vm0, %v400_v61, %v401_v2 }
  0x9a   : > { %v416_v10 = vadd.f32 %v406_v6, %v376_v57  ;;  %v404_v12 = vsel %vm399_vm0, %v401_v2, %v403_v53  ;;  %v724_v13 = vmul.f32 %v4488_v49, %v697_v4  ;;  %v414_v15 = vadd.f32 %v402_v11, %v374_v60 }
  0x9b   : > { %v415_v16 = vadd.f32 %v404_v12, %v375_v8  ;;  %v437_v17 = vsel %vm434_vm1, %v435_v0, %v436_v3  ;;  %v439_v18 = vsel %vm434_vm1, %v436_v3, %v438_v54  ;;  %v749_v20 = vrot.slane %v4502_v9, 1 }
  0x9c   : > { %v451_v19 = vadd.f32 %v441_v7, %v416_v10  ;;  %v773_v21 = vmul.f32 %v4480_v43, %v697_v4  ;;  %v393_v22 = vmul.f32 %v4475_v42, %v367_v5  ;;  %v707_v23 = vpop.permute.xlu1 %706  ;;  %v702_v24 = vpop.permute.xlu0 %701  ;;  %v449_v25 = vadd.f32 %v437_v17, %v414_v15 }
  0x9d   : > { %v450_v26 = vadd.f32 %v439_v18, %v415_v16  ;;  %v378_v27 = vmul.f32 %v4488_v49, %v367_v5  ;;  %v428_v28 = vmul.f32 %v4480_v43, %v367_v5  ;;  %v4521_v31 = vmul.f32 %v4488_v49, %v707_v23 }
  0x9e   : > { %v463_v29 = vadd.f32 %v4510_v14, %v451_v19  ;;  %v407_v30 = vrot.slane %v393_v22, 1  ;;  %v741_v32 = vmul.f32 %v4475_v42, %v707_v23  ;;  %v461_v33 = vadd.f32 %v4510_v14, %v449_v25 }
  0x9f   : > { %v462_v34 = vadd.f32 %v4510_v14, %v450_v26  ;;  %v442_v35 = vrot.slane %v428_v28, 2  ;;  %v4527_v36 = vmul.f32 %v4480_v43, %v707_v23  ;;  %v783_v38 = vrot.slane %v773_v21, 2 }
  0xa0   : > { %v468_v37 = vmax.f32 %v463_v29, 0.0  ;;  %v408_v39 = vsel %vm399_vm0, %v405_v62, %v407_v30  ;;  %v418_v40 = vadd.f32 %v407_v30, %v378_v27  ;;  %v717_v41 = vpop.permute.xlu1 %716  ;;  %v712_v44 = vpop.permute.xlu0 %711  ;;  %v466_v45 = vmax.f32 %v461_v33, 0.0 }
  0xa1   : > { %v467_v46 = vmax.f32 %v462_v34, 0.0  ;;  %v417_v47 = vadd.f32 %v408_v39, %v377_v1  ;;  %v752_v48 = vrot.slane %v741_v32, 1  ;;  %v443_v50 = vsel %vm434_vm1, %v440_v63, %v442_v35 }
  0xa2   : > { %474 = vst.msk [vmem:[#allocation2 + $0x10] sm:$0xff] %vm471_vm2, %v468_v37  ;;  %v453_v51 = vadd.f32 %v442_v35, %v418_v40  ;;  %v786_v52 = vrot.slane %v4527_v36, 2  ;;  %v740_v53 = vmul.f32 %v4475_v42, %v702_v24  ;;  %472 = vst.msk [vmem:[#allocation2] sm:$0xff] %vm471_vm2, %v466_v45  ;;  %v725_v55 = vmul.f32 %v4488_v49, %v702_v24 }
  0xa3   : > { %473 = vst.msk [vmem:[#allocation2 + $0x8] sm:$0xff] %vm471_vm2, %v467_v46  ;;  %v452_v54 = vadd.f32 %v443_v50, %v417_v47  ;;  %v774_v56 = vmul.f32 %v4480_v43, %v702_v24  ;;  %v743_v57 = vmul.f32 %v4475_v42, %v717_v41  ;;  %v728_v60 = vmul.f32 %v4488_v49, %v717_v41  ;;  %v4265_v47 = vld [vmem:[%s5834_s3 + $0x20] sm:$0xff]  }
  0xa4   : > { %v465_v58 = vadd.f32 %v4510_v14, %v453_v51  ;;  %v750_v59 = vrot.slane %v740_v53, 1  ;;  %v777_v61 = vmul.f32 %v4480_v43, %v717_v41  ;;  %v1022_v62 = vpop.permute.xlu1 %1021  ;;  %v1017_v63 = vpop.permute.xlu0 %1016  ;;  %v742_v3 = vmul.f32 %v4475_v42, %v712_v44 }
  0xa5   : > { %v464_v0 = vadd.f32 %v4510_v14, %v452_v54  ;;  %v784_v1 = vrot.slane %v774_v56, 2  ;;  %v756_v2 = vrot.slane %v743_v57, 1  ;;  %v776_v17 = vmul.f32 %v4480_v43, %v712_v44 }
  0xa6   : > { %v470_v4 = vmax.f32 %v465_v58, 0.0  ;;  %v751_v5 = vsel %vm399_vm0, %v749_v20, %v750_v59  ;;  %v753_v6 = vsel %vm399_vm0, %v750_v59, %v752_v48  ;;  %v790_v7 = vrot.slane %v777_v61, 2 }
  0xa7   : > { %v469_v8 = vmax.f32 %v464_v0, 0.0  ;;  %v763_v9 = vadd.f32 %v751_v5, %v724_v13  ;;  %v764_v10 = vadd.f32 %v753_v6, %v725_v55  ;;  %v785_v11 = vsel %vm434_vm1, %v783_v38, %v784_v1 }
  0xa8   : > { %477 = vst.msk [vmem:[#allocation2 + $0x20] sm:$0x3f] %vm476_vm3, %v470_v4  ;;  %v787_v12 = vsel %vm434_vm1, %v784_v1, %v786_v52  ;;  %v767_v15 = vadd.f32 %v756_v2, %v728_v60  ;;  %v754_v16 = vrot.slane %v742_v3, 1  ;;  %v1032_v18 = vpop.permute.xlu1 %1031  ;;  %v727_v21 = vmul.f32 %v4488_v49, %v712_v44  ;;  %v1027_v27 = vpop.permute.xlu0 %1026 }
  0xa9   : > { %475 = vst.msk [vmem:[#allocation2 + $0x18] sm:$0xff] %vm471_vm2, %v469_v8  ;;  %v797_v19 = vadd.f32 %v785_v11, %v763_v9  ;;  %v798_v20 = vadd.f32 %v787_v12, %v764_v10  ;;  %v4553_v13 = vmul.f32 %v4475_v42, %v1022_v62  ;;  %v4560_v26 = vmul.f32 %v4480_v43, %v1022_v62 }
  0xaa   : > { %v4555_v22 = vld [vmem:[#allocation2] ss:$2 sm:$0xff]  ;;  %v801_v23 = vadd.f32 %v790_v7, %v767_v15  ;;  %v755_v24 = vsel %vm399_vm0, %v752_v48, %v754_v16  ;;  %v757_v25 = vsel %vm399_vm0, %v754_v16, %v756_v2  ;;  %v4562_v28 = vld [vmem:[#allocation2 + $0x1] ss:$2 sm:$0xff]  ;;  %v788_v39 = vrot.slane %v776_v17, 2 }
  0xab   : > { %v4564_v29 = vld [vmem:[#allocation2 + $0x2] ss:$2 sm:$0xff]  ;;  %v4566_v30 = vld [vmem:[#allocation2 + $0x3] ss:$2 sm:$0xff]  ;;  %v809_v32 = vadd.f32 %v4510_v14, %v797_v19  ;;  %v810_v33 = vadd.f32 %v4510_v14, %v798_v20  ;;  %v765_v34 = vadd.f32 %v755_v24, %v4521_v31  ;;  %v766_v35 = vadd.f32 %v757_v25, %v727_v21 }
  0xac   : > { %v4571_v36 = vld [vmem:[#allocation2 + $0x4] ss:$2 sm:$0xff]  ;;  %v4573_v37 = vld [vmem:[#allocation2 + $0x5] ss:$2 sm:$0xff]  ;;  %v4576_v38 = vadd.f32 %v4510_v14, %v801_v23  ;;  %v1045_v40 = vmul.f32 %v4488_v49, %v1022_v62  ;;  %v1070_v45 = vrot.slane %v4553_v13, 1  ;;  %v1104_v46 = vrot.slane %v4560_v26, 2  ;;  %v1337_v54 = vpop.permute.xlu1 %1336  ;;  %v1037_v1 = vpop.permute.xlu0 %1036 }
  0xad   : > { %v814_v41 = vmax.f32 %v809_v32, 0.0  ;;  %v815_v44 = vmax.f32 %v810_v33, 0.0  ;;  %v4264_v31 = vld [vmem:[%s5834_s3 + $0x28] sm:$0xff]   ;;  %v789_v48 = vsel %vm434_vm1, %v786_v52, %v788_v39  ;;  %v791_v50 = vsel %vm434_vm1, %v788_v39, %v790_v7 }
  0xae   : > { %v1059_v51 = vmul.f32 %v4475_v42, %v1017_v63  ;;  %v1093_v53 = vmul.f32 %v4480_v43, %v1017_v63  ;;  %v799_v55 = vadd.f32 %v789_v48, %v765_v34  ;;  %v800_v56 = vadd.f32 %v791_v50, %v766_v35  ;;  %4024 = vmatprep.subr.bf16.mxu0 %v4264_v31  ;;  %v4266_v48 = vld [vmem:[%s5834_s3 + $0x18] sm:$0xff]  }
  0xaf   : > { %819 = vst.msk [vmem:[#allocation2] sm:$0xff] %vm471_vm2, %v814_v41  ;;  %820 = vst.msk [vmem:[#allocation2 + $0x8] sm:$0xff] %vm471_vm2, %v815_v44  ;;  %v1044_v57 = vmul.f32 %v4488_v49, %v1017_v63  ;;  %v4595_v58 = vmul.f32 %v4475_v42, %v1032_v18  ;;  %v818_v60 = vmax.f32 %v4576_v38, 0.0  ;;  %v4603_v61 = vmul.f32 %v4480_v43, %v1032_v18  ;;  %v4625_v15 = vld [vmem:[#allocation2 + $0x20] ss:$2 sm:$0x1] }
  0xb0   : > { %v4597_v52 = vld [vmem:[#allocation2 + $0x10] ss:$2 sm:$0xff]  ;;  %v4599_v59 = vld [vmem:[#allocation2 + $0x11] ss:$2 sm:$0xff]  ;;  %v1061_v62 = vmul.f32 %v4475_v42, %v1027_v27  ;;  %v1095_v0 = vmul.f32 %v4480_v43, %v1027_v27  ;;  %4025 = vmatpush3.bf16.msra.mxu0 %v4264_v31  ;;  %v811_v4 = vadd.f32 %v4510_v14, %v799_v55  ;;  %v812_v5 = vadd.f32 %v4510_v14, %v800_v56  ;;  %v1347_v26 = vpop.permute.xlu1 %1346 }
  0xb1   : > { %v4607_v63 = vld [vmem:[#allocation2 + $0x12] ss:$2 sm:$0xff]  ;;  %v4609_v2 = vld [vmem:[#allocation2 + $0x13] ss:$2 sm:$0xff]  ;;  %v4616_v6 = vmul.f32 %v4488_v49, %v1032_v18  ;;  %v4619_v7 = vmul.f32 %v4475_v42, %v1337_v54  ;;  %4026 = vmatprep.subr.bf16.mxu0 %v4265_v47  ;;  %v1069_v9 = vrot.slane %v1059_v51, 1  ;;  %v1103_v10 = vrot.slane %v1093_v53, 2 }
  0xb2   : > { %v4611_v3 = vld [vmem:[#allocation2 + $0x14] ss:$2 sm:$0xff]  ;;  %v4621_v8 = vld [vmem:[#allocation2 + $0x15] ss:$2 sm:$0xff]  ;;  %v1074_v11 = vrot.slane %v4595_v58, 1  ;;  %v1108_v12 = vrot.slane %v4603_v61, 2  ;;  %v1046_v13 = vmul.f32 %v4488_v49, %v1027_v27  ;;  %v4632_v23 = vmul.f32 %v4488_v49, %v1337_v54 }
  0xb3   : > { %v4627_v16 = vld [vmem:[#allocation2 + $0x21] ss:$2 sm:$0x1]  ;;  %v816_v17 = vmax.f32 %v811_v4, 0.0  ;;  %v817_v19 = vmax.f32 %v812_v5, 0.0  ;;  %v1072_v18 = vrot.slane %v1061_v62, 1  ;;  %v1071_v21 = vsel %vm399_vm0, %v1069_v9, %v1070_v45 }
  0xb4   : > { %v1106_v20 = vrot.slane %v1095_v0, 2  ;;  %v1389_v24 = vrot.slane %v4619_v7, 1  ;;  %v501_v25 = vld [vmem:[#allocation2 + $0x22] ss:$2 sm:$0x1]  ;;  %4027 = vmatpush3.bf16.msra.mxu0 %v4265_v47  ;;  %v1083_v32 = vadd.f32 %v1071_v21, %v1044_v57  ;;  %v1105_v33 = vsel %vm434_vm1, %v1103_v10, %v1104_v46  ;;  %v1342_v47 = vpop.permute.xlu0 %1341 }
  0xb5   : > { %821 = vst.msk [vmem:[#allocation2 + $0x10] sm:$0xff] %vm471_vm2, %v816_v17  ;;  %822 = vst.msk [vmem:[#allocation2 + $0x18] sm:$0xff] %vm471_vm2, %v817_v19  ;;  %v1073_v34 = vsel %vm399_vm0, %v1070_v45, %v1072_v18  ;;  %v1075_v35 = vsel %vm399_vm0, %v1072_v18, %v1074_v11  ;;  %v507_v27 = vld [vmem:[#allocation2 + $0x23] ss:$2 sm:$0x1]  ;;  %v4642_v31 = vmul.f32 %v4480_v43, %v1337_v54  ;;  %v4268_v54 = vld [vmem:[%s5834_s3 + $0x28] sm:$0xff]   ;;  %4028 = vmatprep.subr.bf16.mxu0 %v4266_v48 }
  0xb6   : > { %v533_v38 = vld [vmem:[#allocation2 + $0x24] ss:$2 sm:$0x1]  ;;  %v1084_v39 = vadd.f32 %v1073_v34, %v1045_v40  ;;  %v1085_v41 = vadd.f32 %v1075_v35, %v1046_v13  ;;  %v1107_v44 = vsel %vm434_vm1, %v1104_v46, %v1106_v20  ;;  %v1117_v50 = vadd.f32 %v1105_v33, %v1083_v32  ;;  %v539_v51 = vld [vmem:[#allocation2 + $0x25] ss:$2 sm:$0x1]  ;;  %4040 = vmatprep.subr.bf16.mxu1 %v4268_v54 }
  0xb7   : > { %v1109_v45 = vsel %vm434_vm1, %v1106_v20, %v1108_v12  ;;  %v1063_v53 = vmul.f32 %v4475_v42, %v1037_v1  ;;  %v1097_v40 = vmul.f32 %v4480_v43, %v1037_v1  ;;  %v4267_v46 = vld [vmem:[%s5834_s3 + $0x10] sm:$0xff]   ;;  %823 = vst.msk [vmem:[#allocation2 + $0x20] sm:$0x3f] %vm476_vm3, %v818_v60  ;;  %v542_v57 = vmax.f32 %v533_v38, %v539_v51  ;;  %v4270_v62 = vld [vmem:[%s5834_s3 + $0x20] sm:$0xff]   ;;  %v4269_v18 = vld [vmem:[%s5834_s3 + $0x8] sm:$0xff]  }
  0xb8   : > { %v1118_v55 = vadd.f32 %v1107_v44, %v1084_v39  ;;  %v1119_v56 = vadd.f32 %v1109_v45, %v1085_v41  ;;  %v510_v58 = vmax.f32 %v501_v25, %v507_v27  ;;  %v1129_v0 = vadd.f32 %v4510_v14, %v1117_v50  ;;  %4029 = vmatpush3.bf16.msra.mxu0 %v4266_v48  ;;  %v4681_v32 = vld [vmem:[#allocation2] ss:$2 sm:$0xff]  ;;  %v4683_v33 = vld [vmem:[#allocation2 + $0x1] ss:$2 sm:$0xff] }
  0xb9   : > { %v1048_v4 = vmul.f32 %v4488_v49, %v1037_v1  ;;  %v1076_v5 = vrot.slane %v1063_v53, 1  ;;  %v1110_v9 = vrot.slane %v1097_v40, 2  ;;  %v1423_v60 = vrot.slane %v4642_v31, 2  ;;  %550 = vrot.lane.b32.xlu1 %v542_v57, %s4359_s17  ;;  %v1357_v1 = vpop.permute.xlu1 %1356  ;;  %4030 = vmatprep.subr.bf16.mxu0 %v4267_v46  ;;  %5856 = vst [vmem:[#allocation7_spill] sm:$0xff] %v4681_v32  ;;  %5857 = vst [vmem:[#allocation8_spill] sm:$0xff] %v4683_v33 }
  0xba   : > { %v1130_v10 = vadd.f32 %v4510_v14, %v1118_v55  ;;  %v4666_v17 = vadd.f32 %v4510_v14, %v1119_v56  ;;  %518 = vrot.lane.b32.xlu0 %v510_v58, %s4360_s18  ;;  %v4672_v19 = vmul.f32 %v4475_v42, %v1347_v26  ;;  %v1134_v20 = vmax.f32 %v1129_v0, 0.0  ;;  %4041 = vmatpush3.bf16.msra.mxu1 %v4268_v54 }
  0xbb   : > { %v1077_v21 = vsel %vm399_vm0, %v1074_v11, %v1076_v5  ;;  %v1087_v13 = vadd.f32 %v1076_v5, %v1048_v4  ;;  %v4679_v25 = vmul.f32 %v4488_v49, %v1347_v26  ;;  %v1111_v27 = vsel %vm434_vm1, %v1108_v12, %v1110_v9  ;;  %v1352_v11 = vpop.permute.xlu0 %1351  ;;  %4042 = vmatprep.subr.bf16.mxu1 %v4270_v62 }
  0xbc   : > { %v1135_v34 = vmax.f32 %v1130_v10, 0.0  ;;  %v1086_v35 = vadd.f32 %v1077_v21, %v4616_v6  ;;  %v4690_v38 = vmul.f32 %v4480_v43, %v1347_v26  ;;  %v1136_v39 = vmax.f32 %v4666_v17, 0.0  ;;  %v4695_v50 = vld [vmem:[#allocation2 + $0x2] ss:$2 sm:$0xff]  ;;  %v4697_v45 = vld [vmem:[#allocation2 + $0x3] ss:$2 sm:$0xff]  ;;  %4031 = vmatpush3.bf16.msra.mxu0 %v4267_v46 }
  0xbd   : > { %v1121_v41 = vadd.f32 %v1110_v9, %v1087_v13  ;;  %v1392_v44 = vrot.slane %v4672_v19, 1  ;;  %v1380_v48 = vmul.f32 %v4475_v42, %v1342_v47  ;;  %v1365_v12 = vmul.f32 %v4488_v49, %v1342_v47  ;;  %v4703_v51 = vld [vmem:[#allocation2 + $0x4] ss:$2 sm:$0xff]  ;;  %v4705_v53 = vld [vmem:[#allocation2 + $0x5] ss:$2 sm:$0xff]  ;;  %4032 = vmatprep.subr.bf16.mxu0 %v4269_v18 }
  0xbe   : > { %v1120_v61 = vadd.f32 %v1111_v27, %v1086_v35  ;;  %v1426_v6 = vrot.slane %v4690_v38, 2  ;;  %v508_v26 = vmax.f32 %v4564_v29, %v4566_v30  ;;  %v4707_v40 = vld [vmem:[#allocation2 + $0x10] ss:$2 sm:$0xff]  ;;  %v1414_v55 = vmul.f32 %v4480_v43, %v1342_v47  ;;  %1139 = vst.msk [vmem:[#allocation2] sm:$0xff] %vm471_vm2, %v1134_v20  ;;  %1140 = vst.msk [vmem:[#allocation2 + $0x8] sm:$0xff] %vm471_vm2, %v1135_v34 }
  0xbf   : > { %5858 = vst [vmem:[#allocation9_spill] sm:$0xff] %v4707_v40  ;;  %v1133_v54 = vadd.f32 %v4510_v14, %v1121_v41  ;;  %v509_v46 = vmax.f32 %v4607_v63, %v4609_v2  ;;  %v1368_v56 = vmul.f32 %v4488_v49, %v1357_v1  ;;  %4043 = vmatpush3.bf16.msra.mxu1 %v4270_v62  ;;  %v4716_v29 = vld [vmem:[#allocation2 + $0x11] ss:$2 sm:$0xff]  ;;  %v4718_v30 = vld [vmem:[#allocation2 + $0x12] ss:$2 sm:$0xff]  ;;  %v1390_v58 = vrot.slane %v1380_v48, 1  ;;  %v1662_v2 = vpop.permute.xlu1 %1661  ;;  %v1657_v48 = vpop.permute.xlu0 %1656 }
  0xc0   : > { %5859 = vst [vmem:[#allocation10_spill] sm:$0xff] %v4716_v29  ;;  %v1132_v57 = vadd.f32 %v4510_v14, %v1120_v61  ;;  %514 = vrot.lane.b32.xlu0 %v508_v26, %s4360_s18  ;;  %v1383_v47 = vmul.f32 %v4475_v42, %v1357_v1  ;;  %v1417_v63 = vmul.f32 %v4480_v43, %v1357_v1  ;;  %v4724_v0 = vld [vmem:[#allocation2 + $0x20] ss:$2 sm:$0x1]  ;;  %v4730_v62 = vld [vmem:[#allocation2 + $0x13] ss:$2 sm:$0xff] }
  0xc1   : > { %5860 = vst [vmem:[#allocation11_spill] sm:$0xff] %v4724_v0  ;;  %v4726_v4 = vld [vmem:[#allocation2 + $0x21] ss:$2 sm:$0x1]  ;;  %v1138_v10 = vmax.f32 %v1133_v54, 0.0  ;;  %516 = vrot.lane.b32.xlu1 %v509_v46, %s4360_s18  ;;  %v1367_v17 = vmul.f32 %v4488_v49, %v1352_v11  ;;  %v1382_v20 = vmul.f32 %v4475_v42, %v1352_v11  ;;  %v1416_v1 = vmul.f32 %v4480_v43, %v1352_v11 }
  0xc2   : > { %5861 = vst [vmem:[#allocation12_spill] sm:$0xff] %v4726_v4  ;;  %v4728_v5 = vld [vmem:[#allocation2 + $0x22] ss:$2 sm:$0x1]  ;;  %4033 = vmatpush3.bf16.msra.mxu0 %v4269_v18  ;;  %v1137_v34 = vmax.f32 %v1132_v57, 0.0  ;;  %v1391_v35 = vsel %vm399_vm0, %v1389_v24, %v1390_v58  ;;  %v1393_v27 = vsel %vm399_vm0, %v1390_v58, %v1392_v44  ;;  %v541_v41 = vmax.f32 %v4611_v3, %v4621_v8  ;;  %v4274_v57 = vld [vmem:[%s5834_s3 + $0x28] sm:$0xff]  }
  0xc3   : > { %v4732_v9 = vld [vmem:[#allocation2 + $0x23] ss:$2 sm:$0x1]  ;;  %v4738_v21 = vld [vmem:[#allocation2 + $0x14] ss:$2 sm:$0xff]  ;;  %v1403_v11 = vadd.f32 %v1391_v35, %v4632_v23  ;;  %v1404_v26 = vadd.f32 %v1393_v27, %v1365_v12  ;;  %v1424_v54 = vrot.slane %v1414_v55, 2  ;;  %v540_v7 = vmax.f32 %v4571_v36, %v4573_v37 }
  0xc4   : > { %v4740_v13 = vld [vmem:[#allocation2 + $0x24] ss:$2 sm:$0x1]  ;;  %v4750_v61 = vld [vmem:[#allocation2 + $0x15] ss:$2 sm:$0xff]  ;;  %v1396_v24 = vrot.slane %v1383_v47, 1  ;;  %548 = vrot.lane.b32.xlu0 %v541_v41, %s4359_s17  ;;  %v4775_v12 = vmul.f32 %v4475_v42, %v1662_v2  ;;  %v4778_v55 = vmul.f32 %v4480_v43, %v1662_v2  ;;  %v1667_v41 = vpop.permute.xlu0 %1666 }
  0xc5   : > { %v4752_v18 = vld [vmem:[#allocation2 + $0x25] ss:$2 sm:$0x1]  ;;  %1142 = vst.msk [vmem:[#allocation2 + $0x18] sm:$0xff] %vm471_vm2, %v1137_v34  ;;  %v1430_v46 = vrot.slane %v1417_v63, 2  ;;  %1141 = vst.msk [vmem:[#allocation2 + $0x10] sm:$0xff] %vm471_vm2, %v1136_v39  ;;  %v1425_v37 = vsel %vm434_vm1, %v1423_v60, %v1424_v54  ;;  %v1427_v39 = vsel %vm434_vm1, %v1424_v54, %v1426_v6  ;;  %546 = vrot.lane.b32.xlu1 %v540_v7, %s4359_s17  ;;  %v1672_v63 = vpop.permute.xlu1 %1671 }
  0xc6   : > { %1143 = vst.msk [vmem:[#allocation2 + $0x20] sm:$0x3f] %vm476_vm3, %v1138_v10  ;;  %v1394_v3 = vrot.slane %v1382_v20, 1  ;;  %v1428_v8 = vrot.slane %v1416_v1, 2  ;;  %v4271_v23 = vld [vmem:[%s5834_s3] sm:$0xff]   ;;  %v4272_v36 = vld [vmem:[%s5834_s3 + $0x18] sm:$0xff]   ;;  %v1437_v58 = vadd.f32 %v1425_v37, %v1403_v11  ;;  %v1438_v31 = vadd.f32 %v1427_v39, %v1404_v26 }
  0xc7   : > { %v1407_v47 = vadd.f32 %v1396_v24, %v1368_v56  ;;  %4034 = vmatprep.subr.bf16.mxu0 %v4271_v23  ;;  %v4273_v10 = vld [vmem:[%s5834_s3 + $0x10] sm:$0xff]   ;;  %v4795_v56 = vmul.f32 %v4488_v49, %v1662_v2  ;;  %4044 = vmatprep.subr.bf16.mxu1 %v4272_v36  ;;  %v1684_v7 = vmul.f32 %v4488_v49, %v1657_v48 }
  0xc8   : > { %v1395_v60 = vsel %vm399_vm0, %v1392_v44, %v1394_v3  ;;  %v1397_v20 = vsel %vm399_vm0, %v1394_v3, %v1396_v24  ;;  %v1429_v34 = vsel %vm434_vm1, %v1426_v6, %v1428_v8  ;;  %v1449_v19 = vadd.f32 %v4510_v14, %v1437_v58  ;;  %4035 = vmatpush3.bf16.msra.mxu0 %v4271_v23  ;;  %v4812_v23 = vld [vmem:[#allocation2 + $0x1] ss:$2 sm:$0xff] }
  0xc9   : > { %v1405_v1 = vadd.f32 %v1395_v60, %v4679_v25  ;;  %v1450_v44 = vadd.f32 %v4510_v14, %v1438_v31  ;;  %v1441_v35 = vadd.f32 %v1430_v46, %v1407_v47  ;;  %v1406_v27 = vadd.f32 %v1397_v20, %v1367_v17  ;;  %4045 = vmatpush3.bf16.msra.mxu1 %v4272_v36  ;;  %v1977_v47 = vpop.permute.xlu1 %1976 }
  0xca   : > { %v1431_v11 = vsel %vm434_vm1, %v1428_v8, %v1430_v46  ;;  %4056 = vmatprep.subr.bf16.mxu0 %v4274_v57  ;;  %v1454_v6 = vmax.f32 %v1449_v19, 0.0  ;;  %4046 = vmatprep.subr.bf16.mxu1 %v4273_v10  ;;  %v1699_v46 = vmul.f32 %v4475_v42, %v1657_v48  ;;  %v842_v3 = vmax.f32 %v4695_v50, %v4697_v45  ;;  %v4810_v8 = vld [vmem:[#allocation2] ss:$2 sm:$0xff] }
  0xcb   : > { %v1439_v26 = vadd.f32 %v1429_v34, %v1405_v1  ;;  %v4803_v2 = vadd.f32 %v4510_v14, %v1441_v35  ;;  %v1440_v54 = vadd.f32 %v1431_v11, %v1406_v27  ;;  %v1455_v17 = vmax.f32 %v1450_v44, 0.0  ;;  %5862 = vst [vmem:[#allocation13_spill] sm:$0xff] %v4810_v8  ;;  %v1677_v11 = vpop.permute.xlu0 %1676 }
  0xcc   : > { %v4815_v37 = vld [vmem:[#allocation2 + $0x10] ss:$2 sm:$0xff]  ;;  %v4817_v39 = vld [vmem:[#allocation2 + $0x11] ss:$2 sm:$0xff]  ;;  %v1733_v58 = vmul.f32 %v4480_v43, %v1657_v48  ;;  %v843_v31 = vmax.f32 %v4718_v30, %v4730_v62  ;;  %848 = vrot.lane.b32.xlu0 %v842_v3, %s4360_s18  ;;  %v4831_v20 = vmul.f32 %v4488_v49, %v1672_v63  ;;  %v4834_v1 = vmul.f32 %v4475_v42, %v1672_v63 }
  0xcd   : > { %v1451_v24 = vadd.f32 %v4510_v14, %v1439_v26  ;;  %v1452_v57 = vadd.f32 %v4510_v14, %v1440_v54  ;;  %v4823_v60 = vld [vmem:[#allocation2 + $0x2] ss:$2 sm:$0xff]  ;;  %v4825_v50 = vld [vmem:[#allocation2 + $0x12] ss:$2 sm:$0xff]  ;;  %v4827_v45 = vld [vmem:[#allocation2 + $0x3] ss:$2 sm:$0xff]  ;;  %v4837_v48 = vmul.f32 %v4480_v43, %v1672_v63  ;;  %v1701_v30 = vmul.f32 %v4475_v42, %v1667_v41  ;;  %4047 = vmatpush3.bf16.msra.mxu1 %v4273_v10  ;;  %v1987_v10 = vpop.permute.xlu1 %1986 }
  0xce   : > { %v4840_v62 = vld [vmem:[#allocation2 + $0x13] ss:$2 sm:$0xff]  ;;  %v4842_v34 = vld [vmem:[#allocation2 + $0x4] ss:$2 sm:$0xff]  ;;  %v4844_v19 = vld [vmem:[#allocation2 + $0x14] ss:$2 sm:$0xff]  ;;  %850 = vrot.lane.b32.xlu1 %v843_v31, %s4360_s18  ;;  %v1686_v44 = vmul.f32 %v4488_v49, %v1667_v41  ;;  %v1735_v35 = vmul.f32 %v4480_v43, %v1667_v41  ;;  %v844_v27 = vmax.f32 %v4728_v5, %v4732_v9  ;;  %v866_v63 = vmax.f32 %v4703_v51, %v4705_v53 }
  0xcf   : > { %v4853_v26 = vld [vmem:[#allocation2 + $0x20] ss:$2 sm:$0x1]  ;;  %v4855_v54 = vld [vmem:[#allocation2 + $0x5] ss:$2 sm:$0xff]  ;;  %v1456_v36 = vmax.f32 %v1451_v24, 0.0  ;;  %v4860_v31 = vmul.f32 %v4488_v49, %v1977_v47  ;;  %v4863_v41 = vmul.f32 %v4475_v42, %v1977_v47  ;;  %v867_v40 = vmax.f32 %v4738_v21, %v4750_v61 }
  0xd0   : > { %v4857_v3 = vld [vmem:[#allocation2 + $0x15] ss:$2 sm:$0xff]  ;;  %v1457_v38 = vmax.f32 %v1452_v57, 0.0  ;;  %v1709_v5 = vrot.slane %v1699_v46, 1  ;;  %v1743_v9 = vrot.slane %v1733_v58, 2  ;;  %v1714_v51 = vrot.slane %v4834_v1, 1  ;;  %852 = vrot.lane.b32.xlu0 %v844_v27, %s4360_s18 }
  0xd1   : > { %v1748_v53 = vrot.slane %v4837_v48, 2  ;;  %1459 = vst.msk [vmem:[#allocation2] sm:$0xff] %vm471_vm2, %v1454_v6  ;;  %1460 = vst.msk [vmem:[#allocation2 + $0x8] sm:$0xff] %vm471_vm2, %v1455_v17  ;;  %v4869_v25 = vld [vmem:[#allocation2 + $0x21] ss:$2 sm:$0x1]  ;;  %v4876_v46 = vmul.f32 %v4480_v43, %v1977_v47  ;;  %v1688_v48 = vmul.f32 %v4488_v49, %v1677_v11 }
  0xd2   : > { %1461 = vst.msk [vmem:[#allocation2 + $0x10] sm:$0xff] %vm471_vm2, %v1456_v36  ;;  %1462 = vst.msk [vmem:[#allocation2 + $0x18] sm:$0xff] %vm471_vm2, %v1457_v38  ;;  %v1712_v24 = vrot.slane %v1701_v30, 1  ;;  %v1746_v57 = vrot.slane %v1735_v35, 2  ;;  %v5863_v58 = vrot.slane %v4775_v12, 1  ;;  %v5864_v17 = vrot.slane %v4778_v55, 2  ;;  %872 = vrot.lane.b32.xlu1 %v866_v63, %s4359_s17 }
  0xd3   : > { %v4885_v38 = vld [vmem:[#allocation2 + $0x22] ss:$2 sm:$0x1]  ;;  %v4887_v36 = vld [vmem:[#allocation2 + $0x23] ss:$2 sm:$0x1]  ;;  %v1703_v30 = vmul.f32 %v4475_v42, %v1677_v11 }
  0xd4   : > { %v1711_v6 = vsel %vm399_vm0, %v1709_v5, %v5863_v58  ;;  %v1745_v1 = vsel %vm434_vm1, %v1743_v9, %v5864_v17  ;;  %v5865_v35 = vmov %v5863_v58  ;;  %v1715_v5 = vsel %vm399_vm0, %v1712_v24, %v1714_v51  ;;  %v4898_v63 = vld [vmem:[#allocation2 + $0x24] ss:$2 sm:$0x1]  ;;  %v4275_v55 = vld [vmem:[%s5834_s3 + $0x8] sm:$0xff]   ;;  %874 = vrot.lane.b32.xlu0 %v867_v40, %s4359_s17 }
  0xd5   : > { %v1723_v47 = vadd.f32 %v1711_v6, %v1684_v7  ;;  %v1713_v27 = vsel %vm399_vm0, %v5865_v35, %v1712_v24  ;;  %v5866_v58 = vmov %v5864_v17  ;;  %v4900_v17 = vld [vmem:[#allocation2 + $0x25] ss:$2 sm:$0x1]  ;;  %v1725_v33 = vadd.f32 %v1715_v5, %v1686_v44  ;;  %v1982_v24 = vpop.permute.xlu0 %1981  ;;  %4048 = vmatprep.subr.bf16.mxu1 %v4275_v55 }
  0xd6   : > { %v1747_v9 = vsel %vm434_vm1, %v5866_v58, %v1746_v57  ;;  %v1724_v32 = vadd.f32 %v1713_v27, %v4795_v56  ;;  %v1749_v7 = vsel %vm434_vm1, %v1746_v57, %v1748_v53  ;;  %v5867_v12 = vmax.f32 %v4803_v2, 0.0  ;;  %v4277_v2 = vld [vmem:[%s5834_s3] sm:$0xff]   ;;  %4049 = vmatpush3.bf16.msra.mxu1 %v4275_v55 }
  0xd7   : > { %v1716_v6 = vrot.slane %v1703_v30, 1  ;;  %v1757_v35 = vadd.f32 %v1745_v1, %v1723_v47  ;;  %v1737_v58 = vmul.f32 %v4480_v43, %v1677_v11  ;;  %v868_v56 = vmax.f32 %v4740_v13, %v4752_v18  ;;  %4050 = vmatprep.subr.bf16.mxu1 %v4277_v2 }
  0xd8   : > { %1463 = vst.msk [vmem:[#allocation2 + $0x20] sm:$0x3f] %vm476_vm3, %v5867_v12  ;;  %v1758_v44 = vadd.f32 %v1747_v9, %v1724_v32  ;;  %v1759_v57 = vadd.f32 %v1749_v7, %v1725_v33  ;;  %v4940_v40 = vld [vmem:[#allocation2 + $0x1] ss:$2 sm:$0xff]  ;;  %v2020_v29 = vmul.f32 %v4475_v42, %v1982_v24  ;;  %v2054_v0 = vmul.f32 %v4480_v43, %v1982_v24 }
  0xd9   : > { %v1717_v30 = vsel %vm399_vm0, %v1714_v51, %v1716_v6  ;;  %v1727_v27 = vadd.f32 %v1716_v6, %v1688_v48  ;;  %v1769_v1 = vadd.f32 %v4510_v14, %v1757_v35  ;;  %v1750_v21 = vrot.slane %v1737_v58, 2  ;;  %876 = vrot.lane.b32.xlu1 %v868_v56, %s4359_s17  ;;  %v4924_v13 = vld [vmem:[#allocation2 + $0x10] ss:$2 sm:$0xff]  ;;  %v4926_v61 = vld [vmem:[#allocation2 + $0x11] ss:$2 sm:$0xff]  ;;  %5871 = vst [vmem:[#allocation17_spill] sm:$0xff] %v4940_v40  ;;  %v1997_v58 = vpop.permute.xlu1 %1996  ;;  %v1992_v11 = vpop.permute.xlu0 %1991 }
  0xda   : > { %v1726_v47 = vadd.f32 %v1717_v30, %v4831_v20  ;;  %5868 = vst [vmem:[#allocation14_spill] sm:$0xff] %v4924_v13  ;;  %5869 = vst [vmem:[#allocation15_spill] sm:$0xff] %v4926_v61  ;;  %v1770_v32 = vadd.f32 %v4510_v14, %v1758_v44  ;;  %v1771_v33 = vadd.f32 %v4510_v14, %v1759_v57  ;;  %v4930_v18 = vld [vmem:[#allocation2 + $0x2] ss:$2 sm:$0xff]  ;;  %v4942_v9 = vld [vmem:[#allocation2 + $0x3] ss:$2 sm:$0xff]  ;;  %4051 = vmatpush3.bf16.msra.mxu1 %v4277_v2 }
  0xdb   : > { %v4933_v51 = vmul.f32 %v4475_v42, %v1987_v10  ;;  %v4936_v20 = vmul.f32 %v4480_v43, %v1987_v10  ;;  %v4938_v48 = vld [vmem:[#allocation2] ss:$2 sm:$0xff]  ;;  %v1774_v5 = vmax.f32 %v1769_v1, 0.0  ;;  %v1751_v12 = vsel %vm434_vm1, %v1748_v53, %v1750_v21  ;;  %v4955_v57 = vld [vmem:[#allocation2 + $0x5] ss:$2 sm:$0xff] }
  0xdc   : > { %5870 = vst [vmem:[#allocation16_spill] sm:$0xff] %v4938_v48  ;;  %v4944_v7 = vld [vmem:[#allocation2 + $0x4] ss:$2 sm:$0xff]  ;;  %v1761_v6 = vadd.f32 %v1750_v21, %v1727_v27  ;;  %v4948_v35 = vmul.f32 %v4488_v49, %v1987_v10  ;;  %v1775_v44 = vmax.f32 %v1770_v32, 0.0  ;;  %v1776_v55 = vmax.f32 %v1771_v33, 0.0 }
  0xdd   : > { %v4953_v56 = vld [vmem:[%s5834_s3 + $0x28] sm:$0xff]   ;;  %v1760_v30 = vadd.f32 %v1751_v12, %v1726_v47  ;;  %v2032_v1 = vrot.slane %v4933_v51, 1  ;;  %v1162_v32 = vmax.f32 %v4823_v60, %v4827_v45  ;;  %1779 = vst.msk [vmem:[#allocation2] sm:$0xff] %vm471_vm2, %v1774_v5  ;;  %v5845_v51 = vrot.slane %v4936_v20, 2  ;;  %v2302_v48 = vpop.permute.xlu1 %2301 }
  0xde   : > { %5872 = vst [vmem:[#allocation18_spill] sm:$0xff] %v4953_v56  ;;  %v1773_v21 = vadd.f32 %v4510_v14, %v1761_v6  ;;  %v2005_v12 = vmul.f32 %v4488_v49, %v1982_v24  ;;  %1780 = vst.msk [vmem:[#allocation2 + $0x8] sm:$0xff] %vm471_vm2, %v1775_v44  ;;  %v1163_v6 = vmax.f32 %v4825_v50, %v4840_v62  ;;  %v2030_v60 = vrot.slane %v2020_v29, 1 }
  0xdf   : > { %v4958_v53 = vld [vmem:[#allocation2 + $0x12] ss:$2 sm:$0xff]  ;;  %v4960_v27 = vld [vmem:[#allocation2 + $0x13] ss:$2 sm:$0xff]  ;;  %v1772_v33 = vadd.f32 %v4510_v14, %v1760_v30  ;;  %v2064_v45 = vrot.slane %v2054_v0, 2  ;;  %1168 = vrot.lane.b32.xlu0 %v1162_v32, %s4360_s18  ;;  %v2023_v5 = vmul.f32 %v4475_v42, %v1997_v58  ;;  %4072 = vmatprep.subr.bf16.mxu1 %v4953_v56  ;;  %v2008_v24 = vmul.f32 %v4488_v49, %v1997_v58 }
  0xe0   : > { %v4962_v10 = vld [vmem:[#allocation2 + $0x14] ss:$2 sm:$0xff]  ;;  %v4970_v47 = vld [vmem:[#allocation2 + $0x15] ss:$2 sm:$0xff]  ;;  %v1778_v4 = vmax.f32 %v1773_v21, 0.0  ;;  %1170 = vrot.lane.b32.xlu1 %v1163_v6, %s4360_s18  ;;  %v2057_v44 = vmul.f32 %v4480_v43, %v1997_v58  ;;  %v2022_v29 = vmul.f32 %v4475_v42, %v1992_v11  ;;  %v2033_v32 = vsel %vm399_vm0, %v2030_v60, %v2032_v1 }
  0xe1   : > { %1781 = vst.msk [vmem:[#allocation2 + $0x10] sm:$0xff] %vm471_vm2, %v1776_v55  ;;  %v1777_v30 = vmax.f32 %v1772_v33, 0.0  ;;  %v4985_v50 = vld [vmem:[#allocation2 + $0x20] ss:$2 sm:$0x1]  ;;  %v5875_v55 = vrot.slane %v4863_v41, 1  ;;  %v2067_v6 = vsel %vm434_vm1, %v2064_v45, %v5845_v51  ;;  %v1164_v51 = vmax.f32 %v4885_v38, %v4887_v36 }
  0xe2   : > { %5873 = vst [vmem:[#allocation19_spill] sm:$0xff] %v4985_v50  ;;  %v4987_v62 = vld [vmem:[#allocation2 + $0x21] ss:$2 sm:$0x1]  ;;  %v5876_v58 = vrot.slane %v4876_v46, 2  ;;  %v2036_v40 = vrot.slane %v2023_v5, 1  ;;  %v2297_v46 = vpop.permute.xlu0 %2296  ;;  %v1186_v61 = vmax.f32 %v4842_v34, %v4855_v54 }
  0xe3   : > { %5874 = vst [vmem:[#allocation20_spill] sm:$0xff] %v4987_v62  ;;  %v4989_v2 = vld [vmem:[#allocation2 + $0x22] ss:$2 sm:$0x1]  ;;  %v4995_v0 = vld [vmem:[%s5832_s1 + $0x1] ss:$0 sm:$0xff]  ;;  %v2031_v21 = vsel %vm399_vm0, %v5875_v55, %v2030_v60  ;;  %v2044_v55 = vadd.f32 %v2033_v32, %v2005_v12  ;;  %v2007_v12 = vmul.f32 %v4488_v49, %v1992_v11  ;;  %1172 = vrot.lane.b32.xlu0 %v1164_v51, %s4360_s18 }
  0xe4   : > { %v2065_v33 = vsel %vm434_vm1, %v5876_v58, %v2064_v45  ;;  %v5007_v42 = vld [vmem:[#allocation2 + $0x23] ss:$2 sm:$0x1]  ;;  %v5009_v56 = vld [vmem:[#allocation2 + $0x24] ss:$2 sm:$0x1]  ;;  %v2043_v41 = vadd.f32 %v2031_v21, %v4860_v31  ;;  %v2056_v45 = vmul.f32 %v4480_v43, %v1992_v11  ;;  %v2047_v31 = vadd.f32 %v2036_v40, %v2008_v24  ;;  %1192 = vrot.lane.b32.xlu1 %v1186_v61, %s4359_s17 }
  0xe5   : > { %1782 = vst.msk [vmem:[#allocation2 + $0x18] sm:$0xff] %vm471_vm2, %v1777_v30  ;;  %v2070_v60 = vrot.slane %v2057_v44, 2  ;;  %v5013_v13 = vld [vmem:[#allocation2 + $0x25] ss:$2 sm:$0x1]  ;;  %v2034_v58 = vrot.slane %v2022_v29, 1  ;;  %v2078_v50 = vadd.f32 %v2067_v6, %v2044_v55  ;;  %v5037_v49 = vmul.f32 %v4995_v0, %v2302_v48  ;;  %v2312_v6 = vpop.permute.xlu1 %2311 }
  0xe6   : > { %1783 = vst.msk [vmem:[#allocation2 + $0x20] sm:$0x3f] %vm476_vm3, %v1778_v4  ;;  %v2077_v30 = vadd.f32 %v2065_v33, %v2043_v41  ;;  %v2068_v21 = vrot.slane %v2056_v45, 2  ;;  %v5029_v43 = vld [vmem:[%s5832_s1] ss:$0 sm:$0xff]  ;;  %v5879_v32 = vrot.slane %v4936_v20, 2  ;;  %v2307_v45 = vpop.permute.xlu0 %2306  ;;  %v2339_v20 = vmul.f32 %v4995_v0, %v2297_v46 }
  0xe7   : > { %v2035_v5 = vsel %vm399_vm0, %v2032_v1, %v2034_v58  ;;  %v2037_v44 = vsel %vm399_vm0, %v2034_v58, %v2036_v40  ;;  %v5034_v4 = vld [vmem:[%s5832_s1 + $0x2] ss:$0 sm:$0xff]  ;;  %v2090_v54 = vadd.f32 %v4510_v14, %v2078_v50  ;;  %v2081_v38 = vadd.f32 %v2070_v60, %v2047_v31  ;;  %v5046_v40 = vld [vmem:[#allocation2 + $0x1] ss:$2 sm:$0xff] }
  0xe8   : > { %v2089_v34 = vadd.f32 %v4510_v14, %v2077_v30  ;;  %v5041_v36 = vld [vmem:[#allocation2 + $0x2] ss:$2 sm:$0xff]  ;;  %v2045_v11 = vadd.f32 %v2035_v5, %v4948_v35  ;;  %5878 = vst [vmem:[#allocation22_spill] sm:$0xff] %v5046_v40  ;;  %v5048_v1 = vld [vmem:[#allocation2 + $0x3] ss:$2 sm:$0xff]  ;;  %v2046_v29 = vadd.f32 %v2037_v44, %v2007_v12  ;;  %v2069_v50 = vsel %vm434_vm1, %v5879_v32, %v2068_v21 }
  0xe9   : > { %v5044_v61 = vld [vmem:[#allocation2] ss:$2 sm:$0xff]  ;;  %v5052_v24 = vld [vmem:[#allocation2 + $0x5] ss:$2 sm:$0xff]  ;;  %v2071_v33 = vsel %vm434_vm1, %v2068_v21, %v2070_v60  ;;  %v2095_v35 = vmax.f32 %v2090_v54, 0.0  ;;  %v5062_v31 = vadd.f32 %v4510_v14, %v2081_v38  ;;  %v5065_v12 = vmul.f32 %v5034_v4, %v2302_v48 }
  0xea   : > { %5877 = vst [vmem:[#allocation21_spill] sm:$0xff] %v5044_v61  ;;  %v5050_v51 = vld [vmem:[#allocation2 + $0x4] ss:$2 sm:$0xff]  ;;  %v2094_v41 = vmax.f32 %v2089_v34, 0.0  ;;  %v2079_v55 = vadd.f32 %v2069_v50, %v2045_v11  ;;  %v2080_v5 = vadd.f32 %v2071_v33, %v2046_v29  ;;  %v2325_v54 = vmul.f32 %v5029_v43, %v2302_v48  ;;  %v4348_v50 = vld [vmem:[%s5833_s2] ss:$0 sm:$0xff] }
  0xeb   : > { %v2373_v11 = vmul.f32 %v5034_v4, %v2297_v46  ;;  %v1187_v38 = vmax.f32 %v4844_v19, %v4857_v3  ;;  %2100 = vst.msk [vmem:[#allocation2 + $0x8] sm:$0xff] %vm471_vm2, %v2095_v35  ;;  %v2384_v48 = vrot.slane %v5065_v12, 2  ;;  %v2349_v33 = vrot.slane %v2339_v20, 1 }
  0xec   : > { %v5059_v30 = vld [vmem:[#allocation2 + $0x10] ss:$2 sm:$0xff]  ;;  %v5068_v44 = vld [vmem:[#allocation2 + $0x11] ss:$2 sm:$0xff]  ;;  %v2091_v34 = vadd.f32 %v4510_v14, %v2079_v55  ;;  %2099 = vst.msk [vmem:[#allocation2] sm:$0xff] %vm471_vm2, %v2094_v41  ;;  %v2092_v14 = vadd.f32 %v4348_v50, %v2080_v5  ;;  %v1188_v55 = vmax.f32 %v4898_v63, %v4900_v17  ;;  %v2324_v3 = vmul.f32 %v5029_v43, %v2297_v46  ;;  %v2617_v63 = vpop.permute.xlu1 %2616 }
  0xed   : > { %5880 = vst [vmem:[#allocation23_spill] sm:$0xff] %v5059_v30  ;;  %5881 = vst [vmem:[#allocation24_spill] sm:$0xff] %v5068_v44  ;;  %v5070_v60 = vld [vmem:[#allocation2 + $0x12] ss:$2 sm:$0xff]  ;;  %v5072_v21 = vld [vmem:[#allocation2 + $0x13] ss:$2 sm:$0xff]  ;;  %1194 = vrot.lane.b32.xlu0 %v1187_v38, %s4359_s17  ;;  %v2342_v35 = vmul.f32 %v4995_v0, %v2312_v6  ;;  %v5100_v12 = vmul.f32 %v5034_v4, %v2312_v6  ;;  %v2327_v20 = vmul.f32 %v5029_v43, %v2312_v6  ;;  %v2317_v38 = vpop.permute.xlu0 %2316 }
  0xee   : > { %v5081_v29 = vld [vmem:[#allocation2 + $0x14] ss:$2 sm:$0xff]  ;;  %v5083_v32 = vld [vmem:[#allocation2 + $0x15] ss:$2 sm:$0xff]  ;;  %v2096_v19 = vmax.f32 %v2091_v34, 0.0  ;;  %v2383_v41 = vrot.slane %v2373_v11, 2  ;;  %1196 = vrot.lane.b32.xlu1 %v1188_v55, %s4359_s17  ;;  %v1483_v55 = vmax.f32 %v4958_v53, %v4960_v27  ;;  %v2343_v27 = vmul.f32 %v4995_v0, %v2317_v38 }
  0xef   : > { %v2098_v58 = vmax.f32 %v5062_v31, 0.0  ;;  %v2097_v61 = vmax.f32 %v2092_v14, 0.0  ;;  %v5882_v40 = vrot.slane %v5037_v49, 1  ;;  %v5102_v17 = vld [vmem:[#allocation2 + $0x20] ss:$2 sm:$0x1]  ;;  %v2375_v14 = vmul.f32 %v5034_v4, %v2307_v45 }
  0xf0   : > { %5883 = vst [vmem:[#allocation25_spill] sm:$0xff] %v5102_v17  ;;  %2101 = vst.msk [vmem:[#allocation2 + $0x10] sm:$0xff] %vm471_vm2, %v2096_v19  ;;  %v5108_v46 = vld [vmem:[%s5833_s2] ss:$0 sm:$0xff]  ;;  %v2354_v34 = vrot.slane %v2342_v35, 1  ;;  %v2385_v50 = vsel %vm434_vm1, %v2383_v41, %v2384_v48  ;;  %v2388_v35 = vrot.slane %v5100_v12, 2  ;;  %v2328_v44 = vmul.f32 %v5029_v43, %v2317_v38  ;;  %v5151_v17 = vpop.permute.xlu1 %2626 }
  0xf1   : > { %v2351_v5 = vsel %vm399_vm0, %v2349_v33, %v5882_v40  ;;  %v2341_v40 = vmul.f32 %v4995_v0, %v2307_v45  ;;  %v5112_v11 = vld [vmem:[#allocation2 + $0x21] ss:$2 sm:$0x1]  ;;  %2102 = vst.msk [vmem:[#allocation2 + $0x18] sm:$0xff] %vm471_vm2, %v2097_v61  ;;  %v1482_v33 = vmax.f32 %v4930_v18, %v4942_v9  ;;  %v2386_v41 = vrot.slane %v2375_v14, 2 }
  0xf2   : > { %v2363_v31 = vadd.f32 %v2351_v5, %v2324_v3  ;;  %5884 = vst [vmem:[#allocation26_spill] sm:$0xff] %v5112_v11  ;;  %v5121_v19 = vld [vmem:[#allocation2 + $0x22] ss:$2 sm:$0x1]  ;;  %v2326_v5 = vmul.f32 %v5029_v43, %v2307_v45  ;;  %1490 = vrot.lane.b32.xlu1 %v1483_v55, %s4360_s18  ;;  %v5132_v18 = vmul.f32 %v5029_v43, %v2617_v63  ;;  %v5885_v12 = vrot.slane %v5037_v49, 1 }
  0xf3   : > { %v5123_v6 = vld [vmem:[#allocation2 + $0x23] ss:$2 sm:$0x1]  ;;  %v2352_v61 = vrot.slane %v2341_v40, 1  ;;  %1488 = vrot.lane.b32.xlu0 %v1482_v33, %s4360_s18  ;;  %v5135_v9 = vmul.f32 %v4995_v0, %v2617_v63  ;;  %v2387_v55 = vsel %vm434_vm1, %v2384_v48, %v2386_v41  ;;  %v2389_v49 = vsel %vm434_vm1, %v2386_v41, %v2388_v35  ;;  %v2622_v41 = vpop.permute.xlu0 %2621 }
  0xf4   : > { %v2397_v3 = vadd.f32 %v2385_v50, %v2363_v31  ;;  %v5127_v30 = vld [vmem:[#allocation2 + $0x24] ss:$2 sm:$0x1]  ;;  %v5137_v53 = vld [vmem:[#allocation2 + $0x25] ss:$2 sm:$0x1]  ;;  %v5146_v50 = vmul.f32 %v5034_v4, %v2617_v63  ;;  %v1484_v48 = vmax.f32 %v4989_v2, %v5007_v42 }
  0xf5   : > { %v2353_v31 = vsel %vm399_vm0, %v5885_v12, %v2352_v61  ;;  %v2355_v40 = vsel %vm399_vm0, %v2352_v61, %v2354_v34  ;;  %2103 = vst.msk [vmem:[#allocation2 + $0x20] sm:$0x3f] %vm476_vm3, %v2098_v58  ;;  %v2356_v11 = vrot.slane %v2343_v27, 1  ;;  %v2377_v12 = vmul.f32 %v5034_v4, %v2317_v38  ;;  %v5155_v61 = vld [vmem:[#allocation2] ss:$2 sm:$0xff] }
  0xf6   : > { %v2409_v45 = vadd.f32 %v5108_v46, %v2397_v3  ;;  %v2364_v14 = vadd.f32 %v2353_v31, %v2325_v54  ;;  %v2365_v33 = vadd.f32 %v2355_v40, %v2326_v5  ;;  %v1506_v5 = vmax.f32 %v4944_v7, %v4955_v57 }
  0xf7   : > { %v5157_v8 = vld [vmem:[#allocation2 + $0x2] ss:$2 sm:$0xff]  ;;  %v5159_v58 = vld [vmem:[#allocation2 + $0x3] ss:$2 sm:$0xff]  ;;  %v2669_v27 = vrot.slane %v5135_v9, 1  ;;  %v2367_v31 = vadd.f32 %v2356_v11, %v2328_v44  ;;  %v5173_v40 = vmul.f32 %v4995_v0, %v5151_v17  ;;  %v2390_v7 = vrot.slane %v2377_v12, 2  ;;  %1492 = vrot.lane.b32.xlu0 %v1484_v48, %s4360_s18 }
  0xf8   : > { %v2414_v3 = vmax.f32 %v2409_v45, 0.0  ;;  %v2398_v63 = vadd.f32 %v2387_v55, %v2364_v14  ;;  %v2399_v62 = vadd.f32 %v2389_v49, %v2365_v33  ;;  %v5161_v54 = vld [vmem:[#allocation2 + $0x4] ss:$2 sm:$0xff]  ;;  %v5168_v38 = vld [vmem:[#allocation2 + $0x5] ss:$2 sm:$0xff]  ;;  %v2357_v45 = vsel %vm399_vm0, %v2354_v34, %v2356_v11  ;;  %1512 = vrot.lane.b32.xlu1 %v1506_v5, %s4359_s17 }
  0xf9   : > { %5886 = vst [vmem:[#allocation27_spill] sm:$0xff] %v5161_v54  ;;  %5887 = vst [vmem:[#allocation28_spill] sm:$0xff] %v5168_v38  ;;  %v5175_v14 = vld [vmem:[#allocation2 + $0x1] ss:$2 sm:$0xff]  ;;  %v2366_v42 = vadd.f32 %v2357_v45, %v2327_v20  ;;  %v5182_v57 = vld [vmem:[#allocation2 + $0x10] ss:$2 sm:$0xff]  ;;  %v5190_v9 = vmul.f32 %v5034_v4, %v5151_v17  ;;  %v2694_v54 = vmul.f32 %v5034_v4, %v2622_v41  ;;  %v2637_v38 = vpop.permute.xlu1 %2636 }
  0xfa   : > { %v2410_v33 = vadd.f32 %v5108_v46, %v2398_v63  ;;  %v2411_v2 = vadd.f32 %v5108_v46, %v2399_v62  ;;  %2419 = vst.msk [vmem:[#allocation2] sm:$0xff] %vm471_vm2, %v2414_v3  ;;  %v5184_v44 = vld [vmem:[#allocation2 + $0x11] ss:$2 sm:$0xff]  ;;  %v2703_v34 = vrot.slane %v5146_v50, 2  ;;  %v2660_v62 = vmul.f32 %v4995_v0, %v2622_v41 }
  0xfb   : > { %v2391_v3 = vsel %vm434_vm1, %v2388_v35, %v2390_v7  ;;  %v2401_v63 = vadd.f32 %v2390_v7, %v2367_v31  ;;  %v1507_v35 = vmax.f32 %v4962_v10, %v4970_v47  ;;  %v1508_v31 = vmax.f32 %v5009_v56, %v5013_v13  ;;  %v2632_v56 = vpop.permute.xlu0 %2631 }
  0xfc   : > { %v2415_v20 = vmax.f32 %v2410_v33, 0.0  ;;  %v2416_v55 = vmax.f32 %v2411_v2, 0.0  ;;  %v5193_v49 = vld [vmem:[#allocation2 + $0x12] ss:$2 sm:$0xff]  ;;  %v5195_v12 = vld [vmem:[#allocation2 + $0x13] ss:$2 sm:$0xff]  ;;  %v2400_v5 = vadd.f32 %v2391_v3, %v2366_v42  ;;  %v2645_v2 = vmul.f32 %v5029_v43, %v2622_v41 }
  0xfd   : > { %v5198_v48 = vld [vmem:[#allocation2 + $0x14] ss:$2 sm:$0xff]  ;;  %v5200_v50 = vld [vmem:[#allocation2 + $0x15] ss:$2 sm:$0xff]  ;;  %v2670_v11 = vrot.slane %v2660_v62, 1  ;;  %v2413_v33 = vadd.f32 %v5108_v46, %v2401_v63  ;;  %v5888_v62 = vrot.slane %v5173_v40, 1  ;;  %1514 = vrot.lane.b32.xlu0 %v1507_v35, %s4359_s17  ;;  %1516 = vrot.lane.b32.xlu1 %v1508_v31, %s4359_s17  ;;  %v2663_v13 = vmul.f32 %v4995_v0, %v2637_v38 }
  0xfe   : > { %2421 = vst.msk [vmem:[#allocation2 + $0x10] sm:$0xff] %vm471_vm2, %v2416_v55  ;;  %2420 = vst.msk [vmem:[#allocation2 + $0x8] sm:$0xff] %vm471_vm2, %v2415_v20  ;;  %v2412_v42 = vadd.f32 %v5108_v46, %v2400_v5  ;;  %v2704_v3 = vrot.slane %v2694_v54, 2  ;;  %v5221_v10 = vld [vmem:[#allocation2 + $0x22] ss:$2 sm:$0x1] }
  0xff   : > { %v2671_v7 = vsel %vm399_vm0, %v2669_v27, %v2670_v11  ;;  %v2673_v55 = vsel %vm399_vm0, %v2670_v11, %v5888_v62  ;;  %v2418_v63 = vmax.f32 %v2413_v33, 0.0  ;;  %v5223_v47 = vld [vmem:[#allocation2 + $0x23] ss:$2 sm:$0x1]  ;;  %v2697_v33 = vmul.f32 %v5034_v4, %v2637_v38 }
 0x100   : > { %v2683_v41 = vadd.f32 %v2671_v7, %v5132_v18  ;;  %v2684_v45 = vadd.f32 %v2673_v55, %v2645_v2  ;;  %v5225_v27 = vld [vmem:[#allocation2 + $0x24] ss:$2 sm:$0x1]  ;;  %v5227_v20 = vld [vmem:[#allocation2 + $0x25] ss:$2 sm:$0x1]  ;;  %v2705_v11 = vsel %vm434_vm1, %v2703_v34, %v2704_v3  ;;  %v2648_v7 = vmul.f32 %v5029_v43, %v2637_v38 }
 0x101   : > { %5889 = vst [vmem:[#allocation29_spill] sm:$0xff] %v5225_v27  ;;  %v2417_v54 = vmax.f32 %v2412_v42, 0.0  ;;  %v5890_v18 = vrot.slane %v5190_v9, 2  ;;  %v5234_v2 = vld [vmem:[#allocation2 + $0x20] ss:$2 sm:$0x1]  ;;  %v2662_v34 = vmul.f32 %v4995_v0, %v2632_v56  ;;  %v2696_v27 = vmul.f32 %v5034_v4, %v2632_v56 }
 0x102   : > { %v2717_v35 = vadd.f32 %v2705_v11, %v2683_v41  ;;  %v2676_v62 = vrot.slane %v2663_v13, 1  ;;  %v5237_v55 = vld [vmem:[#allocation2 + $0x21] ss:$2 sm:$0x1]  ;;  %v2710_v42 = vrot.slane %v2697_v33, 2  ;;  %v1803_v13 = vmax.f32 %v5070_v60, %v5072_v21 }
 0x103   : > { %v2707_v5 = vsel %vm434_vm1, %v2704_v3, %v5890_v18  ;;  %2422 = vst.msk [vmem:[#allocation2 + $0x18] sm:$0xff] %vm471_vm2, %v2417_v54  ;;  %v1802_v3 = vmax.f32 %v5041_v36, %v5048_v1  ;;  %v2646_v54 = vmul.f32 %v5029_v43, %v5151_v17  ;;  %v2674_v11 = vrot.slane %v2662_v34, 1 }
 0x104   : > { %v2718_v31 = vadd.f32 %v2707_v5, %v2684_v45  ;;  %2423 = vst.msk [vmem:[#allocation2 + $0x20] sm:$0x3f] %vm476_vm3, %v2418_v63  ;;  %v2729_v41 = vadd.f32 %v5108_v46, %v2717_v35  ;;  %v2687_v38 = vadd.f32 %v2676_v62, %v2648_v7  ;;  %v2708_v0 = vrot.slane %v2696_v27, 2  ;;  %1810 = vrot.lane.b32.xlu1 %v1803_v13, %s4360_s18 }
 0x105   : > { %1808 = vrot.lane.b32.xlu0 %v1802_v3, %s4360_s18  ;;  %v5252_v4 = vld [vmem:[#allocation2 + $0x2] ss:$2 sm:$0xff]  ;;  %v5254_v36 = vld [vmem:[#allocation2 + $0x3] ss:$2 sm:$0xff]  ;;  %v2647_v5 = vmul.f32 %v5029_v43, %v2632_v56  ;;  %v5891_v21 = vrot.slane %v5173_v40, 1  ;;  %v2677_v27 = vsel %vm399_vm0, %v2674_v11, %v2676_v62  ;;  %v1804_v35 = vmax.f32 %v5121_v19, %v5123_v6 }
 0x106   : > { %v2730_v45 = vadd.f32 %v5108_v46, %v2718_v31  ;;  %v2734_v1 = vmax.f32 %v2729_v41, 0.0  ;;  %v2721_v18 = vadd.f32 %v2710_v42, %v2687_v38  ;;  %v5258_v33 = vld [vmem:[#allocation2 + $0x4] ss:$2 sm:$0xff]  ;;  %v5260_v60 = vld [vmem:[#allocation2 + $0x5] ss:$2 sm:$0xff]  ;;  %v1826_v3 = vmax.f32 %v5050_v51, %v5052_v24 }
 0x107   : > { %v2675_v17 = vsel %vm399_vm0, %v5891_v21, %v2674_v11  ;;  %v5268_v31 = vld [vmem:[#allocation2] ss:$2 sm:$0xff]  ;;  %v5270_v7 = vld [vmem:[#allocation2 + $0x1] ss:$2 sm:$0xff]  ;;  %v2686_v34 = vadd.f32 %v2677_v27, %v2647_v5  ;;  %v5892_v40 = vrot.slane %v5190_v9, 2  ;;  %v2711_v19 = vsel %vm434_vm1, %v2708_v0, %v2710_v42 }
 0x108   : > { %v2735_v63 = vmax.f32 %v2730_v45, 0.0  ;;  %v2733_v43 = vadd.f32 %v5108_v46, %v2721_v18  ;;  %v2685_v56 = vadd.f32 %v2675_v17, %v2646_v54  ;;  %2739 = vst.msk [vmem:[#allocation2] sm:$0xff] %vm471_vm2, %v2734_v1  ;;  %1832 = vrot.lane.b32.xlu1 %v1826_v3, %s4359_s17  ;;  %v1827_v24 = vmax.f32 %v5081_v29, %v5083_v32  ;;  %v5894_v27 = vld [vmem:[#allocation20_spill] sm:$0xff]  ;;  %v5900_v3 = vld [vmem:[#allocation26_spill] sm:$0xff] }
 0x109   : > { %v2709_v62 = vsel %vm434_vm1, %v5892_v40, %v2708_v0  ;;  %1812 = vrot.lane.b32.xlu0 %v1804_v35, %s4360_s18  ;;  %v2720_v45 = vadd.f32 %v2711_v19, %v2686_v34  ;;  %v491_v42 = vmax.f32 %v4625_v15, %v4627_v16  ;;  %v1828_v1 = vmax.f32 %v5127_v30, %v5137_v53  ;;  %v5895_v35 = vld [vmem:[#allocation19_spill] sm:$0xff]  ;;  %v5901_v40 = vld [vmem:[#allocation25_spill] sm:$0xff]  ;;  %v5902_v19 = vld [vmem:[#allocation24_spill] sm:$0xff] }
 0x10a   : > { %2740 = vst.msk [vmem:[#allocation2 + $0x8] sm:$0xff] %vm471_vm2, %v2735_v63  ;;  %v2738_v6 = vmax.f32 %v2733_v43, 0.0  ;;  %v2719_v41 = vadd.f32 %v2709_v62, %v2685_v56  ;;  %v5283_v38 = vld [vmem:[#allocation2 + $0x10] ss:$2 sm:$0xff]  ;;  %v5285_v51 = vld [vmem:[#allocation2 + $0x11] ss:$2 sm:$0xff]  ;;  %v490_v5 = vmax.f32 %v4597_v52, %v4599_v59  ;;  %v489_v15 = vmax.f32 %v4555_v22, %v4562_v28 }
 0x10b   : > { %v2437_v9 = vld [vmem:[#allocation2 + $0x12] ss:$2 sm:$0xff]  ;;  %v2440_v13 = vld [vmem:[#allocation2 + $0x13] ss:$2 sm:$0xff]  ;;  %v2732_v0 = vadd.f32 %v5108_v46, %v2720_v45  ;;  %495 = vst.msk [vmem:[#allocation3 + $0x10] sm:$0x1] %vm494_vm4, %v491_v42  ;;  %v2122_v30 = vmax.f32 %v5157_v8, %v5159_v58  ;;  %v1152_v53 = vmax.f32 %v4853_v26, %v4869_v25  ;;  %v2123_v22 = vmax.f32 %v5193_v49, %v5195_v12 }
 0x10c   : > { %v5289_v54 = vld [vmem:[#allocation2 + $0x14] ss:$2 sm:$0xff]  ;;  %v2731_v11 = vadd.f32 %v5108_v46, %v2719_v41  ;;  %v2441_v18 = vld [vmem:[#allocation2 + $0x23] ss:$2 sm:$0x1]  ;;  %1836 = vrot.lane.b32.xlu1 %v1828_v1, %s4359_s17  ;;  %493 = vst.msk [vmem:[#allocation3 + $0x8] sm:$0xff] %vm471_vm2, %v490_v5  ;;  %v2124_v28 = vmax.f32 %v5221_v10, %v5223_v47  ;;  %v1151_v8 = vmax.f32 %v4815_v37, %v4817_v39 }
 0x10d   : > { %v2438_v63 = vld [vmem:[#allocation2 + $0x22] ss:$2 sm:$0x1]  ;;  %1834 = vrot.lane.b32.xlu0 %v1827_v24, %s4359_s17  ;;  %v2464_v29 = vld [vmem:[#allocation2 + $0x15] ss:$2 sm:$0xff]  ;;  %v2737_v21 = vmax.f32 %v2732_v0, 0.0  ;;  %v1472_v49 = vmax.f32 %v5895_v35, %v5894_v27  ;;  %v1792_v62 = vmax.f32 %v5901_v40, %v5900_v3  ;;  %v2443_v5 = vmax.f32 %v2437_v9, %v2440_v13 }
 0x10e   : > { %v2462_v32 = vld [vmem:[#allocation2 + $0x24] ss:$2 sm:$0x1]  ;;  %v2736_v16 = vmax.f32 %v2731_v11, 0.0  ;;  %492 = vst.msk [vmem:[#allocation3] sm:$0xff] %vm471_vm2, %v489_v15  ;;  %v5893_v58 = vld [vmem:[#allocation13_spill] sm:$0xff]  ;;  %v2430_v15 = vmax.f32 %v5268_v31, %v5270_v7  ;;  %v2147_v11 = vmax.f32 %v5198_v48, %v5200_v50  ;;  %v2467_v48 = vmax.f32 %v5289_v54, %v2464_v29 }
 0x10f   : > { %v2465_v46 = vld [vmem:[#allocation2 + $0x25] ss:$2 sm:$0x1]  ;;  %v5307_v52 = vld [vmem:[#allocation2 + $0x20] ss:$2 sm:$0x1]  ;;  %v1150_v17 = vmax.f32 %v5893_v58, %v4812_v23 }
 0x110   : > { %v5309_v59 = vld [vmem:[#allocation2 + $0x21] ss:$2 sm:$0x1]  ;;  %2741 = vst.msk [vmem:[#allocation2 + $0x10] sm:$0xff] %vm471_vm2, %v2736_v16  ;;  %2742 = vst.msk [vmem:[#allocation2 + $0x18] sm:$0xff] %vm471_vm2, %v2737_v21  ;;  %v5896_v12 = vld [vmem:[#allocation15_spill] sm:$0xff]  ;;  %2130 = vrot.lane.b32.xlu1 %v2123_v22, %s4360_s18  ;;  %v2442_v16 = vmax.f32 %v5252_v4, %v5254_v36  ;;  %v2468_v50 = vmax.f32 %v2462_v32, %v2465_v46 }
 0x111   : > { %2743 = vst.msk [vmem:[#allocation2 + $0x20] sm:$0x3f] %vm476_vm3, %v2738_v6  ;;  %2128 = vrot.lane.b32.xlu0 %v2122_v30, %s4360_s18  ;;  %v5897_v43 = vld [vmem:[#allocation14_spill] sm:$0xff]  ;;  %v5898_v47 = vld [vmem:[#allocation17_spill] sm:$0xff]  ;;  %v5899_v56 = vld [vmem:[#allocation16_spill] sm:$0xff]  ;;  %v5920_v7 = vmax.f32 %v5307_v52, %v5309_v59 }
 0x112   : > { %v1471_v10 = vmax.f32 %v5897_v43, %v5896_v12  ;;  %v1470_v34 = vmax.f32 %v5899_v56, %v5898_v47  ;;  %v5903_v6 = vld [vmem:[#allocation23_spill] sm:$0xff]  ;;  %v5904_v45 = vld [vmem:[#allocation22_spill] sm:$0xff]  ;;  %v5905_v24 = vld [vmem:[#allocation21_spill] sm:$0xff] }
 0x113   : > { %v1791_v41 = vmax.f32 %v5903_v6, %v5902_v19  ;;  %v1790_v42 = vmax.f32 %v5905_v24, %v5904_v45  ;;  %v5906_v21 = vld [vmem:[#allocation28_spill] sm:$0xff]  ;;  %v5907_v30 = vld [vmem:[#allocation27_spill] sm:$0xff]  ;;  %v5908_v0 = vld [vmem:[#allocation29_spill] sm:$0xff] }
 0x114   : > { %v2146_v22 = vmax.f32 %v5907_v30, %v5906_v21  ;;  %v2148_v1 = vmax.f32 %v5908_v0, %v5227_v20  ;;  %v2466_v21 = vmax.f32 %v5258_v33, %v5260_v60  ;;  %v4286_v37 = vld [vmem:[%s5834_s3 + $0x28] sm:$0xff]   ;;  %v5915_v39 = vld [vmem:[#allocation18_spill] sm:$0xff]  ;;  %v4294_v3 = vld [vmem:[%s5834_s3 + $0x20] sm:$0xff]  }
 0x115   : > { %2132 = vrot.lane.b32.xlu0 %v2124_v28, %s4360_s18  ;;  %v2444_v28 = vmax.f32 %v2438_v63, %v2441_v18  ;;  %v4284_v26 = vld [vmem:[%s5834_s3 + $0x18] sm:$0xff]   ;;  %v4292_v12 = vld [vmem:[%s5834_s3 + $0x28] sm:$0xff]   ;;  %v4291_v43 = vld [vmem:[%s5834_s3 + $0x10] sm:$0xff]  }
 0x116   : > { %2152 = vrot.lane.b32.xlu1 %v2146_v22, %s4359_s17  ;;  %v4290_v27 = vld [vmem:[%s5834_s3 + $0x18] sm:$0xff]   ;;  %v2744_v59 = vld [vmem:[#allocation2] ss:$2 sm:$0xff] }
 0x117   : > { %v2756_v20 = vld [vmem:[#allocation2 + $0x2] ss:$2 sm:$0xff]  ;;  %v2783_v60 = vld [vmem:[#allocation2 + $0x5] ss:$2 sm:$0xff]  ;;  %v4296_v6 = vld [vmem:[%s5834_s3 + $0x18] sm:$0xff]  }
 0x118   : > { %v2757_v4 = vld [vmem:[#allocation2 + $0x12] ss:$2 sm:$0xff]  ;;  %v2760_v36 = vld [vmem:[#allocation2 + $0x13] ss:$2 sm:$0xff] }
 0x119   : > { %2154 = vrot.lane.b32.xlu0 %v2147_v11, %s4359_s17  ;;  %v2759_v11 = vld [vmem:[#allocation2 + $0x3] ss:$2 sm:$0xff]  ;;  %v2763_v13 = vmax.f32 %v2757_v4, %v2760_v36  ;;  %v2758_v63 = vld [vmem:[#allocation2 + $0x22] ss:$2 sm:$0x1] }
 0x11a   : > { %2156 = vrot.lane.b32.xlu1 %v2148_v1, %s4359_s17  ;;  %v2762_v9 = vmax.f32 %v2756_v20, %v2759_v11  ;;  %v2761_v18 = vld [vmem:[#allocation2 + $0x23] ss:$2 sm:$0x1]  ;;  %v2780_v33 = vld [vmem:[#allocation2 + $0x4] ss:$2 sm:$0xff] }
 0x11b   : > { %v2764_v54 = vmax.f32 %v2758_v63, %v2761_v18  ;;  %v2786_v29 = vmax.f32 %v2780_v33, %v2783_v60  ;;  %v2781_v32 = vld [vmem:[#allocation2 + $0x14] ss:$2 sm:$0xff]  ;;  %v2784_v46 = vld [vmem:[#allocation2 + $0x15] ss:$2 sm:$0xff] }
 0x11c   : > { %v2782_v0 = vld [vmem:[#allocation2 + $0x24] ss:$2 sm:$0x1]  ;;  %v2785_v1 = vld [vmem:[#allocation2 + $0x25] ss:$2 sm:$0x1] }
 0x11d   : > { %2448 = vrot.lane.b32.xlu0 %v2442_v16, %s4360_s18  ;;  %v2788_v16 = vmax.f32 %v2782_v0, %v2785_v1  ;;  %v5913_v33 = vld [vmem:[#allocation8_spill] sm:$0xff]  ;;  %v5914_v60 = vld [vmem:[#allocation7_spill] sm:$0xff] }
 0x11e   : > { %2450 = vrot.lane.b32.xlu1 %v2443_v5, %s4360_s18  ;;  %v2787_v5 = vmax.f32 %v2781_v32, %v2784_v46 }
 0x121   : > { %2452 = vrot.lane.b32.xlu0 %v2444_v28, %s4360_s18 }
 0x122   : > { %2472 = vrot.lane.b32.xlu1 %v2466_v21, %s4359_s17 }
 0x125   : > { %2474 = vrot.lane.b32.xlu0 %v2467_v48, %s4359_s17  ;;  %v5909_v48 = vld [vmem:[#allocation12_spill] sm:$0xff] }
 0x126   : > { %2476 = vrot.lane.b32.xlu1 %v2468_v50, %s4359_s17  ;;  %v5910_v50 = vld [vmem:[#allocation11_spill] sm:$0xff] }
 0x127   : > { %v832_v20 = vmax.f32 %v5910_v50, %v5909_v48  ;;  %v4280_v50 = vld [vmem:[%s5834_s3 + $0x10] sm:$0xff]  }
 0x129   : > { %2768 = vrot.lane.b32.xlu0 %v2762_v9, %s4360_s18  ;;  %v5911_v9 = vld [vmem:[#allocation10_spill] sm:$0xff] }
 0x12a   : > { %2770 = vrot.lane.b32.xlu1 %v2763_v13, %s4360_s18  ;;  %v5912_v13 = vld [vmem:[#allocation9_spill] sm:$0xff] }
 0x12b   : > { %v551_v30 = vpop.permute.xlu1 %550  ;;  %v831_v63 = vmax.f32 %v5912_v13, %v5911_v9 }
 0x12c   : > { %v519_v22 = vpop.permute.xlu0 %518 }
 0x12d   : > { %2772 = vrot.lane.b32.xlu0 %v2764_v54, %s4360_s18  ;;  %527 = vst.msk [vmem:[#allocation3 + $0x10] sm:$0x1] %vm526_vm5, %v519_v22  ;;  %v830_v54 = vmax.f32 %v5914_v60, %v5913_v33  ;;  %v4349_v22 = vld [vmem:[%s5834_s3 + $0x28] sm:$0xff]  }
 0x12e   : > { %2792 = vrot.lane.b32.xlu1 %v2786_v29, %s4359_s17  ;;  %559 = vst.msk [vmem:[#allocation3 + $0x10] sm:$0x1] %vm558_vm6, %v551_v30 }
 0x131   : > { %2794 = vrot.lane.b32.xlu0 %v2787_v5, %s4359_s17  ;;  %v4276_v5 = vld [vmem:[%s5834_s3 + $0x20] sm:$0xff]  }
 0x132   : > { %2796 = vrot.lane.b32.xlu1 %v2788_v16, %s4359_s17  ;;  %v515_v28 = vpop.permute.xlu0 %514  ;;  %s3679_s17 = sshll.u32 %s5924_s12, 3 }
 0x133   : > { %v517_v21 = vpop.permute.xlu1 %516  ;;  %524 = vst.msk [vmem:[#allocation3] sm:$0xff] %vm523_vm7, %v515_v28  ;;  %v4278_v28 = vld [vmem:[%s5834_s3 + $0x18] sm:$0xff]   ;;  %s337_s28 = scalar_lea.vmem %s5840_s9, %s3679_s17 }
 0x134   : > { %525 = vst.msk [vmem:[#allocation3 + $0x8] sm:$0xff] %vm523_vm7, %v517_v21 }
 0x135   : > { %v562_v11 = vld [vmem:[#allocation3 + $0x10] sm:$0x1] }
 0x136   : > { %v549_v4 = vpop.permute.xlu0 %548  ;;  %835 = vst.msk [vmem:[#allocation3 + $0x10] sm:$0x1] %vm494_vm4, %v832_v20  ;;  %v564_v1 = vpack.c.bf16 %v562_v11, %v562_v11  ;;  %v4281_v11 = vld [vmem:[%s5834_s3 + $0x8] sm:$0xff]  }
 0x137   : > { %v547_v36 = vpop.permute.xlu1 %546  ;;  %557 = vst.msk [vmem:[#allocation3 + $0x8] sm:$0xff] %vm555_vm8, %v549_v4 }
 0x138   : > { %556 = vst.msk [vmem:[#allocation3] sm:$0xff] %vm555_vm8, %v547_v36 }
 0x13e   : > { %v561_v18 = vld [vmem:[#allocation3 + $0x8] sm:$0xff]  ;;  %v849_v32 = vpop.permute.xlu0 %848 }
 0x13f   : > { %834 = vst.msk [vmem:[#allocation3 + $0x8] sm:$0xff] %vm471_vm2, %v831_v63  ;;  %v560_v29 = vld [vmem:[#allocation3] sm:$0xff]  ;;  %v4283_v63 = vld [vmem:[%s5834_s3] sm:$0xff]  }
 0x140   : > { %v851_v46 = vpop.permute.xlu1 %850  ;;  %833 = vst.msk [vmem:[#allocation3] sm:$0xff] %vm471_vm2, %v830_v54  ;;  %v563_v0 = vpack.c.bf16 %v561_v18, %v560_v29  ;;  %v4287_v54 = vld [vmem:[%s5834_s3 + $0x8] sm:$0xff]  }
 0x141   : > { %858 = vst.msk [vmem:[#allocation3 + $0x8] sm:$0xff] %vm523_vm7, %v851_v46  ;;  %857 = vst.msk [vmem:[#allocation3] sm:$0xff] %vm523_vm7, %v849_v32  ;;  %v4289_v46 = vld [vmem:[%s5834_s3] sm:$0xff]  }
 0x142   : > { %4036 = vmatprep.mubr.msk.bf16.mxu0 %vm620_vm9, %v563_v0  ;;  %v853_v16 = vpop.permute.xlu0 %852 }
 0x143   : > { %4037 = vmatmul.mubr.msk.bf16.vlgmr.msra.gmra.mxu0 %vm620_vm9, %v564_v1  ;;  %859 = vst.msk [vmem:[#allocation3 + $0x10] sm:$0x1] %vm526_vm5, %v853_v16  ;;  %v4288_v1 = vld [vmem:[%s5834_s3 + $0x20] sm:$0xff]  }
 0x144   : > { %v873_v30 = vpop.permute.xlu1 %872  ;;  %4057 = vmatpush3.bf16.msra.mxu0 %v4349_v22  ;;  %v4293_v22 = vld [vmem:[%s5834_s3 + $0x8] sm:$0xff]  }
 0x145   : > { %881 = vst.msk [vmem:[#allocation3] sm:$0xff] %vm555_vm8, %v873_v30  ;;  %4058 = vmatprep.subr.bf16.mxu0 %v4276_v5 }
 0x146   : > { %v875_v48 = vpop.permute.xlu0 %874 }
 0x147   : > { %882 = vst.msk [vmem:[#allocation3 + $0x8] sm:$0xff] %vm555_vm8, %v875_v48 }
 0x148   : > { %4059 = vmatpush3.bf16.msra.mxu0 %v4276_v5 }
 0x149   : > { %4060 = vmatprep.subr.bf16.mxu0 %v4278_v28 }
 0x14b   : > { %v877_v21 = vpop.permute.xlu1 %876 }
 0x14c   : > { %883 = vst.msk [vmem:[#allocation3 + $0x10] sm:$0x1] %vm558_vm6, %v877_v21  ;;  %v884_v20 = vld [vmem:[#allocation3] sm:$0xff]  ;;  %4061 = vmatpush3.bf16.msra.mxu0 %v4278_v28 }
 0x14d   : > { %1153 = vst.msk [vmem:[#allocation3] sm:$0xff] %vm471_vm2, %v1150_v17  ;;  %4062 = vmatprep.subr.bf16.mxu0 %v4280_v50  ;;  %v4282_v17 = vld [vmem:[%s5834_s3 + $0x20] sm:$0xff]  }
 0x14e   : > { %v885_v13 = vld [vmem:[#allocation3 + $0x8] sm:$0xff] }
 0x14f   : > { %1154 = vst.msk [vmem:[#allocation3 + $0x8] sm:$0xff] %vm471_vm2, %v1151_v8  ;;  %v887_v23 = vpack.c.bf16 %v885_v13, %v884_v20 }
 0x150   : > { %4063 = vmatpush3.bf16.msra.mxu0 %v4280_v50  ;;  %v4295_v50 = vld [vmem:[%s5834_s3] sm:$0xff]  }
 0x151   : > { %v1169_v4 = vpop.permute.xlu0 %1168  ;;  %4064 = vmatprep.subr.bf16.mxu0 %v4281_v11  ;;  %4052 = vmatprep.mubr.msk.bf16.mxu1 %vm620_vm9, %v887_v23 }
 0x152   : > { %v1171_v36 = vpop.permute.xlu1 %1170  ;;  %1177 = vst.msk [vmem:[#allocation3] sm:$0xff] %vm523_vm7, %v1169_v4 }
 0x153   : > { %v886_v9 = vld [vmem:[#allocation3 + $0x10] sm:$0x1]  ;;  %1178 = vst.msk [vmem:[#allocation3 + $0x8] sm:$0xff] %vm523_vm7, %v1171_v36  ;;  %v4297_v36 = vld [vmem:[%s5834_s3 + $0x10] sm:$0xff]  }
 0x154   : > { %1155 = vst.msk [vmem:[#allocation3 + $0x10] sm:$0x1] %vm494_vm4, %v1152_v53  ;;  %v888_v58 = vpack.c.bf16 %v886_v9, %v886_v9  ;;  %4065 = vmatpush3.bf16.msra.mxu0 %v4281_v11  ;;  %v4285_v53 = vld [vmem:[%s5834_s3 + $0x10] sm:$0xff]   ;;  %v5916_v9 = vmax.f32 %v5155_v61, %v5175_v14  ;;  %v4299_v61 = vld [vmem:[%s5834_s3 + $0x8] sm:$0xff]   ;;  %v5918_v14 = vmax.f32 %v5234_v2, %v5237_v55  ;;  %v4301_v55 = vld [vmem:[%s5834_s3] sm:$0xff]  }
 0x155   : > { %v1173_v25 = vpop.permute.xlu0 %1172  ;;  %4066 = vmatprep.subr.bf16.mxu0 %v4283_v63 }
 0x156   : > { %v1193_v18 = vpop.permute.xlu1 %1192  ;;  %4053 = vmatmul.mubr.msk.bf16.vlgmr.msra.gmra.mxu1 %vm620_vm9, %v888_v58  ;;  %1179 = vst.msk [vmem:[#allocation3 + $0x10] sm:$0x1] %vm526_vm5, %v1173_v25  ;;  %v5917_v58 = vmax.f32 %v5182_v57, %v5184_v44  ;;  %v4300_v57 = vld [vmem:[%s5834_s3 + $0x20] sm:$0xff]  }
 0x157   : > { %1201 = vst.msk [vmem:[#allocation3] sm:$0xff] %vm555_vm8, %v1193_v18  ;;  %4073 = vmatpush3.bf16.msra.mxu1 %v5915_v39 }
 0x158   : > { %4074 = vmatprep.subr.bf16.mxu1 %v4282_v17  ;;  %4067 = vmatpush3.bf16.msra.mxu0 %v4283_v63 }
 0x159   : > { %4088 = vmatprep.subr.bf16.mxu0 %v4286_v37 }
 0x15b   : > { %4075 = vmatpush3.bf16.msra.mxu1 %v4282_v17 }
 0x15c   : > { %4076 = vmatprep.subr.bf16.mxu1 %v4284_v26 }
 0x15e   : > { %v1204_v60 = vld [vmem:[#allocation3] sm:$0xff] }
 0x15f   : > { %v1195_v8 = vpop.permute.xlu0 %1194  ;;  %1473 = vst.msk [vmem:[#allocation3] sm:$0xff] %vm471_vm2, %v1470_v34  ;;  %4077 = vmatpush3.bf16.msra.mxu1 %v4284_v26 }
 0x160   : > { %v1197_v33 = vpop.permute.xlu1 %1196  ;;  %1202 = vst.msk [vmem:[#allocation3 + $0x8] sm:$0xff] %vm555_vm8, %v1195_v8  ;;  %4078 = vmatprep.subr.bf16.mxu1 %v4285_v53  ;;  %v4304_v8 = vld [vmem:[%s5834_s3 + $0x28] sm:$0xff]  }
 0x161   : > { %1203 = vst.msk [vmem:[#allocation3 + $0x10] sm:$0x1] %vm558_vm6, %v1197_v33  ;;  %v4303_v33 = vld [vmem:[%s5834_s3 + $0x10] sm:$0xff]  }
 0x163   : > { %4079 = vmatpush3.bf16.msra.mxu1 %v4285_v53 }
 0x164   : > { %v1491_v29 = vpop.permute.xlu1 %1490  ;;  %4080 = vmatprep.subr.bf16.mxu1 %v4287_v54 }
 0x165   : > { %v1489_v32 = vpop.permute.xlu0 %1488 }
 0x166   : > { %1497 = vst.msk [vmem:[#allocation3] sm:$0xff] %vm523_vm7, %v1489_v32 }
 0x167   : > { %v1205_v0 = vld [vmem:[#allocation3 + $0x8] sm:$0xff]  ;;  %4081 = vmatpush3.bf16.msra.mxu1 %v4287_v54 }
 0x168   : > { %v1206_v47 = vld [vmem:[#allocation3 + $0x10] sm:$0x1]  ;;  %1474 = vst.msk [vmem:[#allocation3 + $0x8] sm:$0xff] %vm471_vm2, %v1471_v10  ;;  %v1207_v56 = vpack.c.bf16 %v1205_v0, %v1204_v60  ;;  %4082 = vmatprep.subr.bf16.mxu1 %v4289_v46 }
 0x169   : > { %1475 = vst.msk [vmem:[#allocation3 + $0x10] sm:$0x1] %vm494_vm4, %v1472_v49  ;;  %v1208_v34 = vpack.c.bf16 %v1206_v47, %v1206_v47  ;;  %v1493_v16 = vpop.permute.xlu0 %1492  ;;  %v2747_v47 = vld [vmem:[#allocation2 + $0x1] ss:$2 sm:$0xff] }
 0x16a   : > { %1498 = vst.msk [vmem:[#allocation3 + $0x8] sm:$0xff] %vm523_vm7, %v1491_v29  ;;  %v1513_v5 = vpop.permute.xlu1 %1512  ;;  %4068 = vmatprep.mubr.msk.bf16.mxu0 %vm620_vm9, %v1207_v56  ;;  %v5919_v29 = vmax.f32 %v5283_v38, %v5285_v51  ;;  %v4305_v38 = vld [vmem:[%s5834_s3 + $0x8] sm:$0xff]   ;;  %v4306_v51 = vld [vmem:[%s5834_s3 + $0x20] sm:$0xff]  }
 0x16b   : > { %1521 = vst.msk [vmem:[#allocation3] sm:$0xff] %vm555_vm8, %v1513_v5  ;;  %4069 = vmatmul.mubr.msk.bf16.vlgmr.msra.gmra.mxu0 %vm620_vm9, %v1208_v34  ;;  %4083 = vmatpush3.bf16.msra.mxu1 %v4289_v46  ;;  %v4307_v56 = vld [vmem:[%s5834_s3] sm:$0xff]   ;;  %v4308_v34 = vld [vmem:[%s5834_s3 + $0x18] sm:$0xff]  }
 0x16c   : > { %1499 = vst.msk [vmem:[#allocation3 + $0x10] sm:$0x1] %vm526_vm5, %v1493_v16  ;;  %4089 = vmatpush3.bf16.msra.mxu0 %v4286_v37  ;;  %4104 = vmatprep.subr.bf16.mxu1 %v4292_v12  ;;  %v4302_v37 = vld [vmem:[%s5834_s3 + $0x18] sm:$0xff]   ;;  %v2750_v16 = vmax.f32 %v2744_v59, %v2747_v47 }
 0x16d   : > { %4090 = vmatprep.subr.bf16.mxu0 %v4288_v1  ;;  %v2748_v5 = vld [vmem:[#allocation2 + $0x11] ss:$2 sm:$0xff] }
 0x16f   : > { %v1517_v35 = vpop.permute.xlu1 %1516  ;;  %v1515_v49 = vpop.permute.xlu0 %1514 }
 0x170   : > { %4091 = vmatpush3.bf16.msra.mxu0 %v4288_v1  ;;  %1523 = vst.msk [vmem:[#allocation3 + $0x10] sm:$0x1] %vm558_vm6, %v1517_v35  ;;  %v2745_v1 = vld [vmem:[#allocation2 + $0x10] ss:$2 sm:$0xff] }
 0x171   : > { %1522 = vst.msk [vmem:[#allocation3 + $0x8] sm:$0xff] %vm555_vm8, %v1515_v49  ;;  %4092 = vmatprep.subr.bf16.mxu0 %v4290_v27 }
 0x172   : > { %v1524_v10 = vld [vmem:[#allocation3] sm:$0xff] }
 0x173   : > { %1793 = vst.msk [vmem:[#allocation3] sm:$0xff] %vm471_vm2, %v1790_v42 }
 0x174   : > { %4093 = vmatpush3.bf16.msra.mxu0 %v4290_v27  ;;  %v2746_v27 = vld [vmem:[#allocation2 + $0x20] ss:$2 sm:$0x1] }
 0x175   : > { %4094 = vmatprep.subr.bf16.mxu0 %v4291_v43 }
 0x176   : > { %v1811_v28 = vpop.permute.xlu1 %1810 }
 0x177   : > { %v1809_v30 = vpop.permute.xlu0 %1808  ;;  %v1526_v21 = vld [vmem:[#allocation3 + $0x10] sm:$0x1] }
 0x178   : > { %1817 = vst.msk [vmem:[#allocation3] sm:$0xff] %vm523_vm7, %v1809_v30  ;;  %v1525_v48 = vld [vmem:[#allocation3 + $0x8] sm:$0xff]  ;;  %4095 = vmatpush3.bf16.msra.mxu0 %v4291_v43  ;;  %v1528_v42 = vpack.c.bf16 %v1526_v21, %v1526_v21  ;;  %v2749_v43 = vld [vmem:[#allocation2 + $0x21] ss:$2 sm:$0x1]  ;;  %v2751_v30 = vmax.f32 %v2745_v1, %v2748_v5 }
 0x179   : > { %1795 = vst.msk [vmem:[#allocation3 + $0x10] sm:$0x1] %vm494_vm4, %v1792_v62  ;;  %v1527_v24 = vpack.c.bf16 %v1525_v48, %v1524_v10  ;;  %4096 = vmatprep.subr.bf16.mxu0 %v4293_v22  ;;  %v4298_v62 = vld [vmem:[%s5834_s3 + $0x28] sm:$0xff]   ;;  %v4309_v10 = vld [vmem:[%s5834_s3 + $0x10] sm:$0xff]   ;;  %v2752_v21 = vmax.f32 %v2746_v27, %v2749_v43 }
 0x17a   : > { %1794 = vst.msk [vmem:[#allocation3 + $0x8] sm:$0xff] %vm471_vm2, %v1791_v41  ;;  %v1833_v20 = vpop.permute.xlu1 %1832 }
 0x17b   : > { %v1813_v45 = vpop.permute.xlu0 %1812  ;;  %1818 = vst.msk [vmem:[#allocation3 + $0x8] sm:$0xff] %vm523_vm7, %v1811_v28  ;;  %4084 = vmatprep.mubr.msk.bf16.mxu1 %vm620_vm9, %v1527_v24 }
 0x17c   : > { %1819 = vst.msk [vmem:[#allocation3 + $0x10] sm:$0x1] %vm526_vm5, %v1813_v45  ;;  %4085 = vmatmul.mubr.msk.bf16.vlgmr.msra.gmra.mxu1 %vm620_vm9, %v1528_v42  ;;  %4097 = vmatpush3.bf16.msra.mxu0 %v4293_v22 }
 0x17d   : > { %1841 = vst.msk [vmem:[#allocation3] sm:$0xff] %vm555_vm8, %v1833_v20  ;;  %4105 = vmatpush3.bf16.msra.mxu1 %v4292_v12  ;;  %4098 = vmatprep.subr.bf16.mxu0 %v4295_v50 }
 0x17e   : > { %v1837_v19 = vpop.permute.xlu1 %1836  ;;  %4106 = vmatprep.subr.bf16.mxu1 %v4294_v3 }
 0x17f   : > { %v1835_v40 = vpop.permute.xlu0 %1834  ;;  %1843 = vst.msk [vmem:[#allocation3 + $0x10] sm:$0x1] %vm558_vm6, %v1837_v19 }
 0x180   : > { %1842 = vst.msk [vmem:[#allocation3 + $0x8] sm:$0xff] %vm555_vm8, %v1835_v40  ;;  %4099 = vmatpush3.bf16.msra.mxu0 %v4295_v50  ;;  %v4310_v50 = vld [vmem:[%s5834_s3 + $0x8] sm:$0xff]   ;;  %v4311_v40 = vld [vmem:[%s5834_s3] sm:$0xff]  }
 0x181   : > { %4107 = vmatpush3.bf16.msra.mxu1 %v4294_v3  ;;  %4120 = vmatprep.subr.bf16.mxu0 %v4298_v62 }
 0x182   : > { %v2131_v11 = vpop.permute.xlu1 %2130  ;;  %4108 = vmatprep.subr.bf16.mxu1 %v4296_v6 }
 0x183   : > { %v2129_v41 = vpop.permute.xlu0 %2128 }
 0x184   : > { %v1844_v4 = vld [vmem:[#allocation3] sm:$0xff] }
 0x185   : > { %2113 = vst.msk [vmem:[#allocation3] sm:$0xff] %vm471_vm2, %v5916_v9  ;;  %4109 = vmatpush3.bf16.msra.mxu1 %v4296_v6  ;;  %v4361_v9 = vmov 0.0  }
 0x186   : > { %2137 = vst.msk [vmem:[#allocation3] sm:$0xff] %vm523_vm7, %v2129_v41  ;;  %v1846_v23 = vld [vmem:[#allocation3 + $0x10] sm:$0x1]  ;;  %4110 = vmatprep.subr.bf16.mxu1 %v4297_v36 }
 0x187   : > { %v1845_v13 = vld [vmem:[#allocation3 + $0x8] sm:$0xff]  ;;  %v2133_v63 = vpop.permute.xlu0 %2132  ;;  %2115 = vst.msk [vmem:[#allocation3 + $0x10] sm:$0x1] %vm494_vm4, %v5918_v14  ;;  %v1848_v25 = vpack.c.bf16 %v1846_v23, %v1846_v23  ;;  %v4316_v23 = vld [vmem:[%s5836_s5 + $0x28] sm:$0xff]  }
 0x188   : > { %2114 = vst.msk [vmem:[#allocation3 + $0x8] sm:$0xff] %vm471_vm2, %v5917_v58  ;;  %v2153_v17 = vpop.permute.xlu1 %2152  ;;  %v1847_v18 = vpack.c.bf16 %v1845_v13, %v1844_v4  ;;  %v4312_v4 = vld [vmem:[%s5836_s5 + $0x38] sm:$0xff]   ;;  %v4314_v13 = vld [vmem:[%s5836_s5 + $0x30] sm:$0xff]   ;;  %v4317_v58 = vld [vmem:[%s5836_s5 + $0x8] sm:$0xff]  }
 0x189   : > { %2138 = vst.msk [vmem:[#allocation3 + $0x8] sm:$0xff] %vm523_vm7, %v2131_v11  ;;  %4111 = vmatpush3.bf16.msra.mxu1 %v4297_v36  ;;  %v4313_v36 = vld [vmem:[%s5836_s5 + $0x18] sm:$0xff]  }
 0x18a   : > { %2161 = vst.msk [vmem:[#allocation3] sm:$0xff] %vm555_vm8, %v2153_v17  ;;  %4100 = vmatprep.mubr.msk.bf16.mxu0 %vm620_vm9, %v1847_v18  ;;  %4112 = vmatprep.subr.bf16.mxu1 %v4299_v61  ;;  %v4318_v17 = vld [vmem:[%s5836_s5 + $0x20] sm:$0xff]  }
 0x18b   : > { %2139 = vst.msk [vmem:[#allocation3 + $0x10] sm:$0x1] %vm526_vm5, %v2133_v63  ;;  %4101 = vmatmul.mubr.msk.bf16.vlgmr.msra.gmra.mxu0 %vm620_vm9, %v1848_v25  ;;  %v2155_v44 = vpop.permute.xlu0 %2154  ;;  %v4315_v63 = vld [vmem:[%s5836_s5 + $0x10] sm:$0xff]   ;;  %v4319_v18 = vld [vmem:[%s5836_s5] sm:$0xff]  }
 0x18c   : > { %v2157_v2 = vpop.permute.xlu1 %2156  ;;  %2162 = vst.msk [vmem:[#allocation3 + $0x8] sm:$0xff] %vm555_vm8, %v2155_v44  ;;  %4121 = vmatpush3.bf16.msra.mxu0 %v4298_v62 }
 0x18d   : > { %2163 = vst.msk [vmem:[#allocation3 + $0x10] sm:$0x1] %vm558_vm6, %v2157_v2  ;;  %4122 = vmatprep.subr.bf16.mxu0 %v4300_v57  ;;  %4113 = vmatpush3.bf16.msra.mxu1 %v4299_v61  ;;  %v5659_v61 = vld [vmem:[%s5835_s4] ss:$0 sm:$0xff] }
 0x18e   : > { %4114 = vmatprep.subr.bf16.mxu1 %v4301_v55 }
 0x18f   : > { %v2449_v39 = vpop.permute.xlu0 %2448 }
 0x190   : > { %v2451_v26 = vpop.permute.xlu1 %2450  ;;  %4123 = vmatpush3.bf16.msra.mxu0 %v4300_v57 }
 0x191   : > { %v2164_v53 = vld [vmem:[#allocation3] sm:$0xff]  ;;  %4124 = vmatprep.subr.bf16.mxu0 %v4302_v37  ;;  %4115 = vmatpush3.bf16.msra.mxu1 %v4301_v55 }
 0x192   : > { %2433 = vst.msk [vmem:[#allocation3] sm:$0xff] %vm471_vm2, %v2430_v15  ;;  %4136 = vmatprep.subr.bf16.mxu1 %v4304_v8 }
 0x193   : > { %2457 = vst.msk [vmem:[#allocation3] sm:$0xff] %vm523_vm7, %v2449_v39  ;;  %v2165_v60 = vld [vmem:[#allocation3 + $0x8] sm:$0xff]  ;;  %v2453_v54 = vpop.permute.xlu0 %2452 }
 0x194   : > { %2434 = vst.msk [vmem:[#allocation3 + $0x8] sm:$0xff] %vm471_vm2, %v5919_v29  ;;  %v2473_v32 = vpop.permute.xlu1 %2472  ;;  %v2166_v46 = vld [vmem:[#allocation3 + $0x10] sm:$0x1]  ;;  %4125 = vmatpush3.bf16.msra.mxu0 %v4302_v37  ;;  %v2167_v31 = vpack.c.bf16 %v2165_v60, %v2164_v53 }
 0x195   : > { %2458 = vst.msk [vmem:[#allocation3 + $0x8] sm:$0xff] %vm523_vm7, %v2451_v26  ;;  %v2168_v15 = vpack.c.bf16 %v2166_v46, %v2166_v46  ;;  %4126 = vmatprep.subr.bf16.mxu0 %v4303_v33 }
 0x196   : > { %2481 = vst.msk [vmem:[#allocation3] sm:$0xff] %vm555_vm8, %v2473_v32  ;;  %4116 = vmatprep.mubr.msk.bf16.mxu1 %vm620_vm9, %v2167_v31 }
 0x197   : > { %2435 = vst.msk [vmem:[#allocation3 + $0x10] sm:$0x1] %vm494_vm4, %v5920_v7  ;;  %4117 = vmatmul.mubr.msk.bf16.vlgmr.msra.gmra.mxu1 %vm620_vm9, %v2168_v15  ;;  %v2475_v0 = vpop.permute.xlu0 %2474 }
 0x198   : > { %2459 = vst.msk [vmem:[#allocation3 + $0x10] sm:$0x1] %vm526_vm5, %v2453_v54  ;;  %v2477_v52 = vpop.permute.xlu1 %2476  ;;  %4127 = vmatpush3.bf16.msra.mxu0 %v4303_v33  ;;  %4137 = vmatpush3.bf16.msra.mxu1 %v4304_v8 }
 0x199   : > { %2482 = vst.msk [vmem:[#allocation3 + $0x8] sm:$0xff] %vm555_vm8, %v2475_v0  ;;  %4128 = vmatprep.subr.bf16.mxu0 %v4305_v38  ;;  %4138 = vmatprep.subr.bf16.mxu1 %v4306_v51 }
 0x19a   : > { %2483 = vst.msk [vmem:[#allocation3 + $0x10] sm:$0x1] %vm558_vm6, %v2477_v52 }
 0x19b   : > { %v2769_v12 = vpop.permute.xlu0 %2768 }
 0x19c   : > { %v2771_v35 = vpop.permute.xlu1 %2770  ;;  %4129 = vmatpush3.bf16.msra.mxu0 %v4305_v38  ;;  %4139 = vmatpush3.bf16.msra.mxu1 %v4306_v51 }
 0x19d   : > { %v2484_v49 = vld [vmem:[#allocation3] sm:$0xff]  ;;  %4130 = vmatprep.subr.bf16.mxu0 %v4307_v56  ;;  %4140 = vmatprep.subr.bf16.mxu1 %v4308_v34 }
 0x19e   : > { %2753 = vst.msk [vmem:[#allocation3] sm:$0xff] %vm471_vm2, %v2750_v16 }
 0x19f   : > { %2777 = vst.msk [vmem:[#allocation3] sm:$0xff] %vm523_vm7, %v2769_v12  ;;  %v2773_v28 = vpop.permute.xlu0 %2772 }
 0x1a0   : > { %v2485_v22 = vld [vmem:[#allocation3 + $0x8] sm:$0xff]  ;;  %v2793_v48 = vpop.permute.xlu1 %2792  ;;  %4131 = vmatpush3.bf16.msra.mxu0 %v4307_v56  ;;  %4141 = vmatpush3.bf16.msra.mxu1 %v4308_v34 }
 0x1a1   : > { %2754 = vst.msk [vmem:[#allocation3 + $0x8] sm:$0xff] %vm471_vm2, %v2751_v30  ;;  %v2487_v45 = vpack.c.bf16 %v2485_v22, %v2484_v49  ;;  %v2486_v24 = vld [vmem:[#allocation3 + $0x10] sm:$0x1]  ;;  %4142 = vmatprep.subr.bf16.mxu1 %v4309_v10  ;;  %4152 = vmatprep.subr.bf16.mxu0 %v4361_v9 }
 0x1a2   : > { %2778 = vst.msk [vmem:[#allocation3 + $0x8] sm:$0xff] %vm523_vm7, %v2771_v35  ;;  %v2488_v42 = vpack.c.bf16 %v2486_v24, %v2486_v24 }
 0x1a3   : > { %2801 = vst.msk [vmem:[#allocation3] sm:$0xff] %vm555_vm8, %v2793_v48  ;;  %4132 = vmatprep.mubr.msk.bf16.mxu0 %vm620_vm9, %v2487_v45  ;;  %v2795_v20 = vpop.permute.xlu0 %2794 }
 0x1a4   : > { %2755 = vst.msk [vmem:[#allocation3 + $0x10] sm:$0x1] %vm494_vm4, %v2752_v21  ;;  %4133 = vmatmul.mubr.msk.bf16.vlgmr.msra.gmra.mxu0 %vm620_vm9, %v2488_v42  ;;  %v2797_v3 = vpop.permute.xlu1 %2796  ;;  %4143 = vmatpush3.bf16.msra.mxu1 %v4309_v10 }
 0x1a5   : > { %2779 = vst.msk [vmem:[#allocation3 + $0x10] sm:$0x1] %vm526_vm5, %v2773_v28  ;;  %4144 = vmatprep.subr.bf16.mxu1 %v4310_v50  ;;  %4153 = vmatpush3.bf16.msra.mxu0 %v4312_v4 }
 0x1a6   : > { %2802 = vst.msk [vmem:[#allocation3 + $0x8] sm:$0xff] %vm555_vm8, %v2795_v20  ;;  %4154 = vmatprep.subr.bf16.mxu0 %v4361_v9  ;;  %4160 = vmatprep.mubr.msk.bf16.mxu0 %vm4362_vm10, %v4361_v9 }
 0x1a7   : > { %2803 = vst.msk [vmem:[#allocation3 + $0x10] sm:$0x1] %vm558_vm6, %v2797_v3 }
 0x1a8   : > { %4145 = vmatpush3.bf16.msra.mxu1 %v4310_v50 }
 0x1a9   : > { %4146 = vmatprep.subr.bf16.mxu1 %v4311_v40  ;;  %4155 = vmatpush3.bf16.msra.mxu0 %v4314_v13 }
 0x1aa   : > { %v2804_v62 = vld [vmem:[#allocation3] sm:$0xff]  ;;  %4156 = vmatprep.subr.bf16.mxu0 %v4361_v9 }
 0x1ac   : > { %4147 = vmatpush3.bf16.msra.mxu1 %v4311_v40 }
 0x1ad   : > { %v2805_v19 = vld [vmem:[#allocation3 + $0x8] sm:$0xff]  ;;  %4164 = vmatprep.subr.bf16.mxu1 %v4361_v9  ;;  %4157 = vmatpush3.bf16.msra.mxu0 %v4316_v23 }
 0x1ae   : > { %v2807_v6 = vpack.c.bf16 %v2805_v19, %v2804_v62  ;;  %v2806_v41 = vld [vmem:[#allocation3 + $0x10] sm:$0x1]  ;;  %4158 = vmatprep.subr.bf16.mxu0 %v4361_v9 }
 0x1af   : > { %v2808_v11 = vpack.c.bf16 %v2806_v41, %v2806_v41 }
 0x1b0   : > { %4148 = vmatprep.mubr.msk.bf16.mxu1 %vm620_vm9, %v2807_v6 }
 0x1b1   : > { %4149 = vmatmul.mubr.msk.bf16.vlgmr.msra.gmra.mxu1 %vm620_vm9, %v2808_v11  ;;  %4159 = vmatpush3.bf16.msra.mxu0 %v4318_v17 }
 0x1b2   : > { %4165 = vmatpush3.bf16.msra.mxu1 %v4313_v36  ;;  %4172 = vmatprep.mubr.msk.bf16.mxu1 %vm4362_vm10, %v4361_v9 }
 0x1b3   : > { %4166 = vmatprep.subr.bf16.mxu1 %v4361_v9  ;;  %4176 = vmatprep.subr.bf16.mxu0 %v4361_v9 }
 0x1b6   : > { %4167 = vmatpush3.bf16.msra.mxu1 %v4315_v63 }
 0x1b7   : > { %4168 = vmatprep.subr.bf16.mxu1 %v4361_v9 }
 0x1ba   : > { %4169 = vmatpush3.bf16.msra.mxu1 %v4317_v58 }
 0x1bb   : > { %4170 = vmatprep.subr.bf16.mxu1 %v4361_v9 }
 0x1be   : > { %4171 = vmatpush3.bf16.msra.mxu1 %v4319_v18 }
 0x1bf   : > { %4188 = vmatprep.subr.bf16.mxu1 %v4361_v9 }
 0x203   : > { %v4038_v14 = vpop.f32.mrf.mxu0 }
 0x205   : > { %v661_v25 = vpop.f32.mrf.mxu0 }
 0x206   : > { %v662_v57 = vadd.f32 %v5659_v61, %v661_v25 }
 0x207   : > { %v4039_v44 = vpop.f32.mrf.mxu0 }
 0x208   : > { %v675_v2 = vmax.f32 %v662_v57, 0.0 }
 0x209   : > { %v664_v55 = vpop.f32.mrf.mxu0 }
 0x20a   : > { %679 = vst.msk [vmem:[#allocation4] sm:$0xff] %vm678_vm11, %v675_v2  ;;  %v665_v37 = vadd.f32 %v5659_v61, %v664_v55 }
 0x20c   : > { %v676_v39 = vmax.f32 %v665_v37, 0.0 }
 0x20e   : > { %680 = vst.msk [vmem:[#allocation4 + $0x8] sm:$0xff] %vm678_vm11, %v676_v39 }
 0x215   : > { %v683_v26 = vld [vmem:[#allocation4] ss:$2 sm:$0xff]  ;;  %v685_v53 = vld [vmem:[#allocation4 + $0x1] ss:$2 sm:$0xff] }
 0x216   : > { %v4054_v8 = vpop.f32.mrf.mxu1  ;;  %v686_v33 = vmax.f32 %v683_v26, %v685_v53 }
 0x218   : > { %v984_v60 = vpop.f32.mrf.mxu1  ;;  %687 = vst.msk [vmem:[#allocation5] sm:$0xff] %vm678_vm11, %v686_v33 }
 0x219   : > { %v985_v54 = vadd.f32 %v5659_v61, %v984_v60 }
 0x21a   : > { %v4055_v29 = vpop.f32.mrf.mxu1 }
 0x21b   : > { %v998_v32 = vmax.f32 %v985_v54, 0.0 }
 0x21c   : > { %v987_v46 = vpop.f32.mrf.mxu1 }
 0x21d   : > { %1001 = vst.msk [vmem:[#allocation4] sm:$0xff] %vm678_vm11, %v998_v32  ;;  %v988_v31 = vadd.f32 %v5659_v61, %v987_v46 }
 0x21f   : > { %v999_v7 = vmax.f32 %v988_v31, 0.0 }
 0x221   : > { %1002 = vst.msk [vmem:[#allocation4 + $0x8] sm:$0xff] %vm678_vm11, %v999_v7 }
 0x228   : > { %v1004_v15 = vld [vmem:[#allocation4] ss:$2 sm:$0xff]  ;;  %v1005_v38 = vld [vmem:[#allocation4 + $0x1] ss:$2 sm:$0xff] }
 0x229   : > { %v1006_v0 = vmax.f32 %v1004_v15, %v1005_v38 }
 0x22b   : > { %v4070_v51 = vpop.f32.mrf.mxu0  ;;  %1007 = vst.msk [vmem:[#allocation5 + $0x8] sm:$0xff] %vm678_vm11, %v1006_v0 }
 0x22d   : > { %v1304_v52 = vpop.f32.mrf.mxu0 }
 0x22e   : > { %v1305_v59 = vadd.f32 %v5659_v61, %v1304_v52 }
 0x22f   : > { %v4071_v47 = vpop.f32.mrf.mxu0 }
 0x230   : > { %v1318_v56 = vmax.f32 %v1305_v59, 0.0 }
 0x231   : > { %v1307_v34 = vpop.f32.mrf.mxu0 }
 0x232   : > { %1321 = vst.msk [vmem:[#allocation4] sm:$0xff] %vm678_vm11, %v1318_v56  ;;  %v1308_v1 = vadd.f32 %v5659_v61, %v1307_v34 }
 0x234   : > { %v1319_v5 = vmax.f32 %v1308_v1, 0.0 }
 0x236   : > { %1322 = vst.msk [vmem:[#allocation4 + $0x8] sm:$0xff] %vm678_vm11, %v1319_v5 }
 0x23c   : > { %v4086_v16 = vpop.f32.mrf.mxu1 }
 0x23d   : > { %v1324_v12 = vld [vmem:[#allocation4] ss:$2 sm:$0xff]  ;;  %v1325_v27 = vld [vmem:[#allocation4 + $0x1] ss:$2 sm:$0xff] }
 0x23e   : > { %v1624_v35 = vpop.f32.mrf.mxu1  ;;  %v1326_v49 = vmax.f32 %v1324_v12, %v1325_v27  ;;  %v4321_v27 = vld [vmem:[%s5836_s5 + $0x78] sm:$0xff]  }
 0x23f   : > { %v1625_v43 = vadd.f32 %v5659_v61, %v1624_v35 }
 0x240   : > { %v4087_v10 = vpop.f32.mrf.mxu1  ;;  %1327 = vst.msk [vmem:[#allocation5 + $0x10] sm:$0xff] %vm678_vm11, %v1326_v49 }
 0x241   : > { %v1638_v30 = vmax.f32 %v1625_v43, 0.0  ;;  %v4322_v43 = vld [vmem:[%s5836_s5 + $0x50] sm:$0xff]  }
 0x242   : > { %v1627_v22 = vpop.f32.mrf.mxu1  ;;  %v4323_v10 = vld [vmem:[%s5836_s5 + $0x70] sm:$0xff]  }
 0x243   : > { %1641 = vst.msk [vmem:[#allocation4] sm:$0xff] %vm678_vm11, %v1638_v30  ;;  %v1628_v28 = vadd.f32 %v5659_v61, %v1627_v22  ;;  %v4324_v30 = vld [vmem:[%s5836_s5 + $0x48] sm:$0xff]  }
 0x244   : > { %v4325_v22 = vld [vmem:[%s5836_s5 + $0x68] sm:$0xff]  }
 0x245   : > { %v1639_v21 = vmax.f32 %v1628_v28, 0.0 }
 0x247   : > { %1642 = vst.msk [vmem:[#allocation4 + $0x8] sm:$0xff] %vm678_vm11, %v1639_v21 }
 0x24b   : > { %v4102_v48 = vpop.f32.mrf.mxu0 }
 0x24c   : > { %v4326_v48 = vld [vmem:[%s5836_s5 + $0x40] sm:$0xff]  }
 0x24d   : > { %v1944_v45 = vpop.f32.mrf.mxu0 }
 0x24e   : > { %v1945_v24 = vadd.f32 %v5659_v61, %v1944_v45  ;;  %v1644_v50 = vld [vmem:[#allocation4] ss:$2 sm:$0xff]  ;;  %v1645_v20 = vld [vmem:[#allocation4 + $0x1] ss:$2 sm:$0xff] }
 0x24f   : > { %v4103_v42 = vpop.f32.mrf.mxu0  ;;  %v1646_v62 = vmax.f32 %v1644_v50, %v1645_v20  ;;  %v4327_v45 = vld [vmem:[%s5836_s5 + $0x60] sm:$0xff]  }
 0x250   : > { %v1958_v3 = vmax.f32 %v1945_v24, 0.0 }
 0x251   : > { %v1947_v40 = vpop.f32.mrf.mxu0  ;;  %1647 = vst.msk [vmem:[#allocation5 + $0x18] sm:$0xff] %vm678_vm11, %v1646_v62 }
 0x252   : > { %1961 = vst.msk [vmem:[#allocation4] sm:$0xff] %vm678_vm11, %v1958_v3  ;;  %v1948_v19 = vadd.f32 %v5659_v61, %v1947_v40  ;;  %v4328_v3 = vld [vmem:[%s5836_s5 + $0x98] sm:$0xff]  }
 0x253   : > { %v4329_v40 = vld [vmem:[%s5836_s5 + $0xb8] sm:$0xff]  }
 0x254   : > { %v1959_v6 = vmax.f32 %v1948_v19, 0.0 }
 0x256   : > { %1962 = vst.msk [vmem:[#allocation4 + $0x8] sm:$0xff] %vm678_vm11, %v1959_v6  ;;  %v4330_v6 = vld [vmem:[%s5836_s5 + $0x90] sm:$0xff]  }
 0x257   : > { %v4118_v41 = vpop.f32.mrf.mxu1 }
 0x258   : > { %v2941_v56 = vld [vmem:[#allocation5 + $0x1] ss:$8 sm:$0xf]  ;;  %v2928_v34 = vld [vmem:[#allocation5] ss:$8 sm:$0xf] }
 0x259   : > { %v2264_v11 = vpop.f32.mrf.mxu1  ;;  %v3089_v24 = vld [vmem:[#allocation5 + $0x2] ss:$8 sm:$0xf]  ;;  %v3171_v42 = vld [vmem:[#allocation5 + $0x3] ss:$8 sm:$0xf] }
 0x25a   : > { %v2265_v4 = vadd.f32 %v5659_v61, %v2264_v11  ;;  %v4331_v41 = vld [vmem:[%s5836_s5 + $0xb0] sm:$0xff]   ;;  %v4332_v11 = vld [vmem:[%s5836_s5 + $0x88] sm:$0xff]  }
 0x25b   : > { %v4119_v36 = vpop.f32.mrf.mxu1 }
 0x25c   : > { %v2278_v13 = vmax.f32 %v2265_v4, 0.0  ;;  %v4333_v4 = vld [vmem:[%s5836_s5 + $0xa8] sm:$0xff]  }
 0x25d   : > { %v2267_v63 = vpop.f32.mrf.mxu1  ;;  %v1964_v23 = vld [vmem:[#allocation4] ss:$2 sm:$0xff]  ;;  %v1965_v58 = vld [vmem:[#allocation4 + $0x1] ss:$2 sm:$0xff] }
 0x25e   : > { %v2268_v17 = vadd.f32 %v5659_v61, %v2267_v63  ;;  %v1966_v18 = vmax.f32 %v1964_v23, %v1965_v58  ;;  %2281 = vst.msk [vmem:[#allocation4] sm:$0xff] %vm678_vm11, %v2278_v13  ;;  %v4334_v63 = vld [vmem:[%s5836_s5 + $0x80] sm:$0xff]  }
 0x25f   : > { %v4335_v23 = vld [vmem:[%s5836_s5 + $0xa0] sm:$0xff]  }
 0x260   : > { %v2279_v14 = vmax.f32 %v2268_v17, 0.0  ;;  %1967 = vst.msk [vmem:[#allocation5 + $0x20] sm:$0xff] %vm678_vm11, %v1966_v18  ;;  %v3253_v58 = vld [vmem:[#allocation5 + $0x4] ss:$8 sm:$0xf] }
 0x261   : > { %v3335_v17 = vld [vmem:[#allocation5 + $0x5] ss:$8 sm:$0xf] }
 0x262   : > { %2282 = vst.msk [vmem:[#allocation4 + $0x8] sm:$0xff] %vm678_vm11, %v2279_v14 }
 0x264   : > { %v4134_v25 = vpop.f32.mrf.mxu0 }
 0x265   : > { %v4336_v25 = vld [vmem:[%s5836_s5 + $0xd8] sm:$0xff]  }
 0x266   : > { %v2584_v57 = vpop.f32.mrf.mxu0 }
 0x267   : > { %v2585_v44 = vadd.f32 %v5659_v61, %v2584_v57  ;;  %v4337_v57 = vld [vmem:[%s5836_s5 + $0xf8] sm:$0xff]  }
 0x268   : > { %v4135_v2 = vpop.f32.mrf.mxu0 }
 0x269   : > { %v2598_v55 = vmax.f32 %v2585_v44, 0.0  ;;  %v2284_v39 = vld [vmem:[#allocation4] ss:$2 sm:$0xff]  ;;  %v2285_v26 = vld [vmem:[#allocation4 + $0x1] ss:$2 sm:$0xff] }
 0x26a   : > { %v2587_v37 = vpop.f32.mrf.mxu0  ;;  %v2286_v8 = vmax.f32 %v2284_v39, %v2285_v26  ;;  %v4340_v39 = vld [vmem:[%s5836_s5 + $0xc8] sm:$0xff]  }
 0x26b   : > { %v2588_v53 = vadd.f32 %v5659_v61, %v2587_v37  ;;  %2601 = vst.msk [vmem:[#allocation4] sm:$0xff] %vm678_vm11, %v2598_v55  ;;  %v4338_v55 = vld [vmem:[%s5836_s5 + $0xd0] sm:$0xff]   ;;  %v4341_v26 = vld [vmem:[%s5836_s5 + $0xe8] sm:$0xff]  }
 0x26c   : > { %2287 = vst.msk [vmem:[#allocation5 + $0x28] sm:$0xff] %vm678_vm11, %v2286_v8  ;;  %v4339_v37 = vld [vmem:[%s5836_s5 + $0xf0] sm:$0xff]  }
 0x26d   : > { %v2599_v33 = vmax.f32 %v2588_v53, 0.0 }
 0x26f   : > { %2602 = vst.msk [vmem:[#allocation4 + $0x8] sm:$0xff] %vm678_vm11, %v2599_v33  ;;  %v4342_v33 = vld [vmem:[%s5836_s5 + $0xc0] sm:$0xff]  }
 0x271   : > { %v4150_v60 = vpop.f32.mrf.mxu1 }
 0x272   : > { %v4343_v60 = vld [vmem:[%s5836_s5 + $0xe0] sm:$0xff]  }
 0x273   : > { %v2904_v54 = vpop.f32.mrf.mxu1 }
 0x274   : > { %v2905_v29 = vadd.f32 %v5659_v61, %v2904_v54  ;;  %v3417_v54 = vld [vmem:[#allocation5 + $0x6] ss:$8 sm:$0xf] }
 0x275   : > { %v4151_v32 = vpop.f32.mrf.mxu1 }
 0x276   : > { %v2918_v46 = vmax.f32 %v2905_v29, 0.0  ;;  %v2604_v7 = vld [vmem:[#allocation4] ss:$2 sm:$0xff]  ;;  %v2605_v15 = vld [vmem:[#allocation4 + $0x1] ss:$2 sm:$0xff] }
 0x277   : > { %v2907_v31 = vpop.f32.mrf.mxu1  ;;  %v2606_v51 = vmax.f32 %v2604_v7, %v2605_v15  ;;  %v3499_v29 = vld [vmem:[#allocation5 + $0x7] ss:$8 sm:$0xf] }
 0x278   : > { %v2908_v38 = vadd.f32 %v5659_v61, %v2907_v31  ;;  %2921 = vst.msk [vmem:[#allocation4] sm:$0xff] %vm678_vm11, %v2918_v46  ;;  %v4320_v61 = vld [vmem:[%s5836_s5 + $0x58] sm:$0xff]  }
 0x279   : > { %2607 = vst.msk [vmem:[#allocation5 + $0x30] sm:$0xff] %vm678_vm11, %v2606_v51 }
 0x27a   : > { %v2919_v0 = vmax.f32 %v2908_v38, 0.0 }
 0x27c   : > { %2922 = vst.msk [vmem:[#allocation4 + $0x8] sm:$0xff] %vm678_vm11, %v2919_v0 }
 0x283   : > { %v2924_v52 = vld [vmem:[#allocation4] ss:$2 sm:$0xff]  ;;  %v2925_v59 = vld [vmem:[#allocation4 + $0x1] ss:$2 sm:$0xff] }
 0x284   : > { %v2926_v47 = vmax.f32 %v2924_v52, %v2925_v59 }
 0x286   : > { %2927 = vst.msk [vmem:[#allocation5 + $0x38] sm:$0xff] %vm678_vm11, %v2926_v47 }
 0x28d   : > { %v2942_v1 = vld [vmem:[#allocation5 + $0x1] ss:$8 sm:$0xf0]  ;;  %v2929_v5 = vld [vmem:[#allocation5] ss:$8 sm:$0xf0] }
 0x28e   : > { %v2943_v16 = vor.u32 %v2942_v1, %v2941_v56  ;;  %v2930_v12 = vor.u32 %v2929_v5, %v2928_v34  ;;  %v3090_v28 = vld [vmem:[#allocation5 + $0x2] ss:$8 sm:$0xf0]  ;;  %v3172_v21 = vld [vmem:[#allocation5 + $0x3] ss:$8 sm:$0xf0] }
 0x28f   : > { %v3091_v50 = vor.u32 %v3090_v28, %v3089_v24  ;;  %v3173_v20 = vor.u32 %v3172_v21, %v3171_v42  ;;  %v3254_v36 = vld [vmem:[#allocation5 + $0x4] ss:$8 sm:$0xf0]  ;;  %v3336_v13 = vld [vmem:[#allocation5 + $0x5] ss:$8 sm:$0xf0] }
 0x290   : > { %v2944_v35 = vpack.c.bf16 %v2943_v16, %v2943_v16  ;;  %v2931_v49 = vpack.c.bf16 %v2930_v12, %v2930_v12  ;;  %v3255_v18 = vor.u32 %v3254_v36, %v3253_v58  ;;  %v3337_v14 = vor.u32 %v3336_v13, %v3335_v17  ;;  %v3418_v53 = vld [vmem:[#allocation5 + $0x6] ss:$8 sm:$0xf0]  ;;  %v3500_v8 = vld [vmem:[#allocation5 + $0x7] ss:$8 sm:$0xf0] }
 0x291   : > { %v3092_v62 = vpack.c.bf16 %v3091_v50, %v3091_v50  ;;  %v3174_v19 = vpack.c.bf16 %v3173_v20, %v3173_v20  ;;  %v3419_v32 = vor.u32 %v3418_v53, %v3417_v54  ;;  %v3501_v46 = vor.u32 %v3500_v8, %v3499_v29 }
 0x292   : > { %4161 = vmatmul.mubr.msk.bf16.vlgmr.msra.gmra.mxu0 %vm678_vm11, %v2944_v35  ;;  %4173 = vmatmul.mubr.msk.bf16.vlgmr.msra.gmra.mxu1 %vm678_vm11, %v2931_v49  ;;  %v3256_v44 = vpack.c.bf16 %v3255_v18, %v3255_v18  ;;  %v3338_v2 = vpack.c.bf16 %v3337_v14, %v3337_v14  ;;  %v3917_v18 = vld [vmem:[#allocation6] ss:$0 sm:$0xff] }
 0x293   : > { %4177 = vmatpush3.bf16.msra.mxu0 %v4320_v61  ;;  %4189 = vmatpush3.bf16.msra.mxu1 %v4321_v27  ;;  %v3420_v31 = vpack.c.bf16 %v3419_v32, %v3419_v32  ;;  %v3502_v7 = vpack.c.bf16 %v3501_v46, %v3501_v46 }
 0x294   : > { %4178 = vmatprep.subr.bf16.mxu0 %v4361_v9  ;;  %4190 = vmatprep.subr.bf16.mxu1 %v4361_v9 }
 0x295   : > { %4184 = vmatprep.mubr.msk.bf16.mxu0 %vm4362_vm10, %v4361_v9  ;;  %4196 = vmatprep.mubr.msk.bf16.mxu1 %vm4362_vm10, %v4361_v9 }
 0x297   : > { %4179 = vmatpush3.bf16.msra.mxu0 %v4322_v43  ;;  %4191 = vmatpush3.bf16.msra.mxu1 %v4323_v10 }
 0x298   : > { %4180 = vmatprep.subr.bf16.mxu0 %v4361_v9  ;;  %4192 = vmatprep.subr.bf16.mxu1 %v4361_v9 }
 0x29b   : > { %4181 = vmatpush3.bf16.msra.mxu0 %v4324_v30  ;;  %4193 = vmatpush3.bf16.msra.mxu1 %v4325_v22 }
 0x29c   : > { %4182 = vmatprep.subr.bf16.mxu0 %v4361_v9  ;;  %4194 = vmatprep.subr.bf16.mxu1 %v4361_v9 }
 0x29f   : > { %4183 = vmatpush3.bf16.msra.mxu0 %v4326_v48  ;;  %4195 = vmatpush3.bf16.msra.mxu1 %v4327_v45 }
 0x2a0   : > { %4200 = vmatprep.subr.bf16.mxu0 %v4361_v9  ;;  %4212 = vmatprep.subr.bf16.mxu1 %v4361_v9 }
 0x2a2   : > { %4185 = vmatmul.mubr.msk.bf16.vlgmr.msra.gmra.mxu0 %vm678_vm11, %v3092_v62  ;;  %4197 = vmatmul.mubr.msk.bf16.vlgmr.msra.gmra.mxu1 %vm678_vm11, %v3174_v19  ;;  %v3915_v62 = vld [vmem:[%s5837_s6] ss:$0 sm:$0xff] }
 0x2a3   : > { %4201 = vmatpush3.bf16.msra.mxu0 %v4328_v3  ;;  %4213 = vmatpush3.bf16.msra.mxu1 %v4329_v40 }
 0x2a4   : > { %4202 = vmatprep.subr.bf16.mxu0 %v4361_v9  ;;  %4214 = vmatprep.subr.bf16.mxu1 %v4361_v9 }
 0x2a5   : > { %4208 = vmatprep.mubr.msk.bf16.mxu0 %vm4362_vm10, %v4361_v9  ;;  %4220 = vmatprep.mubr.msk.bf16.mxu1 %vm4362_vm10, %v4361_v9 }
 0x2a7   : > { %4203 = vmatpush3.bf16.msra.mxu0 %v4330_v6  ;;  %4215 = vmatpush3.bf16.msra.mxu1 %v4331_v41 }
 0x2a8   : > { %4204 = vmatprep.subr.bf16.mxu0 %v4361_v9  ;;  %4216 = vmatprep.subr.bf16.mxu1 %v4361_v9 }
 0x2ab   : > { %4205 = vmatpush3.bf16.msra.mxu0 %v4332_v11  ;;  %4217 = vmatpush3.bf16.msra.mxu1 %v4333_v4 }
 0x2ac   : > { %4206 = vmatprep.subr.bf16.mxu0 %v4361_v9  ;;  %4218 = vmatprep.subr.bf16.mxu1 %v4361_v9 }
 0x2af   : > { %4207 = vmatpush3.bf16.msra.mxu0 %v4334_v63  ;;  %4219 = vmatpush3.bf16.msra.mxu1 %v4335_v23  ;;  %v3916_v23 = vld [vmem:[%s5838_s7] ss:$0 sm:$0xff] }
 0x2b0   : > { %4224 = vmatprep.subr.bf16.mxu0 %v4361_v9  ;;  %4236 = vmatprep.subr.bf16.mxu1 %v4361_v9 }
 0x2b2   : > { %4209 = vmatmul.mubr.msk.bf16.vlgmr.msra.gmra.mxu0 %vm678_vm11, %v3256_v44  ;;  %4221 = vmatmul.mubr.msk.bf16.vlgmr.msra.gmra.mxu1 %vm678_vm11, %v3338_v2 }
 0x2b3   : > { %4225 = vmatpush3.bf16.msra.mxu0 %v4336_v25  ;;  %4237 = vmatpush3.bf16.msra.mxu1 %v4337_v57 }
 0x2b4   : > { %4226 = vmatprep.subr.bf16.mxu0 %v4361_v9  ;;  %4238 = vmatprep.subr.bf16.mxu1 %v4361_v9 }
 0x2b5   : > { %4232 = vmatprep.mubr.msk.bf16.mxu0 %vm4362_vm10, %v4361_v9  ;;  %4244 = vmatprep.mubr.msk.bf16.mxu1 %vm4362_vm10, %v4361_v9 }
 0x2b7   : > { %4227 = vmatpush3.bf16.msra.mxu0 %v4338_v55  ;;  %4239 = vmatpush3.bf16.msra.mxu1 %v4339_v37 }
 0x2b8   : > { %4228 = vmatprep.subr.bf16.mxu0 %v4361_v9  ;;  %4240 = vmatprep.subr.bf16.mxu1 %v4361_v9 }
 0x2bb   : > { %4229 = vmatpush3.bf16.msra.mxu0 %v4340_v39  ;;  %4241 = vmatpush3.bf16.msra.mxu1 %v4341_v26 }
 0x2bc   : > { %4230 = vmatprep.subr.bf16.mxu0 %v4361_v9  ;;  %4242 = vmatprep.subr.bf16.mxu1 %v4361_v9 }
 0x2bf   : > { %4231 = vmatpush3.bf16.msra.mxu0 %v4342_v33  ;;  %4243 = vmatpush3.bf16.msra.mxu1 %v4343_v60 }
 0x2c2   : > { %4233 = vmatmul.mubr.msk.bf16.vlgmr.msra.gmra.mxu0 %vm678_vm11, %v3420_v31  ;;  %4245 = vmatmul.mubr.msk.bf16.vlgmr.msra.gmra.mxu1 %vm678_vm11, %v3502_v7 }
 0x352   : > { %v3015_v15 = vpop.f32.mrf.mxu0  ;;  %v3082_v38 = vpop.f32.mrf.mxu1 }
 0x353   : > { %v3083_v30 = vadd.f32 %v3082_v38, %v3015_v15 }
 0x354   : > { %v4162_v51 = vpop.f32.mrf.mxu0  ;;  %v4174_v0 = vpop.f32.mrf.mxu1 }
 0x356   : > { %v3018_v52 = vpop.f32.mrf.mxu0  ;;  %v3085_v59 = vpop.f32.mrf.mxu1 }
 0x358   : > { %v4163_v47 = vpop.f32.mrf.mxu0  ;;  %v4175_v56 = vpop.f32.mrf.mxu1 }
 0x362   : > { %v3163_v34 = vpop.f32.mrf.mxu0  ;;  %v3245_v9 = vpop.f32.mrf.mxu1 }
 0x363   : > { %v3169_v21 = vadd.f32 %v3163_v34, %v3083_v30 }
 0x364   : > { %v4186_v1 = vpop.f32.mrf.mxu0  ;;  %v4198_v5 = vpop.f32.mrf.mxu1 }
 0x365   : > { %v3251_v24 = vadd.f32 %v3245_v9, %v3169_v21 }
 0x366   : > { %v3166_v16 = vpop.f32.mrf.mxu0  ;;  %v3248_v12 = vpop.f32.mrf.mxu1 }
 0x368   : > { %v4187_v61 = vpop.f32.mrf.mxu0  ;;  %v4199_v27 = vpop.f32.mrf.mxu1 }
 0x372   : > { %v3327_v35 = vpop.f32.mrf.mxu0  ;;  %v3409_v49 = vpop.f32.mrf.mxu1 }
 0x373   : > { %v3333_v42 = vadd.f32 %v3327_v35, %v3251_v24 }
 0x374   : > { %v4210_v43 = vpop.f32.mrf.mxu0  ;;  %v4222_v10 = vpop.f32.mrf.mxu1 }
 0x375   : > { %v3415_v50 = vadd.f32 %v3409_v49, %v3333_v42 }
 0x376   : > { %v3330_v22 = vpop.f32.mrf.mxu0  ;;  %v3412_v28 = vpop.f32.mrf.mxu1 }
 0x378   : > { %v4211_v48 = vpop.f32.mrf.mxu0  ;;  %v4223_v45 = vpop.f32.mrf.mxu1 }
 0x382   : > { %v3491_v20 = vpop.f32.mrf.mxu0  ;;  %v3573_v3 = vpop.f32.mrf.mxu1 }
 0x383   : > { %v3497_v40 = vadd.f32 %v3491_v20, %v3415_v50 }
 0x384   : > { %v4234_v19 = vpop.f32.mrf.mxu0  ;;  %v4246_v6 = vpop.f32.mrf.mxu1 }
 0x385   : > { %v3579_v41 = vadd.f32 %v3573_v3, %v3497_v40 }
 0x386   : > { %v3494_v11 = vpop.f32.mrf.mxu0  ;;  %v3576_v4 = vpop.f32.mrf.mxu1 }
 0x387   : > { %v3587_v36 = vadd.f32 %v3915_v62, %v3579_v41 }
 0x388   : > { %v4235_v13 = vpop.f32.mrf.mxu0  ;;  %v4247_v63 = vpop.f32.mrf.mxu1 }
 0x389   : > { %v3588_v58 = vmax.f32 %v3587_v36, 0.0 }
 0x38b   : > { %v3596_v17 = vmul.f32 %v3916_v23, %v3588_v58 }
 0x38d   : > { %3597 = vadd.xlane.f32.xlu0 %v3596_v17 }
 0x416   : > { %v3598_v14 = vpop.xlane.xlu0 %3597 }
 0x417   : > { %v3606_v25 = vadd.f32 %v3917_v18, %v3598_v14 }
 0x419   : > { %v3607_v57 = vand.u32 2147483647, %v3606_v25  ;;  %vm3611_vm13 = vcmp.ge.f32.partialorder %v3606_v25, 0.0 }
 0x41b   : > { %v3608_v44 = vsub.f32 0.0, %v3607_v57 }
 0x41d   : > { %v3609_v2 = vmul.f32 1.442695, %v3608_v44 }
 0x41f   : > { %4344 = vpow2.f32 %v3609_v2 }
 0x42c   : > { %v4345_v55 = vpop.eup %4344 }
 0x42d   : > { %v3612_v37 = vadd.f32 1.0, %v4345_v55 }
 0x42f   : > { %4346 = vrcp.f32 %v3612_v37 }
 0x43c   : > { %v4347_v39 = vpop.eup %4346 }
 0x43d   : > { %v3615_v26 = vmul.f32 %v4347_v39, %v4345_v55 }
 0x43f   : > { %v3616_v53 = vsel %vm3611_vm13, %v4347_v39, %v3615_v26 }
 0x440   : > { %3618 = vst.msk [vmem:[%s337_s28] sm:$0xff] %vm3617_vm12, %v3616_v53 }
 0x441 PF: > { %s21_s11 = sadd.s32 1, %s4356_s11  }
 0x442   : > { %p18_p5 = scmp.ge.s32.totalorder %s21_s11, 4  }
 0x444   :  { %20 = sbr.rel (!%p18_p5) target bundleno = 3 (0x3), region = 125 }

</bundles_post_ra>
